<compile_context>
chip_gen: v7x
topology: tpu7x:2x2x1
jax: 0.10.0
libtpu: 0.0.40
codegen_flags: <defaults>
</compile_context>

<pallas_src>
import functools
import math

import jax
import jax.numpy as jnp
from jax.experimental import pallas as pl
from jax.experimental.pallas import tpu as pltpu

_OUT_DIM = 3                        # real width of the final projection
_OUT_PAD = 128                      # lane-dense padded width for the final store


# ------------------------ per-generation tuning knobs ------------------------

def _tpu_vmem_capacity_bytes():
    try:
        info = pltpu.get_tpu_info()
        cap = getattr(info, "vmem_capacity_bytes", None)
        if cap:
            return int(cap)
    except Exception:
        pass
    return None


_VMEM_CAP = _tpu_vmem_capacity_bytes()
if _VMEM_CAP is not None and _VMEM_CAP <= 64 * 1024 * 1024:
    # v7x: 64 MiB physical per TensorCore -> leave headroom for spills/scratch.
    _VMEM_LIMIT = 48 * 1024 * 1024
    _ROW_TILE = 256
elif _VMEM_CAP is not None:
    # v5e / v6e: 128 MiB physical -> allow larger scoped limit + bigger tiles.
    _VMEM_LIMIT = 100 * 1024 * 1024
    _ROW_TILE = 512
else:
    # Unknown backend: conservative values known to compile everywhere.
    _VMEM_LIMIT = 64 * 1024 * 1024
    _ROW_TILE = 512


# -------- optional single-buffering of grid-invariant operands (probed) ------

_BUFFERED_1_OK = None


def _probe_buffered_1():
    """Check that pl.BlockSpec(..., pipeline_mode=pl.Buffered(1)) works here."""
    try:
        def k(x_ref, o_ref):
            o_ref[...] = x_ref[...] + 1.0

        x = jnp.zeros((8, 128), jnp.float32)
        out = pl.pallas_call(
            k,
            out_shape=jax.ShapeDtypeStruct((16, 128), jnp.float32),
            grid=(2,),
            in_specs=[pl.BlockSpec((8, 128), lambda i: (0, 0),
                                   pipeline_mode=pl.Buffered(1))],
            out_specs=pl.BlockSpec((8, 128), lambda i: (i, 0)),
        )(x)
        jax.block_until_ready(out)
        return bool(jnp.all(out == 1.0))
    except Exception:
        return False


def _buffered_1_ok():
    global _BUFFERED_1_OK
    if _BUFFERED_1_OK is None:
        _BUFFERED_1_OK = _probe_buffered_1()
    return _BUFFERED_1_OK


def _const_spec(block_shape, index_map):
    """BlockSpec for a grid-invariant operand; single-buffered when supported."""
    if _buffered_1_ok():
        return pl.BlockSpec(block_shape, index_map, pipeline_mode=pl.Buffered(1))
    return pl.BlockSpec(block_shape, index_map)


# --------------------------------- helpers -----------------------------------

def _row_tiling(M):
    """(padded_M, row_tile): big tiles for big M, full-M single tile otherwise."""
    if M >= _ROW_TILE:
        Mp = pl.cdiv(M, _ROW_TILE) * _ROW_TILE
        return Mp, _ROW_TILE
    if M >= 128:
        Mp = ((M + 127) // 128) * 128
        return Mp, 128
    Mp = ((M + 7) // 8) * 8
    return Mp, Mp


def _pad_rows(x, Mp):
    M = x.shape[0]
    return x if Mp == M else jnp.pad(x, ((0, Mp - M), (0, 0)))


def _layernorm(x, g, b, eps):
    mu = jnp.mean(x, axis=-1, keepdims=True)
    var = jnp.mean(jnp.square(x - mu), axis=-1, keepdims=True)
    return (x - mu) * jax.lax.rsqrt(var + eps) * g + b


# ----------------------- fused LN + single matmul (QKV) ----------------------

def _ln_linear_kernel(x_ref, g_ref, b_ref, w_ref, wb_ref, o_ref, *, eps):
    ln = _layernorm(x_ref[...], g_ref[...], b_ref[...], eps)
    y = jnp.dot(ln.astype(jnp.bfloat16), w_ref[...],
                preferred_element_type=jnp.float32) + wb_ref[...]
    o_ref[...] = y.astype(o_ref.dtype)


def ln_linear(x, g, b, w, wb, *, eps=1e-5, out_dtype=jnp.float32):
    M, E = x.shape
    N = w.shape[1]
    Mp, tm = _row_tiling(M)
    xp = _pad_rows(x, Mp)
    out = pl.pallas_call(
        functools.partial(_ln_linear_kernel, eps=eps),
        out_shape=jax.ShapeDtypeStruct((Mp, N), out_dtype),
        grid=(Mp // tm,),
        in_specs=[
            pl.BlockSpec((tm, E), lambda i: (i, 0)),
            _const_spec((1, E), lambda i: (0, 0)),
            _const_spec((1, E), lambda i: (0, 0)),
            _const_spec((E, N), lambda i: (0, 0)),
            _const_spec((1, N), lambda i: (0, 0)),
        ],
        out_specs=pl.BlockSpec((tm, N), lambda i: (i, 0)),
        compiler_params=pltpu.CompilerParams(
            dimension_semantics=("parallel",),
            vmem_limit_bytes=_VMEM_LIMIT),
    )(xp, g.reshape(1, E), b.reshape(1, E), w, wb.reshape(1, N))
    return out if Mp == M else out[:M]


# ------------- fused LN + matmul + activation + matmul (+residual) -----------
# Used for both the MLP block (gelu_new, +residual) and the output head (relu).

def _ln_mlp_kernel(x_ref, g_ref, b_ref, w1_ref, b1_ref, w2_ref, b2_ref, o_ref,
                   *, eps, activation, add_residual):
    x = x_ref[...]
    ln = _layernorm(x, g_ref[...], b_ref[...], eps)
    h = jnp.dot(ln.astype(jnp.bfloat16), w1_ref[...],
                preferred_element_type=jnp.float32) + b1_ref[...]
    if activation == "gelu_new":                      # GPT-2 tanh approximation
        c = math.sqrt(2.0 / math.pi)
        h = 0.5 * h * (1.0 + jnp.tanh(c * (h + 0.044715 * h * h * h)))
    elif activation == "relu":
        h = jnp.maximum(h, 0.0)
    y = jnp.dot(h.astype(jnp.bfloat16), w2_ref[...],
                preferred_element_type=jnp.float32) + b2_ref[...]
    if add_residual:
        y = x + y
    o_ref[...] = y.astype(o_ref.dtype)
    # TODO(synk): K/N-tile w1/w2 (grid axis + accumulator) for E >= ~1536 so the
    # full weight pair does not have to stay VMEM-resident on v7x's 64 MiB.


def ln_mlp(x, g, b, w1, b1, w2, b2, *, activation, add_residual, eps=1e-5):
    M, E = x.shape
    N1, N2 = w1.shape[1], w2.shape[1]
    Mp, tm = _row_tiling(M)
    xp = _pad_rows(x, Mp)
    out = pl.pallas_call(
        functools.partial(_ln_mlp_kernel, eps=eps, activation=activation,
                          add_residual=add_residual),
        out_shape=jax.ShapeDtypeStruct((Mp, N2), jnp.float32),
        grid=(Mp // tm,),
        in_specs=[
            pl.BlockSpec((tm, E), lambda i: (i, 0)),
            _const_spec((1, E), lambda i: (0, 0)),
            _const_spec((1, E), lambda i: (0, 0)),
            _const_spec((E, N1), lambda i: (0, 0)),
            _const_spec((1, N1), lambda i: (0, 0)),
            _const_spec((N1, N2), lambda i: (0, 0)),
            _const_spec((1, N2), lambda i: (0, 0)),
        ],
        out_specs=pl.BlockSpec((tm, N2), lambda i: (i, 0)),
        compiler_params=pltpu.CompilerParams(
            dimension_semantics=("parallel",),
            vmem_limit_bytes=_VMEM_LIMIT),
    )(xp, g.reshape(1, E), b.reshape(1, E), w1, b1.reshape(1, N1),
      w2, b2.reshape(1, N2))
    return out if Mp == M else out[:M]


# ------------- fused causal MHA + output projection + residual add -----------
# Grid = (batch, q-tiles).  The bf16 (S, 3E) qkv slab of one batch stays VMEM-
# resident across its q-tiles; each head's context is projected immediately
# (acc += (p_h @ v_h) @ proj_w[h*Dh:(h+1)*Dh, :]) so there is no concat / lane
# relayout and every MXU output is lane-dense (N = E).

def _attn_proj_res_kernel(qkv_ref, res_ref, pw_ref, pb_ref, o_ref,
                          *, n_head, scale):
    S = qkv_ref.shape[0]
    tq, E = res_ref.shape
    Dh = E // n_head
    qi = pl.program_id(1)
    q_start = pl.multiple_of(qi * tq, tq)

    q_rows = qkv_ref[pl.ds(q_start, tq), :]               # (tq, 3E) bf16
    q_slab = q_rows[:, :E] * scale                         # scale folded into Q
    kv = qkv_ref[...]                                      # (S, 3E) bf16
    k_slab = kv[:, E:2 * E]
    v_slab = kv[:, 2 * E:]

    row = jax.lax.broadcasted_iota(jnp.int32, (tq, S), 0) + qi * tq
    col = jax.lax.broadcasted_iota(jnp.int32, (tq, S), 1)
    causal = col <= row

    acc = jnp.zeros((tq, E), jnp.float32)
    # Static unroll over heads keeps all lane slices static (Dh < 128 lanes);
    # the accumulator chain serializes per-head working sets.
    # TODO(synk): for large n_head / long S, batch heads into 128/256-lane
    # groups (batched dot_general) and KV-tile with an online softmax.
    for h in range(n_head):
        qh = q_slab[:, h * Dh:(h + 1) * Dh]                # (tq, Dh) bf16
        kh = k_slab[:, h * Dh:(h + 1) * Dh]                # (S,  Dh) bf16
        vh = v_slab[:, h * Dh:(h + 1) * Dh]                # (S,  Dh) bf16
        # q . k^T without materializing k.T (contract Dh of both operands)
        s = jax.lax.dot_general(qh, kh, (((1,), (1,)), ((), ())),
                                preferred_element_type=jnp.float32)
        s = jnp.where(causal, s, -1e30)
        m = jnp.max(s, axis=-1, keepdims=True)
        e = jnp.exp(s - m)
        p = e / jnp.sum(e, axis=-1, keepdims=True)         # exact softmax
        ctx = jnp.dot(p.astype(jnp.bfloat16), vh,
                      preferred_element_type=jnp.float32)  # (tq, Dh)
        acc = acc + jnp.dot(ctx.astype(jnp.bfloat16),
                            pw_ref[h * Dh:(h + 1) * Dh, :],
                            preferred_element_type=jnp.float32)
    o_ref[...] = (res_ref[...] + acc + pb_ref[...]).astype(o_ref.dtype)


def _q_tile(seq):
    for t in (256, 128):
        if seq % t == 0:
            return t
    return seq


def attn_block(qkv, x_res, proj_w, proj_b, *, batch, seq, n_head):
    M, E = x_res.shape
    assert M == batch * seq, "flattened rows must equal batch*seq"
    assert seq % 8 == 0, "sequence length must be a multiple of 8"
    assert E % n_head == 0, "embedding dim must divide evenly into heads"
    tq = _q_tile(seq)
    nq = seq // tq
    scale = 1.0 / math.sqrt(E // n_head)
    return pl.pallas_call(
        functools.partial(_attn_proj_res_kernel, n_head=n_head, scale=scale),
        out_shape=jax.ShapeDtypeStruct((M, E), jnp.float32),
        grid=(batch, nq),
        in_specs=[
            pl.BlockSpec((seq, 3 * E), lambda b, q: (b, 0)),          # bf16 qkv
            pl.BlockSpec((tq, E), lambda b, q: (b * nq + q, 0)),      # residual
            _const_spec((E, E), lambda b, q: (0, 0)),                 # proj w
            _const_spec((1, E), lambda b, q: (0, 0)),                 # proj b
        ],
        out_specs=pl.BlockSpec((tq, E), lambda b, q: (b * nq + q, 0)),
        compiler_params=pltpu.CompilerParams(
            dimension_semantics=("parallel", "parallel"),
            vmem_limit_bytes=_VMEM_LIMIT),
    )(qkv, x_res, proj_w, proj_b.reshape(1, E))


# -------------------------- parameter construction --------------------------

def init_params(key, *, n_layer, n_embd, n_inner, n_positions):
    def normal(key, shape, scale=0.02):
        return scale * jax.random.normal(key, shape, dtype=jnp.float32)

    keys = iter(jax.random.split(key, 4 * n_layer + 4))
    out2_w = normal(next(keys), (n_embd, _OUT_DIM))
    out2_w = jnp.pad(out2_w, ((0, 0), (0, _OUT_PAD - _OUT_DIM)))   # lane-dense head
    params = {
        "wpe": normal(next(keys), (n_positions, n_embd)),
        "lnf_g": jnp.ones((n_embd,), jnp.float32),
        "lnf_b": jnp.zeros((n_embd,), jnp.float32),
        # out_proj = Linear(E,E) -> ReLU -> Linear(E,3)  (matmul weights in bf16)
        "out1_w": normal(next(keys), (n_embd, n_embd)).astype(jnp.bfloat16),
        "out1_b": jnp.zeros((n_embd,), jnp.float32),
        "out2_w": out2_w.astype(jnp.bfloat16),
        "out2_b": jnp.zeros((_OUT_PAD,), jnp.float32),
        "layers": [],
    }
    for _ in range(n_layer):
        params["layers"].append({
            "ln1_g": jnp.ones((n_embd,), jnp.float32),
            "ln1_b": jnp.zeros((n_embd,), jnp.float32),
            "qkv_w": normal(next(keys), (n_embd, 3 * n_embd)).astype(jnp.bfloat16),
            "qkv_b": jnp.zeros((3 * n_embd,), jnp.float32),
            "proj_w": normal(next(keys), (n_embd, n_embd)).astype(jnp.bfloat16),
            "proj_b": jnp.zeros((n_embd,), jnp.float32),
            "ln2_g": jnp.ones((n_embd,), jnp.float32),
            "ln2_b": jnp.zeros((n_embd,), jnp.float32),
            "fc_w": normal(next(keys), (n_embd, n_inner)).astype(jnp.bfloat16),
            "fc_b": jnp.zeros((n_inner,), jnp.float32),
            "mproj_w": normal(next(keys), (n_inner, n_embd)).astype(jnp.bfloat16),
            "mproj_b": jnp.zeros((n_embd,), jnp.float32),
        })
    return params


# ------------------------------- forward pass --------------------------------

def transformer_module_forward(params, embeddings, *, n_head):
    """Mirrors TransformerModule.forward: returns (embeddings, output_embeddings)."""
    B, S, E = embeddings.shape
    assert S <= params["wpe"].shape[0], "sequence longer than position table"
    assert S % 8 == 0 and E % 128 == 0 and E % n_head == 0

    # inputs_embeds + position embeddings (GPT-2, no token ids)
    h = embeddings + params["wpe"][:S][None, :, :]
    x = h.reshape(B * S, E)

    for lyr in params["layers"]:
        # --- attention block:  LN1 + QKV (bf16 slab) -> MHA + proj + residual ---
        qkv = ln_linear(x, lyr["ln1_g"], lyr["ln1_b"], lyr["qkv_w"], lyr["qkv_b"],
                        out_dtype=jnp.bfloat16)
        x = attn_block(qkv, x, lyr["proj_w"], lyr["proj_b"],
                       batch=B, seq=S, n_head=n_head)
        # --- MLP block:  LN2 + fc + gelu_new + mproj + residual (one kernel) ---
        x = ln_mlp(x, lyr["ln2_g"], lyr["ln2_b"],
                   lyr["fc_w"], lyr["fc_b"], lyr["mproj_w"], lyr["mproj_b"],
                   activation="gelu_new", add_residual=True)

    # --- head: LN_f + Linear(E,E) + ReLU + Linear(E, 3-padded-to-128) ---
    y = ln_mlp(x, params["lnf_g"], params["lnf_b"],
               params["out1_w"], params["out1_b"],
               params["out2_w"], params["out2_b"],
               activation="relu", add_residual=False)
    y = y[:, :_OUT_DIM]
    return embeddings, y.reshape(B, S, _OUT_DIM)


# ----------------------------------- main ------------------------------------

if __name__ == "__main__":
    # Small shapes consistent with the module (scaled-down GPT-2):
    B, S = 2, 8
    E = 128          # n_embd / hidden_size (scaled down from 768)
    N_HEAD = 8       # matches GPT2Config(n_head=8)
    N_LAYER = 2      # scaled down from 12
    N_INNER = 4 * E
    N_POSITIONS = 64

    _buffered_1_ok()   # run the single-buffering feature probe eagerly

    key = jax.random.PRNGKey(0)
    pkey, xkey = jax.random.split(key)
    params = init_params(pkey, n_layer=N_LAYER, n_embd=E,
                         n_inner=N_INNER, n_positions=N_POSITIONS)
    embeddings = jax.random.normal(xkey, (B, S, E), dtype=jnp.float32)

    fwd = jax.jit(functools.partial(transformer_module_forward, n_head=N_HEAD))
    emb_out, summary = fwd(params, embeddings)
    jax.block_until_ready((emb_out, summary))

    assert emb_out.shape == (B, S, E)
    assert summary.shape == (B, S, 3)
    assert bool(jnp.all(jnp.isfinite(summary)))
    print("KERNEL_OK")
</pallas_src>

<mosaic_0001>
module attributes {stable_mosaic.version = 11 : i64} {
  func.func @k(%arg0: i32, %arg1: memref<8x128xf32, #tpu.memory_space<vmem>>, %arg2: memref<8x128xf32, #tpu.memory_space<vmem>>) attributes {dimension_semantics = [#tpu.dimension_semantics<arbitrary>], iteration_bounds = array<i64: 2>, scalar_prefetch = 0 : i64, scratch_operands = 0 : i64, tpu.core_type = #tpu.core_type<tc>, window_params = [{pipeline_mode = #tpu.pipeline_mode<synchronous>, transform_indices = @transform_0, window_bounds = array<i64: 8, 128>}, {transform_indices = @transform_1, window_bounds = array<i64: 8, 128>}]} {
    %c0 = arith.constant 0 : index
    %c0_0 = arith.constant 0 : index
    %0 = vector.load %arg1[%c0, %c0_0] : memref<8x128xf32, #tpu.memory_space<vmem>>, vector<8x128xf32>
    %cst = arith.constant 1.000000e+00 : f32
    %1 = vector.broadcast %cst : f32 to vector<8x128xf32>
    %2 = arith.addf %0, %1 : vector<8x128xf32>
    %c0_1 = arith.constant 0 : index
    %c0_2 = arith.constant 0 : index
    %3 = vector.load %arg2[%c0_1, %c0_2] : memref<8x128xf32, #tpu.memory_space<vmem>>, vector<8x128xf32>
    tpu.vector_store %arg2[%c0_1, %c0_2], %2 {strides = array<i32>} : memref<8x128xf32, #tpu.memory_space<vmem>>, vector<8x128xf32>,
    return
  }
  func.func @transform_0(%arg0: i32) -> (i32, i32) {
    %c0_i32 = arith.constant 0 : i32
    %c0_i32_0 = arith.constant 0 : i32
    %c0_i32_1 = arith.constant 0 : i32
    return %c0_i32, %c0_i32_0 : i32, i32
  }
  func.func @transform_1(%arg0: i32) -> (i32, i32) {
    %c0_i32 = arith.constant 0 : i32
    %c0_i32_0 = arith.constant 0 : i32
    return %arg0, %c0_i32 : i32, i32
  }
}

module attributes {stable_mosaic.version = 11 : i64} {
  func.func @_attn_proj_res_kernel(%arg0: i32, %arg1: i32, %arg2: memref<8x384xbf16, #tpu.memory_space<vmem>>, %arg3: memref<8x128xf32, #tpu.memory_space<vmem>>, %arg4: memref<128x128xbf16, #tpu.memory_space<vmem>>, %arg5: memref<1x128xf32, #tpu.memory_space<vmem>>, %arg6: memref<8x128xf32, #tpu.memory_space<vmem>>) attributes {dimension_semantics = [#tpu.dimension_semantics<parallel>, #tpu.dimension_semantics<parallel>], iteration_bounds = array<i64: 2, 1>, scalar_prefetch = 0 : i64, scratch_operands = 0 : i64, tpu.core_type = #tpu.core_type<tc>, window_params = [{transform_indices = @transform_0, window_bounds = array<i64: 8, 384>}, {transform_indices = @transform_1, window_bounds = array<i64: 8, 128>}, {pipeline_mode = #tpu.pipeline_mode<synchronous>, transform_indices = @transform_2, window_bounds = array<i64: 128, 128>}, {pipeline_mode = #tpu.pipeline_mode<synchronous>, transform_indices = @transform_3, window_bounds = array<i64: 1, 128>}, {transform_indices = @transform_4, window_bounds = array<i64: 8, 128>}]} {
    %c8_i32 = arith.constant 8 : i32
    %0 = arith.muli %arg1, %c8_i32 : i32
    %1 = tpu.assume_multiple %0, 8 : i32
    %2 = arith.index_cast %1 : i32 to index
    %c0 = arith.constant 0 : index
    %3 = vector.load %arg2[%2, %c0] : memref<8x384xbf16, #tpu.memory_space<vmem>>, vector<8x384xbf16>
    %4 = vector.extract_strided_slice %3 {offsets = [0, 0], sizes = [8, 128], strides = [1, 1]} : vector<8x384xbf16> to vector<8x128xbf16>
    %cst = arith.constant 2.500000e-01 : bf16
    %5 = vector.broadcast %cst : bf16 to vector<8x128xbf16>
    %6 = arith.mulf %4, %5 : vector<8x128xbf16>
    %c0_0 = arith.constant 0 : index
    %c0_1 = arith.constant 0 : index
    %7 = vector.load %arg2[%c0_0, %c0_1] : memref<8x384xbf16, #tpu.memory_space<vmem>>, vector<8x384xbf16>
    %8 = vector.extract_strided_slice %7 {offsets = [0, 128], sizes = [8, 128], strides = [1, 1]} : vector<8x384xbf16> to vector<8x128xbf16>
    %9 = vector.extract_strided_slice %7 {offsets = [0, 256], sizes = [8, 128], strides = [1, 1]} : vector<8x384xbf16> to vector<8x128xbf16>
    %10 = tpu.iota {dimensions = array<i32: 0>} : vector<8x8xi32>
    %c8_i32_2 = arith.constant 8 : i32
    %11 = arith.muli %arg1, %c8_i32_2 : i32
    %12 = vector.broadcast %11 : i32 to vector<8x8xi32>
    %13 = arith.addi %10, %12 : vector<8x8xi32>
    %14 = tpu.iota {dimensions = array<i32: 1>} : vector<8x8xi32>
    %15 = arith.cmpi sle, %14, %13 : vector<8x8xi32>
    %cst_3 = arith.constant 0.000000e+00 : f32
    %16 = vector.broadcast %cst_3 : f32 to vector<8x128xf32>
    %17 = vector.extract_strided_slice %6 {offsets = [0, 0], sizes = [8, 16], strides = [1, 1]} : vector<8x128xbf16> to vector<8x16xbf16>
    %18 = vector.extract_strided_slice %8 {offsets = [0, 0], sizes = [8, 16], strides = [1, 1]} : vector<8x128xbf16> to vector<8x16xbf16>
    %19 = vector.extract_strided_slice %9 {offsets = [0, 0], sizes = [8, 16], strides = [1, 1]} : vector<8x128xbf16> to vector<8x16xbf16>
    %cst_4 = arith.constant dense<0.000000e+00> : vector<8x8xf32>
    %20 = tpu.matmul %17, %18, %cst_4 {dimension_numbers = #tpu.dot_dimension_numbers<[1], [1], [0], [0], [0, 0, 1, 0], [], []>} : vector<8x16xbf16>, vector<8x16xbf16>, vector<8x8xf32> -> vector<8x8xf32>
    %cst_5 = arith.constant -1.000000e+30 : f32
    %21 = vector.broadcast %cst_5 : f32 to vector<8x8xf32>
    %22 = arith.select %15, %20, %21 : vector<8x8xi1>, vector<8x8xf32>
    %cst_6 = arith.constant dense<0xFF800000> : vector<8xf32>
    %23 = vector.multi_reduction <maximumf>, %22, %cst_6 [1] : vector<8x8xf32> to vector<8xf32>
    %24 = vector.shape_cast %23 : vector<8xf32> to vector<8x1xf32>
    %25 = vector.broadcast %24 : vector<8x1xf32> to vector<8x8xf32>
    %26 = arith.subf %22, %25 : vector<8x8xf32>
    %27 = math.exp %26 : vector<8x8xf32>
    %cst_7 = arith.constant dense<0.000000e+00> : vector<8xf32>
    %28 = vector.multi_reduction <add>, %27, %cst_7 [1] : vector<8x8xf32> to vector<8xf32>
    %29 = vector.shape_cast %28 : vector<8xf32> to vector<8x1xf32>
    %30 = vector.broadcast %29 : vector<8x1xf32> to vector<8x8xf32>
    %31 = arith.divf %27, %30 : vector<8x8xf32>
    %32 = arith.truncf %31 : vector<8x8xf32> to vector<8x8xbf16>
    %cst_8 = arith.constant dense<0.000000e+00> : vector<8x16xf32>
    %33 = tpu.matmul %32, %19, %cst_8 {dimension_numbers = #tpu.dot_dimension_numbers<[1], [0], [0], [1], [0, 0, 1, 1], [], []>} : vector<8x8xbf16>, vector<8x16xbf16>, vector<8x16xf32> -> vector<8x16xf32>
    %34 = arith.truncf %33 : vector<8x16xf32> to vector<8x16xbf16>
    %c0_9 = arith.constant 0 : index
    %c0_10 = arith.constant 0 : index
    %35 = vector.load %arg4[%c0_9, %c0_10] : memref<128x128xbf16, #tpu.memory_space<vmem>>, vector<16x128xbf16>
    %cst_11 = arith.constant dense<0.000000e+00> : vector<8x128xf32>
    %36 = tpu.matmul %34, %35, %cst_11 {dimension_numbers = #tpu.dot_dimension_numbers<[1], [0], [0], [1], [0, 0, 1, 1], [], []>} : vector<8x16xbf16>, vector<16x128xbf16>, vector<8x128xf32> -> vector<8x128xf32>
    %37 = arith.addf %16, %36 : vector<8x128xf32>
    %38 = vector.extract_strided_slice %6 {offsets = [0, 16], sizes = [8, 16], strides = [1, 1]} : vector<8x128xbf16> to vector<8x16xbf16>
    %39 = vector.extract_strided_slice %8 {offsets = [0, 16], sizes = [8, 16], strides = [1, 1]} : vector<8x128xbf16> to vector<8x16xbf16>
    %40 = vector.extract_strided_slice %9 {offsets = [0, 16], sizes = [8, 16], strides = [1, 1]} : vector<8x128xbf16> to vector<8x16xbf16>
    %cst_12 = arith.constant dense<0.000000e+00> : vector<8x8xf32>
    %41 = tpu.matmul %38, %39, %cst_12 {dimension_numbers = #tpu.dot_dimension_numbers<[1], [1], [0], [0], [0, 0, 1, 0], [], []>} : vector<8x16xbf16>, vector<8x16xbf16>, vector<8x8xf32> -> vector<8x8xf32>
    %cst_13 = arith.constant -1.000000e+30 : f32
    %42 = vector.broadcast %cst_13 : f32 to vector<8x8xf32>
    %43 = arith.select %15, %41, %42 : vector<8x8xi1>, vector<8x8xf32>
    %cst_14 = arith.constant dense<0xFF800000> : vector<8xf32>
    %44 = vector.multi_reduction <maximumf>, %43, %cst_14 [1] : vector<8x8xf32> to vector<8xf32>
    %45 = vector.shape_cast %44 : vector<8xf32> to vector<8x1xf32>
    %46 = vector.broadcast %45 : vector<8x1xf32> to vector<8x8xf32>
    %47 = arith.subf %43, %46 : vector<8x8xf32>
    %48 = math.exp %47 : vector<8x8xf32>
    %cst_15 = arith.constant dense<0.000000e+00> : vector<8xf32>
    %49 = vector.multi_reduction <add>, %48, %cst_15 [1] : vector<8x8xf32> to vector<8xf32>
    %50 = vector.shape_cast %49 : vector<8xf32> to vector<8x1xf32>
    %51 = vector.broadcast %50 : vector<8x1xf32> to vector<8x8xf32>
    %52 = arith.divf %48, %51 : vector<8x8xf32>
    %53 = arith.truncf %52 : vector<8x8xf32> to vector<8x8xbf16>
    %cst_16 = arith.constant dense<0.000000e+00> : vector<8x16xf32>
    %54 = tpu.matmul %53, %40, %cst_16 {dimension_numbers = #tpu.dot_dimension_numbers<[1], [0], [0], [1], [0, 0, 1, 1], [], []>} : vector<8x8xbf16>, vector<8x16xbf16>, vector<8x16xf32> -> vector<8x16xf32>
    %55 = arith.truncf %54 : vector<8x16xf32> to vector<8x16xbf16>
    %c16 = arith.constant 16 : index
    %c0_17 = arith.constant 0 : index
    %56 = vector.load %arg4[%c16, %c0_17] : memref<128x128xbf16, #tpu.memory_space<vmem>>, vector<16x128xbf16>
    %cst_18 = arith.constant dense<0.000000e+00> : vector<8x128xf32>
    %57 = tpu.matmul %55, %56, %cst_18 {dimension_numbers = #tpu.dot_dimension_numbers<[1], [0], [0], [1], [0, 0, 1, 1], [], []>} : vector<8x16xbf16>, vector<16x128xbf16>, vector<8x128xf32> -> vector<8x128xf32>
    %58 = arith.addf %37, %57 : vector<8x128xf32>
    %59 = vector.extract_strided_slice %6 {offsets = [0, 32], sizes = [8, 16], strides = [1, 1]} : vector<8x128xbf16> to vector<8x16xbf16>
    %60 = vector.extract_strided_slice %8 {offsets = [0, 32], sizes = [8, 16], strides = [1, 1]} : vector<8x128xbf16> to vector<8x16xbf16>
    %61 = vector.extract_strided_slice %9 {offsets = [0, 32], sizes = [8, 16], strides = [1, 1]} : vector<8x128xbf16> to vector<8x16xbf16>
    %cst_19 = arith.constant dense<0.000000e+00> : vector<8x8xf32>
    %62 = tpu.matmul %59, %60, %cst_19 {dimension_numbers = #tpu.dot_dimension_numbers<[1], [1], [0], [0], [0, 0, 1, 0], [], []>} : vector<8x16xbf16>, vector<8x16xbf16>, vector<8x8xf32> -> vector<8x8xf32>
    %cst_20 = arith.constant -1.000000e+30 : f32
    %63 = vector.broadcast %cst_20 : f32 to vector<8x8xf32>
    %64 = arith.select %15, %62, %63 : vector<8x8xi1>, vector<8x8xf32>
    %cst_21 = arith.constant dense<0xFF800000> : vector<8xf32>
    %65 = vector.multi_reduction <maximumf>, %64, %cst_21 [1] : vector<8x8xf32> to vector<8xf32>
    %66 = vector.shape_cast %65 : vector<8xf32> to vector<8x1xf32>
    %67 = vector.broadcast %66 : vector<8x1xf32> to vector<8x8xf32>
    %68 = arith.subf %64, %67 : vector<8x8xf32>
    %69 = math.exp %68 : vector<8x8xf32>
    %cst_22 = arith.constant dense<0.000000e+00> : vector<8xf32>
    %70 = vector.multi_reduction <add>, %69, %cst_22 [1] : vector<8x8xf32> to vector<8xf32>
    %71 = vector.shape_cast %70 : vector<8xf32> to vector<8x1xf32>
    %72 = vector.broadcast %71 : vector<8x1xf32> to vector<8x8xf32>
    %73 = arith.divf %69, %72 : vector<8x8xf32>
    %74 = arith.truncf %73 : vector<8x8xf32> to vector<8x8xbf16>
    %cst_23 = arith.constant dense<0.000000e+00> : vector<8x16xf32>
    %75 = tpu.matmul %74, %61, %cst_23 {dimension_numbers = #tpu.dot_dimension_numbers<[1], [0], [0], [1], [0, 0, 1, 1], [], []>} : vector<8x8xbf16>, vector<8x16xbf16>, vector<8x16xf32> -> vector<8x16xf32>
    %76 = arith.truncf %75 : vector<8x16xf32> to vector<8x16xbf16>
    %c32 = arith.constant 32 : index
    %c0_24 = arith.constant 0 : index
    %77 = vector.load %arg4[%c32, %c0_24] : memref<128x128xbf16, #tpu.memory_space<vmem>>, vector<16x128xbf16>
    %cst_25 = arith.constant dense<0.000000e+00> : vector<8x128xf32>
    %78 = tpu.matmul %76, %77, %cst_25 {dimension_numbers = #tpu.dot_dimension_numbers<[1], [0], [0], [1], [0, 0, 1, 1], [], []>} : vector<8x16xbf16>, vector<16x128xbf16>, vector<8x128xf32> -> vector<8x128xf32>
    %79 = arith.addf %58, %78 : vector<8x128xf32>
    %80 = vector.extract_strided_slice %6 {offsets = [0, 48], sizes = [8, 16], strides = [1, 1]} : vector<8x128xbf16> to vector<8x16xbf16>
    %81 = vector.extract_strided_slice %8 {offsets = [0, 48], sizes = [8, 16], strides = [1, 1]} : vector<8x128xbf16> to vector<8x16xbf16>
    %82 = vector.extract_strided_slice %9 {offsets = [0, 48], sizes = [8, 16], strides = [1, 1]} : vector<8x128xbf16> to vector<8x16xbf16>
    %cst_26 = arith.constant dense<0.000000e+00> : vector<8x8xf32>
    %83 = tpu.matmul %80, %81, %cst_26 {dimension_numbers = #tpu.dot_dimension_numbers<[1], [1], [0], [0], [0, 0, 1, 0], [], []>} : vector<8x16xbf16>, vector<8x16xbf16>, vector<8x8xf32> -> vector<8x8xf32>
    %cst_27 = arith.constant -1.000000e+30 : f32
    %84 = vector.broadcast %cst_27 : f32 to vector<8x8xf32>
    %85 = arith.select %15, %83, %84 : vector<8x8xi1>, vector<8x8xf32>
    %cst_28 = arith.constant dense<0xFF800000> : vector<8xf32>
    %86 = vector.multi_reduction <maximumf>, %85, %cst_28 [1] : vector<8x8xf32> to vector<8xf32>
    %87 = vector.shape_cast %86 : vector<8xf32> to vector<8x1xf32>
    %88 = vector.broadcast %87 : vector<8x1xf32> to vector<8x8xf32>
    %89 = arith.subf %85, %88 : vector<8x8xf32>
    %90 = math.exp %89 : vector<8x8xf32>
    %cst_29 = arith.constant dense<0.000000e+00> : vector<8xf32>
    %91 = vector.multi_reduction <add>, %90, %cst_29 [1] : vector<8x8xf32> to vector<8xf32>
    %92 = vector.shape_cast %91 : vector<8xf32> to vector<8x1xf32>
    %93 = vector.broadcast %92 : vector<8x1xf32> to vector<8x8xf32>
    %94 = arith.divf %90, %93 : vector<8x8xf32>
    %95 = arith.truncf %94 : vector<8x8xf32> to vector<8x8xbf16>
    %cst_30 = arith.constant dense<0.000000e+00> : vector<8x16xf32>
    %96 = tpu.matmul %95, %82, %cst_30 {dimension_numbers = #tpu.dot_dimension_numbers<[1], [0], [0], [1], [0, 0, 1, 1], [], []>} : vector<8x8xbf16>, vector<8x16xbf16>, vector<8x16xf32> -> vector<8x16xf32>
    %97 = arith.truncf %96 : vector<8x16xf32> to vector<8x16xbf16>
    %c48 = arith.constant 48 : index
    %c0_31 = arith.constant 0 : index
    %98 = vector.load %arg4[%c48, %c0_31] : memref<128x128xbf16, #tpu.memory_space<vmem>>, vector<16x128xbf16>
    %cst_32 = arith.constant dense<0.000000e+00> : vector<8x128xf32>
    %99 = tpu.matmul %97, %98, %cst_32 {dimension_numbers = #tpu.dot_dimension_numbers<[1], [0], [0], [1], [0, 0, 1, 1], [], []>} : vector<8x16xbf16>, vector<16x128xbf16>, vector<8x128xf32> -> vector<8x128xf32>
    %100 = arith.addf %79, %99 : vector<8x128xf32>
    %101 = vector.extract_strided_slice %6 {offsets = [0, 64], sizes = [8, 16], strides = [1, 1]} : vector<8x128xbf16> to vector<8x16xbf16>
    %102 = vector.extract_strided_slice %8 {offsets = [0, 64], sizes = [8, 16], strides = [1, 1]} : vector<8x128xbf16> to vector<8x16xbf16>
    %103 = vector.extract_strided_slice %9 {offsets = [0, 64], sizes = [8, 16], strides = [1, 1]} : vector<8x128xbf16> to vector<8x16xbf16>
    %cst_33 = arith.constant dense<0.000000e+00> : vector<8x8xf32>
    %104 = tpu.matmul %101, %102, %cst_33 {dimension_numbers = #tpu.dot_dimension_numbers<[1], [1], [0], [0], [0, 0, 1, 0], [], []>} : vector<8x16xbf16>, vector<8x16xbf16>, vector<8x8xf32> -> vector<8x8xf32>
    %cst_34 = arith.constant -1.000000e+30 : f32
    %105 = vector.broadcast %cst_34 : f32 to vector<8x8xf32>
    %106 = arith.select %15, %104, %105 : vector<8x8xi1>, vector<8x8xf32>
    %cst_35 = arith.constant dense<0xFF800000> : vector<8xf32>
    %107 = vector.multi_reduction <maximumf>, %106, %cst_35 [1] : vector<8x8xf32> to vector<8xf32>
    %108 = vector.shape_cast %107 : vector<8xf32> to vector<8x1xf32>
    %109 = vector.broadcast %108 : vector<8x1xf32> to vector<8x8xf32>
    %110 = arith.subf %106, %109 : vector<8x8xf32>
    %111 = math.exp %110 : vector<8x8xf32>
    %cst_36 = arith.constant dense<0.000000e+00> : vector<8xf32>
    %112 = vector.multi_reduction <add>, %111, %cst_36 [1] : vector<8x8xf32> to vector<8xf32>
    %113 = vector.shape_cast %112 : vector<8xf32> to vector<8x1xf32>
    %114 = vector.broadcast %113 : vector<8x1xf32> to vector<8x8xf32>
    %115 = arith.divf %111, %114 : vector<8x8xf32>
    %116 = arith.truncf %115 : vector<8x8xf32> to vector<8x8xbf16>
    %cst_37 = arith.constant dense<0.000000e+00> : vector<8x16xf32>
    %117 = tpu.matmul %116, %103, %cst_37 {dimension_numbers = #tpu.dot_dimension_numbers<[1], [0], [0], [1], [0, 0, 1, 1], [], []>} : vector<8x8xbf16>, vector<8x16xbf16>, vector<8x16xf32> -> vector<8x16xf32>
    %118 = arith.truncf %117 : vector<8x16xf32> to vector<8x16xbf16>
    %c64 = arith.constant 64 : index
    %c0_38 = arith.constant 0 : index
    %119 = vector.load %arg4[%c64, %c0_38] : memref<128x128xbf16, #tpu.memory_space<vmem>>, vector<16x128xbf16>
    %cst_39 = arith.constant dense<0.000000e+00> : vector<8x128xf32>
    %120 = tpu.matmul %118, %119, %cst_39 {dimension_numbers = #tpu.dot_dimension_numbers<[1], [0], [0], [1], [0, 0, 1, 1], [], []>} : vector<8x16xbf16>, vector<16x128xbf16>, vector<8x128xf32> -> vector<8x128xf32>
    %121 = arith.addf %100, %120 : vector<8x128xf32>
    %122 = vector.extract_strided_slice %6 {offsets = [0, 80], sizes = [8, 16], strides = [1, 1]} : vector<8x128xbf16> to vector<8x16xbf16>
    %123 = vector.extract_strided_slice %8 {offsets = [0, 80], sizes = [8, 16], strides = [1, 1]} : vector<8x128xbf16> to vector<8x16xbf16>
    %124 = vector.extract_strided_slice %9 {offsets = [0, 80], sizes = [8, 16], strides = [1, 1]} : vector<8x128xbf16> to vector<8x16xbf16>
    %cst_40 = arith.constant dense<0.000000e+00> : vector<8x8xf32>
    %125 = tpu.matmul %122, %123, %cst_40 {dimension_numbers = #tpu.dot_dimension_numbers<[1], [1], [0], [0], [0, 0, 1, 0], [], []>} : vector<8x16xbf16>, vector<8x16xbf16>, vector<8x8xf32> -> vector<8x8xf32>
    %cst_41 = arith.constant -1.000000e+30 : f32
    %126 = vector.broadcast %cst_41 : f32 to vector<8x8xf32>
    %127 = arith.select %15, %125, %126 : vector<8x8xi1>, vector<8x8xf32>
    %cst_42 = arith.constant dense<0xFF800000> : vector<8xf32>
    %128 = vector.multi_reduction <maximumf>, %127, %cst_42 [1] : vector<8x8xf32> to vector<8xf32>
    %129 = vector.shape_cast %128 : vector<8xf32> to vector<8x1xf32>
    %130 = vector.broadcast %129 : vector<8x1xf32> to vector<8x8xf32>
    %131 = arith.subf %127, %130 : vector<8x8xf32>
    %132 = math.exp %131 : vector<8x8xf32>
    %cst_43 = arith.constant dense<0.000000e+00> : vector<8xf32>
    %133 = vector.multi_reduction <add>, %132, %cst_43 [1] : vector<8x8xf32> to vector<8xf32>
    %134 = vector.shape_cast %133 : vector<8xf32> to vector<8x1xf32>
    %135 = vector.broadcast %134 : vector<8x1xf32> to vector<8x8xf32>
    %136 = arith.divf %132, %135 : vector<8x8xf32>
    %137 = arith.truncf %136 : vector<8x8xf32> to vector<8x8xbf16>
    %cst_44 = arith.constant dense<0.000000e+00> : vector<8x16xf32>
    %138 = tpu.matmul %137, %124, %cst_44 {dimension_numbers = #tpu.dot_dimension_numbers<[1], [0], [0], [1], [0, 0, 1, 1], [], []>} : vector<8x8xbf16>, vector<8x16xbf16>, vector<8x16xf32> -> vector<8x16xf32>
    %139 = arith.truncf %138 : vector<8x16xf32> to vector<8x16xbf16>
    %c80 = arith.constant 80 : index
    %c0_45 = arith.constant 0 : index
    %140 = vector.load %arg4[%c80, %c0_45] : memref<128x128xbf16, #tpu.memory_space<vmem>>, vector<16x128xbf16>
    %cst_46 = arith.constant dense<0.000000e+00> : vector<8x128xf32>
    %141 = tpu.matmul %139, %140, %cst_46 {dimension_numbers = #tpu.dot_dimension_numbers<[1], [0], [0], [1], [0, 0, 1, 1], [], []>} : vector<8x16xbf16>, vector<16x128xbf16>, vector<8x128xf32> -> vector<8x128xf32>
    %142 = arith.addf %121, %141 : vector<8x128xf32>
    %143 = vector.extract_strided_slice %6 {offsets = [0, 96], sizes = [8, 16], strides = [1, 1]} : vector<8x128xbf16> to vector<8x16xbf16>
    %144 = vector.extract_strided_slice %8 {offsets = [0, 96], sizes = [8, 16], strides = [1, 1]} : vector<8x128xbf16> to vector<8x16xbf16>
    %145 = vector.extract_strided_slice %9 {offsets = [0, 96], sizes = [8, 16], strides = [1, 1]} : vector<8x128xbf16> to vector<8x16xbf16>
    %cst_47 = arith.constant dense<0.000000e+00> : vector<8x8xf32>
    %146 = tpu.matmul %143, %144, %cst_47 {dimension_numbers = #tpu.dot_dimension_numbers<[1], [1], [0], [0], [0, 0, 1, 0], [], []>} : vector<8x16xbf16>, vector<8x16xbf16>, vector<8x8xf32> -> vector<8x8xf32>
    %cst_48 = arith.constant -1.000000e+30 : f32
    %147 = vector.broadcast %cst_48 : f32 to vector<8x8xf32>
    %148 = arith.select %15, %146, %147 : vector<8x8xi1>, vector<8x8xf32>
    %cst_49 = arith.constant dense<0xFF800000> : vector<8xf32>
    %149 = vector.multi_reduction <maximumf>, %148, %cst_49 [1] : vector<8x8xf32> to vector<8xf32>
    %150 = vector.shape_cast %149 : vector<8xf32> to vector<8x1xf32>
    %151 = vector.broadcast %150 : vector<8x1xf32> to vector<8x8xf32>
    %152 = arith.subf %148, %151 : vector<8x8xf32>
    %153 = math.exp %152 : vector<8x8xf32>
    %cst_50 = arith.constant dense<0.000000e+00> : vector<8xf32>
    %154 = vector.multi_reduction <add>, %153, %cst_50 [1] : vector<8x8xf32> to vector<8xf32>
    %155 = vector.shape_cast %154 : vector<8xf32> to vector<8x1xf32>
    %156 = vector.broadcast %155 : vector<8x1xf32> to vector<8x8xf32>
    %157 = arith.divf %153, %156 : vector<8x8xf32>
    %158 = arith.truncf %157 : vector<8x8xf32> to vector<8x8xbf16>
    %cst_51 = arith.constant dense<0.000000e+00> : vector<8x16xf32>
    %159 = tpu.matmul %158, %145, %cst_51 {dimension_numbers = #tpu.dot_dimension_numbers<[1], [0], [0], [1], [0, 0, 1, 1], [], []>} : vector<8x8xbf16>, vector<8x16xbf16>, vector<8x16xf32> -> vector<8x16xf32>
    %160 = arith.truncf %159 : vector<8x16xf32> to vector<8x16xbf16>
    %c96 = arith.constant 96 : index
    %c0_52 = arith.constant 0 : index
    %161 = vector.load %arg4[%c96, %c0_52] : memref<128x128xbf16, #tpu.memory_space<vmem>>, vector<16x128xbf16>
    %cst_53 = arith.constant dense<0.000000e+00> : vector<8x128xf32>
    %162 = tpu.matmul %160, %161, %cst_53 {dimension_numbers = #tpu.dot_dimension_numbers<[1], [0], [0], [1], [0, 0, 1, 1], [], []>} : vector<8x16xbf16>, vector<16x128xbf16>, vector<8x128xf32> -> vector<8x128xf32>
    %163 = arith.addf %142, %162 : vector<8x128xf32>
    %164 = vector.extract_strided_slice %6 {offsets = [0, 112], sizes = [8, 16], strides = [1, 1]} : vector<8x128xbf16> to vector<8x16xbf16>
    %165 = vector.extract_strided_slice %8 {offsets = [0, 112], sizes = [8, 16], strides = [1, 1]} : vector<8x128xbf16> to vector<8x16xbf16>
    %166 = vector.extract_strided_slice %9 {offsets = [0, 112], sizes = [8, 16], strides = [1, 1]} : vector<8x128xbf16> to vector<8x16xbf16>
    %cst_54 = arith.constant dense<0.000000e+00> : vector<8x8xf32>
    %167 = tpu.matmul %164, %165, %cst_54 {dimension_numbers = #tpu.dot_dimension_numbers<[1], [1], [0], [0], [0, 0, 1, 0], [], []>} : vector<8x16xbf16>, vector<8x16xbf16>, vector<8x8xf32> -> vector<8x8xf32>
    %cst_55 = arith.constant -1.000000e+30 : f32
    %168 = vector.broadcast %cst_55 : f32 to vector<8x8xf32>
    %169 = arith.select %15, %167, %168 : vector<8x8xi1>, vector<8x8xf32>
    %cst_56 = arith.constant dense<0xFF800000> : vector<8xf32>
    %170 = vector.multi_reduction <maximumf>, %169, %cst_56 [1] : vector<8x8xf32> to vector<8xf32>
    %171 = vector.shape_cast %170 : vector<8xf32> to vector<8x1xf32>
    %172 = vector.broadcast %171 : vector<8x1xf32> to vector<8x8xf32>
    %173 = arith.subf %169, %172 : vector<8x8xf32>
    %174 = math.exp %173 : vector<8x8xf32>
    %cst_57 = arith.constant dense<0.000000e+00> : vector<8xf32>
    %175 = vector.multi_reduction <add>, %174, %cst_57 [1] : vector<8x8xf32> to vector<8xf32>
    %176 = vector.shape_cast %175 : vector<8xf32> to vector<8x1xf32>
    %177 = vector.broadcast %176 : vector<8x1xf32> to vector<8x8xf32>
    %178 = arith.divf %174, %177 : vector<8x8xf32>
    %179 = arith.truncf %178 : vector<8x8xf32> to vector<8x8xbf16>
    %cst_58 = arith.constant dense<0.000000e+00> : vector<8x16xf32>
    %180 = tpu.matmul %179, %166, %cst_58 {dimension_numbers = #tpu.dot_dimension_numbers<[1], [0], [0], [1], [0, 0, 1, 1], [], []>} : vector<8x8xbf16>, vector<8x16xbf16>, vector<8x16xf32> -> vector<8x16xf32>
    %181 = arith.truncf %180 : vector<8x16xf32> to vector<8x16xbf16>
    %c112 = arith.constant 112 : index
    %c0_59 = arith.constant 0 : index
    %182 = vector.load %arg4[%c112, %c0_59] : memref<128x128xbf16, #tpu.memory_space<vmem>>, vector<16x128xbf16>
    %cst_60 = arith.constant dense<0.000000e+00> : vector<8x128xf32>
    %183 = tpu.matmul %181, %182, %cst_60 {dimension_numbers = #tpu.dot_dimension_numbers<[1], [0], [0], [1], [0, 0, 1, 1], [], []>} : vector<8x16xbf16>, vector<16x128xbf16>, vector<8x128xf32> -> vector<8x128xf32>
    %184 = arith.addf %163, %183 : vector<8x128xf32>
    %c0_61 = arith.constant 0 : index
    %c0_62 = arith.constant 0 : index
    %185 = vector.load %arg3[%c0_61, %c0_62] : memref<8x128xf32, #tpu.memory_space<vmem>>, vector<8x128xf32>
    %186 = arith.addf %185, %184 : vector<8x128xf32>
    %c0_63 = arith.constant 0 : index
    %c0_64 = arith.constant 0 : index
    %187 = vector.load %arg5[%c0_63, %c0_64] : memref<1x128xf32, #tpu.memory_space<vmem>>, vector<1x128xf32>
    %188 = vector.broadcast %187 : vector<1x128xf32> to vector<8x128xf32>
    %189 = arith.addf %186, %188 : vector<8x128xf32>
    %c0_65 = arith.constant 0 : index
    %c0_66 = arith.constant 0 : index
    %190 = vector.load %arg6[%c0_65, %c0_66] : memref<8x128xf32, #tpu.memory_space<vmem>>, vector<8x128xf32>
    tpu.vector_store %arg6[%c0_65, %c0_66], %189 {strides = array<i32>} : memref<8x128xf32, #tpu.memory_space<vmem>>, vector<8x128xf32>,
    return
  }
  func.func @transform_0(%arg0: i32, %arg1: i32) -> (i32, i32) {
    %c0_i32 = arith.constant 0 : i32
    %c0_i32_0 = arith.constant 0 : i32
    return %arg0, %c0_i32 : i32, i32
  }
  func.func @transform_1(%arg0: i32, %arg1: i32) -> (i32, i32) {
    %c1_i32 = arith.constant 1 : i32
    %0 = arith.muli %arg0, %c1_i32 : i32
    %1 = arith.addi %0, %arg1 : i32
    %c0_i32 = arith.constant 0 : i32
    %c0_i32_0 = arith.constant 0 : i32
    return %1, %c0_i32 : i32, i32
  }
  func.func @transform_2(%arg0: i32, %arg1: i32) -> (i32, i32) {
    %c0_i32 = arith.constant 0 : i32
    %c0_i32_0 = arith.constant 0 : i32
    %c0_i32_1 = arith.constant 0 : i32
    return %c0_i32, %c0_i32_0 : i32, i32
  }
  func.func @transform_3(%arg0: i32, %arg1: i32) -> (i32, i32) {
    %c0_i32 = arith.constant 0 : i32
    %c0_i32_0 = arith.constant 0 : i32
    %c0_i32_1 = arith.constant 0 : i32
    return %c0_i32, %c0_i32_0 : i32, i32
  }
  func.func @transform_4(%arg0: i32, %arg1: i32) -> (i32, i32) {
    %c1_i32 = arith.constant 1 : i32
    %0 = arith.muli %arg0, %c1_i32 : i32
    %1 = arith.addi %0, %arg1 : i32
    %c0_i32 = arith.constant 0 : i32
    %c0_i32_0 = arith.constant 0 : i32
    return %1, %c0_i32 : i32, i32
  }
}

module attributes {stable_mosaic.version = 11 : i64} {
  func.func @_ln_linear_kernel(%arg0: i32, %arg1: memref<16x128xf32, #tpu.memory_space<vmem>>, %arg2: memref<1x128xf32, #tpu.memory_space<vmem>>, %arg3: memref<1x128xf32, #tpu.memory_space<vmem>>, %arg4: memref<128x384xbf16, #tpu.memory_space<vmem>>, %arg5: memref<1x384xf32, #tpu.memory_space<vmem>>, %arg6: memref<16x384xbf16, #tpu.memory_space<vmem>>) attributes {dimension_semantics = [#tpu.dimension_semantics<parallel>], iteration_bounds = array<i64: 1>, scalar_prefetch = 0 : i64, scratch_operands = 0 : i64, tpu.core_type = #tpu.core_type<tc>, window_params = [{transform_indices = @transform_0, window_bounds = array<i64: 16, 128>}, {pipeline_mode = #tpu.pipeline_mode<synchronous>, transform_indices = @transform_1, window_bounds = array<i64: 1, 128>}, {pipeline_mode = #tpu.pipeline_mode<synchronous>, transform_indices = @transform_2, window_bounds = array<i64: 1, 128>}, {pipeline_mode = #tpu.pipeline_mode<synchronous>, transform_indices = @transform_3, window_bounds = array<i64: 128, 384>}, {pipeline_mode = #tpu.pipeline_mode<synchronous>, transform_indices = @transform_4, window_bounds = array<i64: 1, 384>}, {transform_indices = @transform_5, window_bounds = array<i64: 16, 384>}]} {
    %c0 = arith.constant 0 : index
    %c0_0 = arith.constant 0 : index
    %0 = vector.load %arg1[%c0, %c0_0] : memref<16x128xf32, #tpu.memory_space<vmem>>, vector<16x128xf32>
    %c0_1 = arith.constant 0 : index
    %c0_2 = arith.constant 0 : index
    %1 = vector.load %arg2[%c0_1, %c0_2] : memref<1x128xf32, #tpu.memory_space<vmem>>, vector<1x128xf32>
    %c0_3 = arith.constant 0 : index
    %c0_4 = arith.constant 0 : index
    %2 = vector.load %arg3[%c0_3, %c0_4] : memref<1x128xf32, #tpu.memory_space<vmem>>, vector<1x128xf32>
    %cst = arith.constant dense<0.000000e+00> : vector<16xf32>
    %3 = vector.multi_reduction <add>, %0, %cst [1] : vector<16x128xf32> to vector<16xf32>
    %4 = vector.shape_cast %3 : vector<16xf32> to vector<16x1xf32>
    %cst_5 = arith.constant 1.280000e+02 : f32
    %5 = vector.broadcast %cst_5 : f32 to vector<16x1xf32>
    %6 = arith.divf %4, %5 : vector<16x1xf32>
    %7 = vector.broadcast %6 : vector<16x1xf32> to vector<16x128xf32>
    %8 = arith.subf %0, %7 : vector<16x128xf32>
    %9 = arith.mulf %8, %8 : vector<16x128xf32>
    %cst_6 = arith.constant dense<0.000000e+00> : vector<16xf32>
    %10 = vector.multi_reduction <add>, %9, %cst_6 [1] : vector<16x128xf32> to vector<16xf32>
    %11 = vector.shape_cast %10 : vector<16xf32> to vector<16x1xf32>
    %cst_7 = arith.constant 1.280000e+02 : f32
    %12 = vector.broadcast %cst_7 : f32 to vector<16x1xf32>
    %13 = arith.divf %11, %12 : vector<16x1xf32>
    %14 = vector.broadcast %6 : vector<16x1xf32> to vector<16x128xf32>
    %15 = arith.subf %0, %14 : vector<16x128xf32>
    %cst_8 = arith.constant 9.99999974E-6 : f32
    %16 = vector.broadcast %cst_8 : f32 to vector<16x1xf32>
    %17 = arith.addf %13, %16 : vector<16x1xf32>
    %18 = math.rsqrt %17 : vector<16x1xf32>
    %19 = vector.broadcast %18 : vector<16x1xf32> to vector<16x128xf32>
    %20 = arith.mulf %15, %19 : vector<16x128xf32>
    %21 = vector.broadcast %1 : vector<1x128xf32> to vector<16x128xf32>
    %22 = arith.mulf %20, %21 : vector<16x128xf32>
    %23 = vector.broadcast %2 : vector<1x128xf32> to vector<16x128xf32>
    %24 = arith.addf %22, %23 : vector<16x128xf32>
    %25 = arith.truncf %24 : vector<16x128xf32> to vector<16x128xbf16>
    %c0_9 = arith.constant 0 : index
    %c0_10 = arith.constant 0 : index
    %26 = vector.load %arg4[%c0_9, %c0_10] : memref<128x384xbf16, #tpu.memory_space<vmem>>, vector<128x384xbf16>
    %cst_11 = arith.constant dense<0.000000e+00> : vector<16x384xf32>
    %27 = tpu.matmul %25, %26, %cst_11 {dimension_numbers = #tpu.dot_dimension_numbers<[1], [0], [0], [1], [0, 0, 1, 1], [], []>} : vector<16x128xbf16>, vector<128x384xbf16>, vector<16x384xf32> -> vector<16x384xf32>
    %c0_12 = arith.constant 0 : index
    %c0_13 = arith.constant 0 : index
    %28 = vector.load %arg5[%c0_12, %c0_13] : memref<1x384xf32, #tpu.memory_space<vmem>>, vector<1x384xf32>
    %29 = vector.broadcast %28 : vector<1x384xf32> to vector<16x384xf32>
    %30 = arith.addf %27, %29 : vector<16x384xf32>
    %31 = arith.truncf %30 : vector<16x384xf32> to vector<16x384xbf16>
    %c0_14 = arith.constant 0 : index
    %c0_15 = arith.constant 0 : index
    %32 = vector.load %arg6[%c0_14, %c0_15] : memref<16x384xbf16, #tpu.memory_space<vmem>>, vector<16x384xbf16>
    tpu.vector_store %arg6[%c0_14, %c0_15], %31 {strides = array<i32>} : memref<16x384xbf16, #tpu.memory_space<vmem>>, vector<16x384xbf16>,
    return
  }
  func.func @transform_0(%arg0: i32) -> (i32, i32) {
    %c0_i32 = arith.constant 0 : i32
    %c0_i32_0 = arith.constant 0 : i32
    return %arg0, %c0_i32 : i32, i32
  }
  func.func @transform_1(%arg0: i32) -> (i32, i32) {
    %c0_i32 = arith.constant 0 : i32
    %c0_i32_0 = arith.constant 0 : i32
    %c0_i32_1 = arith.constant 0 : i32
    return %c0_i32, %c0_i32_0 : i32, i32
  }
  func.func @transform_2(%arg0: i32) -> (i32, i32) {
    %c0_i32 = arith.constant 0 : i32
    %c0_i32_0 = arith.constant 0 : i32
    %c0_i32_1 = arith.constant 0 : i32
    return %c0_i32, %c0_i32_0 : i32, i32
  }
  func.func @transform_3(%arg0: i32) -> (i32, i32) {
    %c0_i32 = arith.constant 0 : i32
    %c0_i32_0 = arith.constant 0 : i32
    %c0_i32_1 = arith.constant 0 : i32
    return %c0_i32, %c0_i32_0 : i32, i32
  }
  func.func @transform_4(%arg0: i32) -> (i32, i32) {
    %c0_i32 = arith.constant 0 : i32
    %c0_i32_0 = arith.constant 0 : i32
    %c0_i32_1 = arith.constant 0 : i32
    return %c0_i32, %c0_i32_0 : i32, i32
  }
  func.func @transform_5(%arg0: i32) -> (i32, i32) {
    %c0_i32 = arith.constant 0 : i32
    %c0_i32_0 = arith.constant 0 : i32
    return %arg0, %c0_i32 : i32, i32
  }
}

module attributes {stable_mosaic.version = 11 : i64} {
  func.func @_ln_mlp_kernel(%arg0: i32, %arg1: memref<16x128xf32, #tpu.memory_space<vmem>>, %arg2: memref<1x128xf32, #tpu.memory_space<vmem>>, %arg3: memref<1x128xf32, #tpu.memory_space<vmem>>, %arg4: memref<128x512xbf16, #tpu.memory_space<vmem>>, %arg5: memref<1x512xf32, #tpu.memory_space<vmem>>, %arg6: memref<512x128xbf16, #tpu.memory_space<vmem>>, %arg7: memref<1x128xf32, #tpu.memory_space<vmem>>, %arg8: memref<16x128xf32, #tpu.memory_space<vmem>>) attributes {dimension_semantics = [#tpu.dimension_semantics<parallel>], iteration_bounds = array<i64: 1>, scalar_prefetch = 0 : i64, scratch_operands = 0 : i64, tpu.core_type = #tpu.core_type<tc>, window_params = [{transform_indices = @transform_0, window_bounds = array<i64: 16, 128>}, {pipeline_mode = #tpu.pipeline_mode<synchronous>, transform_indices = @transform_1, window_bounds = array<i64: 1, 128>}, {pipeline_mode = #tpu.pipeline_mode<synchronous>, transform_indices = @transform_2, window_bounds = array<i64: 1, 128>}, {pipeline_mode = #tpu.pipeline_mode<synchronous>, transform_indices = @transform_3, window_bounds = array<i64: 128, 512>}, {pipeline_mode = #tpu.pipeline_mode<synchronous>, transform_indices = @transform_4, window_bounds = array<i64: 1, 512>}, {pipeline_mode = #tpu.pipeline_mode<synchronous>, transform_indices = @transform_5, window_bounds = array<i64: 512, 128>}, {pipeline_mode = #tpu.pipeline_mode<synchronous>, transform_indices = @transform_6, window_bounds = array<i64: 1, 128>}, {transform_indices = @transform_7, window_bounds = array<i64: 16, 128>}]} {
    %c0 = arith.constant 0 : index
    %c0_0 = arith.constant 0 : index
    %0 = vector.load %arg1[%c0, %c0_0] : memref<16x128xf32, #tpu.memory_space<vmem>>, vector<16x128xf32>
    %c0_1 = arith.constant 0 : index
    %c0_2 = arith.constant 0 : index
    %1 = vector.load %arg2[%c0_1, %c0_2] : memref<1x128xf32, #tpu.memory_space<vmem>>, vector<1x128xf32>
    %c0_3 = arith.constant 0 : index
    %c0_4 = arith.constant 0 : index
    %2 = vector.load %arg3[%c0_3, %c0_4] : memref<1x128xf32, #tpu.memory_space<vmem>>, vector<1x128xf32>
    %cst = arith.constant dense<0.000000e+00> : vector<16xf32>
    %3 = vector.multi_reduction <add>, %0, %cst [1] : vector<16x128xf32> to vector<16xf32>
    %4 = vector.shape_cast %3 : vector<16xf32> to vector<16x1xf32>
    %cst_5 = arith.constant 1.280000e+02 : f32
    %5 = vector.broadcast %cst_5 : f32 to vector<16x1xf32>
    %6 = arith.divf %4, %5 : vector<16x1xf32>
    %7 = vector.broadcast %6 : vector<16x1xf32> to vector<16x128xf32>
    %8 = arith.subf %0, %7 : vector<16x128xf32>
    %9 = arith.mulf %8, %8 : vector<16x128xf32>
    %cst_6 = arith.constant dense<0.000000e+00> : vector<16xf32>
    %10 = vector.multi_reduction <add>, %9, %cst_6 [1] : vector<16x128xf32> to vector<16xf32>
    %11 = vector.shape_cast %10 : vector<16xf32> to vector<16x1xf32>
    %cst_7 = arith.constant 1.280000e+02 : f32
    %12 = vector.broadcast %cst_7 : f32 to vector<16x1xf32>
    %13 = arith.divf %11, %12 : vector<16x1xf32>
    %14 = vector.broadcast %6 : vector<16x1xf32> to vector<16x128xf32>
    %15 = arith.subf %0, %14 : vector<16x128xf32>
    %cst_8 = arith.constant 9.99999974E-6 : f32
    %16 = vector.broadcast %cst_8 : f32 to vector<16x1xf32>
    %17 = arith.addf %13, %16 : vector<16x1xf32>
    %18 = math.rsqrt %17 : vector<16x1xf32>
    %19 = vector.broadcast %18 : vector<16x1xf32> to vector<16x128xf32>
    %20 = arith.mulf %15, %19 : vector<16x128xf32>
    %21 = vector.broadcast %1 : vector<1x128xf32> to vector<16x128xf32>
    %22 = arith.mulf %20, %21 : vector<16x128xf32>
    %23 = vector.broadcast %2 : vector<1x128xf32> to vector<16x128xf32>
    %24 = arith.addf %22, %23 : vector<16x128xf32>
    %25 = arith.truncf %24 : vector<16x128xf32> to vector<16x128xbf16>
    %c0_9 = arith.constant 0 : index
    %c0_10 = arith.constant 0 : index
    %26 = vector.load %arg4[%c0_9, %c0_10] : memref<128x512xbf16, #tpu.memory_space<vmem>>, vector<128x512xbf16>
    %cst_11 = arith.constant dense<0.000000e+00> : vector<16x512xf32>
    %27 = tpu.matmul %25, %26, %cst_11 {dimension_numbers = #tpu.dot_dimension_numbers<[1], [0], [0], [1], [0, 0, 1, 1], [], []>} : vector<16x128xbf16>, vector<128x512xbf16>, vector<16x512xf32> -> vector<16x512xf32>
    %c0_12 = arith.constant 0 : index
    %c0_13 = arith.constant 0 : index
    %28 = vector.load %arg5[%c0_12, %c0_13] : memref<1x512xf32, #tpu.memory_space<vmem>>, vector<1x512xf32>
    %29 = vector.broadcast %28 : vector<1x512xf32> to vector<16x512xf32>
    %30 = arith.addf %27, %29 : vector<16x512xf32>
    %cst_14 = arith.constant 5.000000e-01 : f32
    %31 = vector.broadcast %cst_14 : f32 to vector<16x512xf32>
    %32 = arith.mulf %31, %30 : vector<16x512xf32>
    %cst_15 = arith.constant 4.471500e-02 : f32
    %33 = vector.broadcast %cst_15 : f32 to vector<16x512xf32>
    %34 = arith.mulf %33, %30 : vector<16x512xf32>
    %35 = arith.mulf %34, %30 : vector<16x512xf32>
    %36 = arith.mulf %35, %30 : vector<16x512xf32>
    %37 = arith.addf %30, %36 : vector<16x512xf32>
    %cst_16 = arith.constant 0.797884583 : f32
    %38 = vector.broadcast %cst_16 : f32 to vector<16x512xf32>
    %39 = arith.mulf %38, %37 : vector<16x512xf32>
    %40 = math.tanh %39 : vector<16x512xf32>
    %cst_17 = arith.constant 1.000000e+00 : f32
    %41 = vector.broadcast %cst_17 : f32 to vector<16x512xf32>
    %42 = arith.addf %41, %40 : vector<16x512xf32>
    %43 = arith.mulf %32, %42 : vector<16x512xf32>
    %44 = arith.truncf %43 : vector<16x512xf32> to vector<16x512xbf16>
    %c0_18 = arith.constant 0 : index
    %c0_19 = arith.constant 0 : index
    %45 = vector.load %arg6[%c0_18, %c0_19] : memref<512x128xbf16, #tpu.memory_space<vmem>>, vector<512x128xbf16>
    %cst_20 = arith.constant dense<0.000000e+00> : vector<16x128xf32>
    %46 = tpu.matmul %44, %45, %cst_20 {dimension_numbers = #tpu.dot_dimension_numbers<[1], [0], [0], [1], [0, 0, 1, 1], [], []>} : vector<16x512xbf16>, vector<512x128xbf16>, vector<16x128xf32> -> vector<16x128xf32>
    %c0_21 = arith.constant 0 : index
    %c0_22 = arith.constant 0 : index
    %47 = vector.load %arg7[%c0_21, %c0_22] : memref<1x128xf32, #tpu.memory_space<vmem>>, vector<1x128xf32>
    %48 = vector.broadcast %47 : vector<1x128xf32> to vector<16x128xf32>
    %49 = arith.addf %46, %48 : vector<16x128xf32>
    %50 = arith.addf %0, %49 : vector<16x128xf32>
    %c0_23 = arith.constant 0 : index
    %c0_24 = arith.constant 0 : index
    %51 = vector.load %arg8[%c0_23, %c0_24] : memref<16x128xf32, #tpu.memory_space<vmem>>, vector<16x128xf32>
    tpu.vector_store %arg8[%c0_23, %c0_24], %50 {strides = array<i32>} : memref<16x128xf32, #tpu.memory_space<vmem>>, vector<16x128xf32>,
    return
  }
  func.func @transform_0(%arg0: i32) -> (i32, i32) {
    %c0_i32 = arith.constant 0 : i32
    %c0_i32_0 = arith.constant 0 : i32
    return %arg0, %c0_i32 : i32, i32
  }
  func.func @transform_1(%arg0: i32) -> (i32, i32) {
    %c0_i32 = arith.constant 0 : i32
    %c0_i32_0 = arith.constant 0 : i32
    %c0_i32_1 = arith.constant 0 : i32
    return %c0_i32, %c0_i32_0 : i32, i32
  }
  func.func @transform_2(%arg0: i32) -> (i32, i32) {
    %c0_i32 = arith.constant 0 : i32
    %c0_i32_0 = arith.constant 0 : i32
    %c0_i32_1 = arith.constant 0 : i32
    return %c0_i32, %c0_i32_0 : i32, i32
  }
  func.func @transform_3(%arg0: i32) -> (i32, i32) {
    %c0_i32 = arith.constant 0 : i32
    %c0_i32_0 = arith.constant 0 : i32
    %c0_i32_1 = arith.constant 0 : i32
    return %c0_i32, %c0_i32_0 : i32, i32
  }
  func.func @transform_4(%arg0: i32) -> (i32, i32) {
    %c0_i32 = arith.constant 0 : i32
    %c0_i32_0 = arith.constant 0 : i32
    %c0_i32_1 = arith.constant 0 : i32
    return %c0_i32, %c0_i32_0 : i32, i32
  }
  func.func @transform_5(%arg0: i32) -> (i32, i32) {
    %c0_i32 = arith.constant 0 : i32
    %c0_i32_0 = arith.constant 0 : i32
    %c0_i32_1 = arith.constant 0 : i32
    return %c0_i32, %c0_i32_0 : i32, i32
  }
  func.func @transform_6(%arg0: i32) -> (i32, i32) {
    %c0_i32 = arith.constant 0 : i32
    %c0_i32_0 = arith.constant 0 : i32
    %c0_i32_1 = arith.constant 0 : i32
    return %c0_i32, %c0_i32_0 : i32, i32
  }
  func.func @transform_7(%arg0: i32) -> (i32, i32) {
    %c0_i32 = arith.constant 0 : i32
    %c0_i32_0 = arith.constant 0 : i32
    return %arg0, %c0_i32 : i32, i32
  }
}

module attributes {stable_mosaic.version = 11 : i64} {
  func.func @_ln_mlp_kernel(%arg0: i32, %arg1: memref<16x128xf32, #tpu.memory_space<vmem>>, %arg2: memref<1x128xf32, #tpu.memory_space<vmem>>, %arg3: memref<1x128xf32, #tpu.memory_space<vmem>>, %arg4: memref<128x128xbf16, #tpu.memory_space<vmem>>, %arg5: memref<1x128xf32, #tpu.memory_space<vmem>>, %arg6: memref<128x128xbf16, #tpu.memory_space<vmem>>, %arg7: memref<1x128xf32, #tpu.memory_space<vmem>>, %arg8: memref<16x128xf32, #tpu.memory_space<vmem>>) attributes {dimension_semantics = [#tpu.dimension_semantics<parallel>], iteration_bounds = array<i64: 1>, scalar_prefetch = 0 : i64, scratch_operands = 0 : i64, tpu.core_type = #tpu.core_type<tc>, window_params = [{transform_indices = @transform_0, window_bounds = array<i64: 16, 128>}, {pipeline_mode = #tpu.pipeline_mode<synchronous>, transform_indices = @transform_1, window_bounds = array<i64: 1, 128>}, {pipeline_mode = #tpu.pipeline_mode<synchronous>, transform_indices = @transform_2, window_bounds = array<i64: 1, 128>}, {pipeline_mode = #tpu.pipeline_mode<synchronous>, transform_indices = @transform_3, window_bounds = array<i64: 128, 128>}, {pipeline_mode = #tpu.pipeline_mode<synchronous>, transform_indices = @transform_4, window_bounds = array<i64: 1, 128>}, {pipeline_mode = #tpu.pipeline_mode<synchronous>, transform_indices = @transform_5, window_bounds = array<i64: 128, 128>}, {pipeline_mode = #tpu.pipeline_mode<synchronous>, transform_indices = @transform_6, window_bounds = array<i64: 1, 128>}, {transform_indices = @transform_7, window_bounds = array<i64: 16, 128>}]} {
    %c0 = arith.constant 0 : index
    %c0_0 = arith.constant 0 : index
    %0 = vector.load %arg1[%c0, %c0_0] : memref<16x128xf32, #tpu.memory_space<vmem>>, vector<16x128xf32>
    %c0_1 = arith.constant 0 : index
    %c0_2 = arith.constant 0 : index
    %1 = vector.load %arg2[%c0_1, %c0_2] : memref<1x128xf32, #tpu.memory_space<vmem>>, vector<1x128xf32>
    %c0_3 = arith.constant 0 : index
    %c0_4 = arith.constant 0 : index
    %2 = vector.load %arg3[%c0_3, %c0_4] : memref<1x128xf32, #tpu.memory_space<vmem>>, vector<1x128xf32>
    %cst = arith.constant dense<0.000000e+00> : vector<16xf32>
    %3 = vector.multi_reduction <add>, %0, %cst [1] : vector<16x128xf32> to vector<16xf32>
    %4 = vector.shape_cast %3 : vector<16xf32> to vector<16x1xf32>
    %cst_5 = arith.constant 1.280000e+02 : f32
    %5 = vector.broadcast %cst_5 : f32 to vector<16x1xf32>
    %6 = arith.divf %4, %5 : vector<16x1xf32>
    %7 = vector.broadcast %6 : vector<16x1xf32> to vector<16x128xf32>
    %8 = arith.subf %0, %7 : vector<16x128xf32>
    %9 = arith.mulf %8, %8 : vector<16x128xf32>
    %cst_6 = arith.constant dense<0.000000e+00> : vector<16xf32>
    %10 = vector.multi_reduction <add>, %9, %cst_6 [1] : vector<16x128xf32> to vector<16xf32>
    %11 = vector.shape_cast %10 : vector<16xf32> to vector<16x1xf32>
    %cst_7 = arith.constant 1.280000e+02 : f32
    %12 = vector.broadcast %cst_7 : f32 to vector<16x1xf32>
    %13 = arith.divf %11, %12 : vector<16x1xf32>
    %14 = vector.broadcast %6 : vector<16x1xf32> to vector<16x128xf32>
    %15 = arith.subf %0, %14 : vector<16x128xf32>
    %cst_8 = arith.constant 9.99999974E-6 : f32
    %16 = vector.broadcast %cst_8 : f32 to vector<16x1xf32>
    %17 = arith.addf %13, %16 : vector<16x1xf32>
    %18 = math.rsqrt %17 : vector<16x1xf32>
    %19 = vector.broadcast %18 : vector<16x1xf32> to vector<16x128xf32>
    %20 = arith.mulf %15, %19 : vector<16x128xf32>
    %21 = vector.broadcast %1 : vector<1x128xf32> to vector<16x128xf32>
    %22 = arith.mulf %20, %21 : vector<16x128xf32>
    %23 = vector.broadcast %2 : vector<1x128xf32> to vector<16x128xf32>
    %24 = arith.addf %22, %23 : vector<16x128xf32>
    %25 = arith.truncf %24 : vector<16x128xf32> to vector<16x128xbf16>
    %c0_9 = arith.constant 0 : index
    %c0_10 = arith.constant 0 : index
    %26 = vector.load %arg4[%c0_9, %c0_10] : memref<128x128xbf16, #tpu.memory_space<vmem>>, vector<128x128xbf16>
    %cst_11 = arith.constant dense<0.000000e+00> : vector<16x128xf32>
    %27 = tpu.matmul %25, %26, %cst_11 {dimension_numbers = #tpu.dot_dimension_numbers<[1], [0], [0], [1], [0, 0, 1, 1], [], []>} : vector<16x128xbf16>, vector<128x128xbf16>, vector<16x128xf32> -> vector<16x128xf32>
    %c0_12 = arith.constant 0 : index
    %c0_13 = arith.constant 0 : index
    %28 = vector.load %arg5[%c0_12, %c0_13] : memref<1x128xf32, #tpu.memory_space<vmem>>, vector<1x128xf32>
    %29 = vector.broadcast %28 : vector<1x128xf32> to vector<16x128xf32>
    %30 = arith.addf %27, %29 : vector<16x128xf32>
    %cst_14 = arith.constant 0.000000e+00 : f32
    %31 = vector.broadcast %cst_14 : f32 to vector<16x128xf32>
    %32 = arith.maximumf %30, %31 : vector<16x128xf32>
    %33 = arith.truncf %32 : vector<16x128xf32> to vector<16x128xbf16>
    %c0_15 = arith.constant 0 : index
    %c0_16 = arith.constant 0 : index
    %34 = vector.load %arg6[%c0_15, %c0_16] : memref<128x128xbf16, #tpu.memory_space<vmem>>, vector<128x128xbf16>
    %cst_17 = arith.constant dense<0.000000e+00> : vector<16x128xf32>
    %35 = tpu.matmul %33, %34, %cst_17 {dimension_numbers = #tpu.dot_dimension_numbers<[1], [0], [0], [1], [0, 0, 1, 1], [], []>} : vector<16x128xbf16>, vector<128x128xbf16>, vector<16x128xf32> -> vector<16x128xf32>
    %c0_18 = arith.constant 0 : index
    %c0_19 = arith.constant 0 : index
    %36 = vector.load %arg7[%c0_18, %c0_19] : memref<1x128xf32, #tpu.memory_space<vmem>>, vector<1x128xf32>
    %37 = vector.broadcast %36 : vector<1x128xf32> to vector<16x128xf32>
    %38 = arith.addf %35, %37 : vector<16x128xf32>
    %c0_20 = arith.constant 0 : index
    %c0_21 = arith.constant 0 : index
    %39 = vector.load %arg8[%c0_20, %c0_21] : memref<16x128xf32, #tpu.memory_space<vmem>>, vector<16x128xf32>
    tpu.vector_store %arg8[%c0_20, %c0_21], %38 {strides = array<i32>} : memref<16x128xf32, #tpu.memory_space<vmem>>, vector<16x128xf32>,
    return
  }
  func.func @transform_0(%arg0: i32) -> (i32, i32) {
    %c0_i32 = arith.constant 0 : i32
    %c0_i32_0 = arith.constant 0 : i32
    return %arg0, %c0_i32 : i32, i32
  }
  func.func @transform_1(%arg0: i32) -> (i32, i32) {
    %c0_i32 = arith.constant 0 : i32
    %c0_i32_0 = arith.constant 0 : i32
    %c0_i32_1 = arith.constant 0 : i32
    return %c0_i32, %c0_i32_0 : i32, i32
  }
  func.func @transform_2(%arg0: i32) -> (i32, i32) {
    %c0_i32 = arith.constant 0 : i32
    %c0_i32_0 = arith.constant 0 : i32
    %c0_i32_1 = arith.constant 0 : i32
    return %c0_i32, %c0_i32_0 : i32, i32
  }
  func.func @transform_3(%arg0: i32) -> (i32, i32) {
    %c0_i32 = arith.constant 0 : i32
    %c0_i32_0 = arith.constant 0 : i32
    %c0_i32_1 = arith.constant 0 : i32
    return %c0_i32, %c0_i32_0 : i32, i32
  }
  func.func @transform_4(%arg0: i32) -> (i32, i32) {
    %c0_i32 = arith.constant 0 : i32
    %c0_i32_0 = arith.constant 0 : i32
    %c0_i32_1 = arith.constant 0 : i32
    return %c0_i32, %c0_i32_0 : i32, i32
  }
  func.func @transform_5(%arg0: i32) -> (i32, i32) {
    %c0_i32 = arith.constant 0 : i32
    %c0_i32_0 = arith.constant 0 : i32
    %c0_i32_1 = arith.constant 0 : i32
    return %c0_i32, %c0_i32_0 : i32, i32
  }
  func.func @transform_6(%arg0: i32) -> (i32, i32) {
    %c0_i32 = arith.constant 0 : i32
    %c0_i32_0 = arith.constant 0 : i32
    %c0_i32_1 = arith.constant 0 : i32
    return %c0_i32, %c0_i32_0 : i32, i32
  }
  func.func @transform_7(%arg0: i32) -> (i32, i32) {
    %c0_i32 = arith.constant 0 : i32
    %c0_i32_0 = arith.constant 0 : i32
    return %arg0, %c0_i32 : i32, i32
  }
}

</mosaic_0001>

<bundles_post_ra>
// kernel: tpu_custom_call.1
= control target key start
LH: loop header
LB: loop body
LE: loop exit
PB: predicated region body
PF: predicated region fallthrough
CT: control target
= control target key end

     0   :  { %6 = vsyncpa [#allocation3], 0  ;;  %s482_s0 = inlined_call_operand.hbm [shape: f32[8,128], index: 0, kind: input, shape index: {}]   ;;  %s483_s1 = inlined_call_operand.hbm [shape: f32[16,128], index: 1, kind: output, shape index: {}]  }
   0x1   :  { %7 = vsyncpa [#allocation4], 0 }
   0x2   :  { %9 = vsyncpa [#allocation4 + $0x1], 0  ;;  %s352_s6 = smov 0   ;;  %s354_s7 = smov 0  }
   0x3   :  { %s356_s8 = smov 0   ;;  %s358_s9 = smov 0  }
   0x4 LB: > { %s373_s10 = sadd.s32 4294967295, %s338_s9   ;;  %s184_s11 = sadd.s32 4294967294, %s338_s9   ;;  %s338_s9 = sphi %s358_s9, %s499_s9   ;;  %s334_s8 = sphi %s356_s8, %s498_s8   ;;  %s330_s7 = sphi %s354_s7, %s497_s7   ;;  %s326_s6 = sphi %s352_s6, %s496_s6  }
   0x5   : > { %s377_s12 = sadd.s32 1, %s338_s9   ;;  %s43_s13 = sadd.s32 1, %s334_s8 }
   0x6   : > { %s40_s14 = ssub.s32 %s338_s9, %s377_s12  ;;  %p53_p0 = scmp.ne.s32.totalorder %s334_s8, %s330_s7 }
   0x7   : > { %p41_p1 = scmp.eq.s32.totalorder %s40_s14, 0  ;;  %p54_p2 = scmp.eq.s32.totalorder %s373_s10, 1 }
   0x8   : > { %p59_p3 = scmp.ne.s32.totalorder %s330_s7, %s326_s6  ;;  %p60_p4 = scmp.eq.s32.totalorder %s184_s11, 1 }
   0x9   : > { %s388_s15 = scalar_select %p41_p1, %s334_s8, %s43_s13  }
   0xa   : > { %p390_p5 = por %p54_p2, %p53_p0  ;;  %p394_p6 = por %p60_p4, %p59_p3 }
   0xb   : > { %p185_p7 = scmp.ge.s32.totalorder %s338_s9, 1  ;;  %p67_p8 = scmp.lt.s32.totalorder %s338_s9, 3 }
   0xc   : > { %s487_s16 = scalar_select %p390_p5, 1, 0 }
   0xd   : > { %s488_s17 = scalar_select %p394_p6, 1, 0 }
   0xe   : > { %p484_p9 = scmp.eq.s32.totalorder %s373_s10, 0  ;;  %p401_p10 = pnand %p185_p7, %p67_p8 }
   0xf   : > { %s340_s19 = smov [#allocation2]   ;;  %s244_s24 = scalar_lea.hbm %s482_s0, 128 }
  0x10   : > { %s489_s18 = scalar_select %p401_p10, 1, 0 }
  0x11   : > { %s80_s20 = sshll.u32 %s340_s19, 4  ;;  %p200_p11 = pneg %p401_p10  ;;  %s81_s20 = int_to_ptr.vmem [resolvable:$true] %s80_s20 }
  0x12   : > { %p245_p13 = scmp.ne.s32.totalorder %s482_s0, %s244_s24  ;;  %p251_p3 = scmp.lt.u32.totalorder %s244_s24, %s482_s0 }
  0x13   : > { %p409_p12 = pnand %p484_p9, %p200_p11 }
  0x15   : > { %p246_p0 = pneg %p409_p12 }
  0x17   : > { %p247_p1 = pnand %p246_p0, %p245_p13 }
  0x19   : > { %p248_p2 = pneg %p247_p1 }
  0x1b   : > { %p253_p4 = pnand %p251_p3, %p248_p2 }
  0x1d   : > { %256 = shalt.err (!%p253_p4)
}
  0x1e   : > { %s257_s29 = scalar_lea.vmem %s81_s20, 128  ;;  %p265_p9 = scmp.lt.s32.totalorder %s81_s20, %s81_s20 }
  0x1f   : > { %p258_p7 = scmp.ne.s32.totalorder %s81_s20, %s257_s29  ;;  %p266_p6 = scmp.lt.s32.totalorder %s257_s29, %s257_s29 }
  0x21   : > { %p260_p8 = pnand %p258_p7, %p246_p0  ;;  %p267_p5 = por %p266_p6, %p265_p9 }
  0x23   : > { %p261_p11 = pneg %p260_p8 }
  0x25   : > { %p268_p10 = pnand %p267_p5, %p261_p11 }
  0x27   : > { %271 = shalt.err (!%p268_p10)
}
  0x28   : > { %203 = dma.hbm_to_vmem [thread:$0]  (!%p409_p12), %s482_s0, 128, %s81_s20, [#allocation3]  }
  0x29   : > { %p491_p13 = scmp.ne.s32.totalorder %s489_s18, 0 }
  0x2a   : > { %p492_p1 = scmp.eq.s32.totalorder (!%p491_p13), %s373_s10, 0 }
  0x2b   : > { %93 = sbr.rel (%p491_p13) target bundleno = 77 (0x4d), region = 24 }
  0x32   : > { %317 = dma.done.wait (%p492_p1), [#allocation3], 128   ;;  %p493_p0 = pmov %p492_p1 }
  0x33   : > { %s105_s3 = sand.u32 1, %s330_s7   ;;  %s191_s13 = sshll.u32 %s373_s10, 7  ;;  %v108_v0 = vld [vmem:[#allocation2] sm:$0xff] }
  0x34   : > { %319 = vsyncadd (%p493_p0), [#allocation3], 4294967168  ;;  %s189_s4 = sshll.u32 %s105_s3, 3  ;;  %v109_v1 = vadd.f32 1.0, %v108_v0  ;;  %s442_s19 = scalar_lea.hbm %s483_s1, %s191_s13 }
  0x35   : > { %s107_s5 = scalar_lea.vmem [#allocation5], %s189_s4  ;;  %s112_s20 = scalar_lea.sflag [#allocation4], %s105_s3 }
  0x36   : > { %s125_s11 = sshll.u32 %s107_s5, 4  ;;  %110 = vst [vmem:[%s107_s5] sm:$0xff] %v109_v1  ;;  %p494_p6 = scmp.ne.s32.totalorder %s487_s16, 0  ;;  %s437_s11 = int_to_ptr.vmem [resolvable:$true] %s125_s11 }
  0x37   : > { %s272_s21 = scalar_lea.vmem %s437_s11, 128  ;;  %s341_s10 = smov [#allocation5]  }
  0x38   : > { %p273_p5 = scmp.ne.s32.totalorder %s437_s11, %s272_s21  ;;  %s276_s22 = sshll.u32 %s341_s10, 4  ;;  %s277_s22 = int_to_ptr.vmem [resolvable:$false] %s276_s22 }
  0x39   : > { %s278_s23 = scalar_lea.vmem %s277_s22, 256  ;;  %p279_p12 = scmp.lt.s32.totalorder %s437_s11, %s277_s22 }
  0x3a   : > { %p274_p9 = pnand %p273_p5, %p494_p6  ;;  %p280_p2 = scmp.lt.s32.totalorder %s278_s23, %s272_s21 }
  0x3c   : > { %p275_p10 = pneg %p274_p9  ;;  %p281_p3 = por %p280_p2, %p279_p12 }
  0x3e   : > { %p282_p4 = pnand %p281_p3, %p275_p10 }
  0x40   : > { %285 = shalt.err (!%p282_p4)
}
  0x41   : > { %s286_s24 = scalar_lea.hbm %s442_s19, 128  ;;  %s290_s27 = scalar_lea.hbm %s483_s1, 256 }
  0x42   : > { %p287_p7 = scmp.ne.s32.totalorder %s442_s19, %s286_s24  ;;  %p291_p13 = scmp.lt.u32.totalorder %s442_s19, %s483_s1 }
  0x43   : > { %p292_p1 = scmp.lt.u32.totalorder %s290_s27, %s286_s24  ;;  %p294_p5 = scmp.lt.u32.totalorder %s286_s24, %s442_s19 }
  0x44   : > { %p288_p8 = pnand %p287_p7, %p494_p6 }
  0x45   : > { %p293_p0 = por %p292_p1, %p291_p13 }
  0x46   : > { %p289_p11 = pneg %p288_p8 }
  0x47   : > { %p295_p9 = por %p294_p5, %p293_p0 }
  0x49   : > { %p296_p10 = pnand %p295_p9, %p289_p11 }
  0x4b   : > { %299 = shalt.err (!%p296_p10)
}
  0x4c   : > { %198 = dma.vmem_to_hbm [thread:$0]  (%p494_p6), %s437_s11, 128, %s442_s19, %s112_s20  }
  0x4d PF: > { %p210_p12 = scmp.ge.s32.totalorder %s338_s9, 2  ;;  %s137_s30 = sand.u32 1, %s326_s6  }
  0x4e   : > { %p495_p2 = scmp.ne.s32.totalorder %s488_s17, 0  ;;  %s138_s2 = scalar_lea.sflag [#allocation4], %s137_s30 }
  0x50   : > { %p205_p3 = pnand %p210_p12, %p495_p2 }
  0x52   : > { %321 = dma.done.wait (!%p205_p3), %s138_s2, 128  }
  0x53   : > { %323 = vsyncadd (!%p205_p3), %s138_s2, 4294967168  ;;  %p12_p4 = scmp.ge.s32.totalorder %s377_s12, 4   ;;  %s496_s6 = smov %s330_s7 }
  0x54   : > { %s497_s7 = smov %s334_s8  ;;  %s498_s8 = smov %s388_s15 }
  0x55   : > { %s499_s9 = smov %s377_s12  ;;  %14 = sbr.rel (!%p12_p4) target bundleno = 4 (0x4), region = 61 }
  0x5c   :  { %143 = vsyncpa [#allocation3], 1 }
  0x5d   :  { %145 = vsyncpa [#allocation3 + $0x1], 1 }
  0x5e   :  { %146 = vsyncpa [#allocation4], 1 }
  0x5f   :  { %148 = vsyncpa [#allocation4 + $0x1], 1 }

// kernel: transformer_module_forward.7
= control target key start
LH: loop header
LB: loop body
LE: loop exit
PB: predicated region body
PF: predicated region fallthrough
CT: control target
= control target key end

     0   :  { %10 = vsyncpa [#allocation3], 0  ;;  %s831_s0 = inlined_call_operand.hbm [shape: f32[16,128], index: 0, kind: input, shape index: {}]   ;;  %s832_s1 = inlined_call_operand.hbm [shape: f32[1,128], index: 1, kind: input, shape index: {}]   ;;  %s833_s2 = inlined_call_operand.hbm [shape: f32[1,128], index: 2, kind: input, shape index: {}]   ;;  %s834_s3 = inlined_call_operand.hbm [shape: bf16[128,384], index: 3, kind: input, shape index: {}]   ;;  %s835_s4 = inlined_call_operand.hbm [shape: f32[1,384], index: 4, kind: input, shape index: {}]   ;;  %s836_s5 = inlined_call_operand.hbm [shape: bf16[16,384], index: 5, kind: output, shape index: {}]  }
   0x1   :  { %11 = vsyncpa [#allocation6], 0 }
   0x2   :  { %12 = vsyncpa [#allocation9], 0 }
   0x3   :  { %13 = vsyncpa [#allocation4], 0  ;;  %s684_s18 = smov [#allocation5]   ;;  %s685_s20 = smov [#allocation8]  }
   0x4   :  { %s32_s19 = sshll.u32 %s684_s18, 4  ;;  %s51_s21 = sshll.u32 %s685_s20, 4  ;;  %s33_s19 = int_to_ptr.vmem [resolvable:$true] %s32_s19  ;;  %s727_s21 = int_to_ptr.vmem [resolvable:$true] %s51_s21 }
   0x5   :  { %s544_s24 = scalar_lea.hbm %s832_s1, 16 }
   0x6   :  { %p545_p0 = scmp.ne.s32.totalorder %s832_s1, %s544_s24  ;;  %p548_p1 = scmp.lt.u32.totalorder %s544_s24, %s832_s1 }
   0x8   :  { %p550_p2 = pnand %p548_p1, %p545_p0 }
   0xa   :  { %553 = shalt.err (!%p550_p2)
}
   0xb   :  { %s554_s29 = scalar_lea.vmem %s33_s19, 16  ;;  %s558_s30 = scalar_lea.vmem %s33_s19, 32 }
   0xc   :  { %p555_p3 = scmp.ne.s32.totalorder %s33_s19, %s554_s29  ;;  %p559_p4 = scmp.lt.s32.totalorder %s33_s19, %s33_s19 }
   0xd   :  { %p560_p5 = scmp.lt.s32.totalorder %s558_s30, %s554_s29 }
   0xf   :  { %p561_p6 = por %p560_p5, %p559_p4 }
  0x11   :  { %p562_p7 = pnand %p561_p6, %p555_p3 }
  0x13   :  { %565 = shalt.err (!%p562_p7)
}
  0x14   :  { %35 = dma.hbm_to_vmem [thread:$0]  %s832_s1, 16, %s33_s19, [#allocation6]  }
  0x15   :  { %s566_s10 = scalar_lea.hbm %s834_s3, 3072 }
  0x16   :  { %p567_p8 = scmp.ne.s32.totalorder %s834_s3, %s566_s10  ;;  %p570_p9 = scmp.lt.u32.totalorder %s566_s10, %s834_s3 }
  0x18   :  { %p572_p10 = pnand %p570_p9, %p567_p8 }
  0x1a   :  { %575 = shalt.err (!%p572_p10)
}
  0x1b   :  { %s576_s15 = scalar_lea.vmem %s727_s21, 3072  ;;  %p581_p12 = scmp.lt.s32.totalorder %s727_s21, %s727_s21 }
  0x1c   :  { %p577_p11 = scmp.ne.s32.totalorder %s727_s21, %s576_s15  ;;  %p582_p13 = scmp.lt.s32.totalorder %s576_s15, %s576_s15 }
  0x1e   :  { %p583_p0 = por %p582_p13, %p581_p12 }
  0x20   :  { %p584_p1 = pnand %p583_p0, %p577_p11 }
  0x22   :  { %587 = shalt.err (!%p584_p1)
}
  0x23   :  { %s686_s1 = smov 192   ;;  %s687_s16 = smov 12  }
  0x24   :  { %57 = dma.hbm_to_vmem [thread:$0]  %s834_s3, 3072, %s727_s21, [#allocation9], %s686_s1, %s686_s1, %s687_s16  }
  0x25   :  { %s688_s19 = smov [#allocation2]   ;;  %s588_s24 = scalar_lea.hbm %s831_s0, 256 }
  0x26   :  { %s19_s20 = sshll.u32 %s688_s19, 4  ;;  %p589_p2 = scmp.ne.s32.totalorder %s831_s0, %s588_s24  ;;  %s20_s20 = int_to_ptr.vmem [resolvable:$true] %s19_s20 }
  0x27   :  { %p592_p3 = scmp.lt.u32.totalorder %s588_s24, %s831_s0 }
  0x29   :  { %p594_p4 = pnand %p592_p3, %p589_p2 }
  0x2b   :  { %597 = shalt.err (!%p594_p4)
}
  0x2c   :  { %s598_s29 = scalar_lea.vmem %s20_s20, 256  ;;  %p603_p6 = scmp.lt.s32.totalorder %s20_s20, %s20_s20 }
  0x2d   :  { %p599_p5 = scmp.ne.s32.totalorder %s20_s20, %s598_s29  ;;  %p604_p7 = scmp.lt.s32.totalorder %s598_s29, %s598_s29 }
  0x2f   :  { %p605_p8 = por %p604_p7, %p603_p6 }
  0x31   :  { %p606_p9 = pnand %p605_p8, %p599_p5 }
  0x33   :  { %609 = shalt.err (!%p606_p9)
}
  0x34   :  { %s689_s3 = smov 128   ;;  %s690_s21 = smov 8  }
  0x35   :  { %25 = dma.hbm_to_vmem [thread:$0]  %s831_s0, 256, %s20_s20, [#allocation3], %s689_s3, %s689_s3, %s690_s21  }
  0x36   :  { %s691_s7 = smov [#allocation7]   ;;  %s692_s9 = smov [#allocation10]  }
  0x37   :  { %s42_s8 = sshll.u32 %s691_s7, 4  ;;  %s64_s10 = sshll.u32 %s692_s9, 4  ;;  %s43_s8 = int_to_ptr.vmem [resolvable:$true] %s42_s8  ;;  %s65_s10 = int_to_ptr.vmem [resolvable:$true] %s64_s10 }
  0x38   :  { %s610_s13 = scalar_lea.hbm %s833_s2, 16 }
  0x39   :  { %p611_p10 = scmp.ne.s32.totalorder %s833_s2, %s610_s13  ;;  %p614_p11 = scmp.lt.u32.totalorder %s610_s13, %s833_s2 }
  0x3b   :  { %p616_p12 = pnand %p614_p11, %p611_p10 }
  0x3d   :  { %619 = shalt.err (!%p616_p12)
}
  0x3e   :  { %s620_s0 = scalar_lea.vmem %s43_s8, 16  ;;  %s624_s19 = scalar_lea.vmem %s43_s8, 32 }
  0x3f   :  { %p621_p13 = scmp.ne.s32.totalorder %s43_s8, %s620_s0  ;;  %p625_p0 = scmp.lt.s32.totalorder %s43_s8, %s43_s8 }
  0x40   :  { %p626_p1 = scmp.lt.s32.totalorder %s624_s19, %s620_s0 }
  0x42   :  { %p627_p2 = por %p626_p1, %p625_p0 }
  0x44   :  { %p628_p3 = pnand %p627_p2, %p621_p13 }
  0x46   :  { %631 = shalt.err (!%p628_p3)
}
  0x47   :  { %45 = dma.hbm_to_vmem [thread:$0]  %s833_s2, 16, %s43_s8, [#allocation6]  }
  0x48   :  { %s632_s25 = scalar_lea.hbm %s835_s4, 48 }
  0x49   :  { %p633_p4 = scmp.ne.s32.totalorder %s835_s4, %s632_s25  ;;  %p636_p5 = scmp.lt.u32.totalorder %s632_s25, %s835_s4 }
  0x4b   :  { %p638_p6 = pnand %p636_p5, %p633_p4 }
  0x4d   :  { %641 = shalt.err (!%p638_p6)
}
  0x4e   :  { %s642_s3 = scalar_lea.vmem %s65_s10, 48  ;;  %s646_s21 = scalar_lea.vmem %s65_s10, 64 }
  0x4f   :  { %p643_p7 = scmp.ne.s32.totalorder %s65_s10, %s642_s3  ;;  %p647_p8 = scmp.lt.s32.totalorder %s65_s10, %s65_s10 }
  0x50   :  { %p648_p9 = scmp.lt.s32.totalorder %s646_s21, %s642_s3 }
  0x52   :  { %p649_p10 = por %p648_p9, %p647_p8 }
  0x54   :  { %p650_p11 = pnand %p649_p10, %p643_p7 }
  0x56   :  { %653 = shalt.err (!%p650_p11)
}
  0x57   :  { %67 = dma.hbm_to_vmem [thread:$0]  %s835_s4, 48, %s65_s10, [#allocation9]  }
  0x58   :  { %676 = dma.done.wait [#allocation3], 256  }
  0x59   :  { %677 = vsyncadd [#allocation3], 4294967040 }
  0x5a   :  { %678 = dma.done.wait [#allocation6], 32  }
  0x5b   :  { %679 = vsyncadd [#allocation6], 4294967264 }
  0x5c   :  { %680 = dma.done.wait [#allocation9], 3120  }
  0x5d   :  { %681 = vsyncadd [#allocation9], 4294964176  ;;  %v84_v0 = vld [vmem:[#allocation2] sm:$0xff]  ;;  %v85_v1 = vld [vmem:[#allocation2 + $0x8] sm:$0xff]  ;;  %v693_v4 = vmov 0.0   ;;  %v694_v30 = vmov 0   ;;  %v162_v53 = vlaneseq }
  0x5e   :  { %88 = vadd.xlane.f32.xlu0 %v84_v0  ;;  %v508_v2 = vld [vmem:[#allocation8 + $0x4] ss:$12 sps:$4 sm:$0xff]   ;;  %v510_v3 = vld [vmem:[#allocation8] ss:$12 sps:$4 sm:$0xff]   ;;  %475 = vmatprep.subr.bf16.mxu1 %v693_v4  ;;  %v511_v5 = vld [vmem:[#allocation8 + $0x8] ss:$12 sps:$4 sm:$0xff]  }
  0x5f   :  { %v512_v6 = vld [vmem:[#allocation8 + $0x1c] ss:$12 sps:$4 sm:$0xff]   ;;  %305 = vmatprep.subr.bf16.mxu0 %v508_v2  ;;  %476 = vmatpush3.bf16.msra.mxu1 %v511_v5  ;;  %v514_v15 = vld [vmem:[#allocation8 + $0x18] ss:$12 sps:$4 sm:$0xff]   ;;  %v515_v16 = vld [vmem:[#allocation8 + $0x20] ss:$12 sps:$4 sm:$0xff]  }
  0x60   :  { %306 = vmatpush1.bf16.msra.mxu0 %v510_v3  ;;  %477 = vmatprep.subr.bf16.mxu1 %v693_v4  ;;  %v516_v17 = vld [vmem:[#allocation8 + $0x34] ss:$12 sps:$4 sm:$0xff]   ;;  %v518_v18 = vld [vmem:[#allocation8 + $0x30] ss:$12 sps:$4 sm:$0xff]   ;;  %v519_v19 = vld [vmem:[#allocation8 + $0x38] ss:$12 sps:$4 sm:$0xff]  }
  0x61   :  { %307 = vmatprep.subr.bf16.mxu0 %v512_v6  ;;  %v520_v20 = vld [vmem:[#allocation8 + $0x4c] ss:$12 sps:$4 sm:$0xff]   ;;  %v522_v21 = vld [vmem:[#allocation8 + $0x48] ss:$12 sps:$4 sm:$0xff]   ;;  %v523_v22 = vld [vmem:[#allocation8 + $0x50] ss:$12 sps:$4 sm:$0xff]   ;;  %337 = vmatprep.mubr.bf16.mxu0 %v694_v30 }
  0x62   :  { %90 = vadd.xlane.f32.xlu0 %v85_v1  ;;  %v524_v23 = vld [vmem:[#allocation8 + $0x64] ss:$12 sps:$4 sm:$0xff]   ;;  %v526_v24 = vld [vmem:[#allocation8 + $0x60] ss:$12 sps:$4 sm:$0xff]   ;;  %v527_v25 = vld [vmem:[#allocation8 + $0x68] ss:$12 sps:$4 sm:$0xff]  }
  0x63   :  { %478 = vmatpush3.bf16.msra.mxu1 %v515_v16  ;;  %v528_v26 = vld [vmem:[#allocation8 + $0x7c] ss:$12 sps:$4 sm:$0xff]   ;;  %v530_v27 = vld [vmem:[#allocation8 + $0x78] ss:$12 sps:$4 sm:$0xff]   ;;  %v531_v28 = vld [vmem:[#allocation8 + $0x80] ss:$12 sps:$4 sm:$0xff]  }
  0x64   :  { %308 = vmatpush1.bf16.msra.mxu0 %v514_v15  ;;  %479 = vmatprep.subr.bf16.mxu1 %v693_v4  ;;  %v532_v29 = vld [vmem:[#allocation8 + $0x94] ss:$12 sps:$4 sm:$0xff]   ;;  %vm695_vm0 = vmmov 0   ;;  %v534_v31 = vld [vmem:[#allocation8 + $0x90] ss:$12 sps:$4 sm:$0xff]   ;;  %v163_v54 = vshrl.u32 %v162_v53, 7 }
  0x65   :  { %309 = vmatprep.subr.bf16.mxu0 %v516_v17  ;;  %491 = vmatprep.mubr.msk.bf16.mxu1 %vm695_vm0, %v693_v4  ;;  %v535_v32 = vld [vmem:[#allocation8 + $0x98] ss:$12 sps:$4 sm:$0xff]   ;;  %v538_v34 = vld [vmem:[#allocation8 + $0xa8] ss:$12 sps:$4 sm:$0xff]   ;;  %v539_v35 = vld [vmem:[#allocation8 + $0xb0] ss:$12 sps:$4 sm:$0xff]  }
  0x66   :  { %v536_v33 = vld [vmem:[#allocation8 + $0xac] ss:$12 sps:$4 sm:$0xff]   ;;  %v432_v44 = vld [vmem:[#allocation5] ss:$0 sm:$0xff]  ;;  %v433_v48 = vld [vmem:[#allocation7] ss:$0 sm:$0xff] }
  0x67   :  { %480 = vmatpush3.bf16.msra.mxu1 %v519_v19  ;;  %v164_v55 = vsub.s32 0, %v163_v54  ;;  %v172_v56 = vsub.s32 2, %v163_v54  ;;  %v160_v57 = vld [vmem:[#allocation10] sm:$0x7]  ;;  %v168_v58 = vsub.s32 1, %v163_v54  ;;  %s696_s4 = smov [#allocation11]  }
  0x68   :  { %310 = vmatpush1.bf16.msra.mxu0 %v518_v18  ;;  %481 = vmatprep.subr.bf16.mxu1 %v693_v4  ;;  %s418_s6 = sshll.u32 %s696_s4, 4  ;;  %s419_s6 = int_to_ptr.vmem [resolvable:$true] %s418_s6 }
  0x69   :  { %311 = vmatprep.subr.bf16.mxu0 %v520_v20  ;;  %v165_v59 = vrot.slane %v160_v57, %v164_v55  ;;  %v173_v60 = vrot.slane %v160_v57, %v172_v56  ;;  %v169_v61 = vrot.slane %v160_v57, %v168_v58  ;;  %s654_s7 = scalar_lea.vmem %s419_s6, 384  ;;  %p659_p13 = scmp.lt.s32.totalorder %s419_s6, %s419_s6 }
  0x6a   :  { %p655_p12 = scmp.ne.s32.totalorder %s419_s6, %s654_s7  ;;  %p660_p0 = scmp.lt.s32.totalorder %s654_s7, %s654_s7 }
  0x6b   :  { %482 = vmatpush3.bf16.msra.mxu1 %v523_v22 }
  0x6c   :  { %312 = vmatpush1.bf16.msra.mxu0 %v522_v21  ;;  %483 = vmatprep.subr.bf16.mxu1 %v693_v4  ;;  %p661_p1 = por %p660_p0, %p659_p13 }
  0x6d   :  { %313 = vmatprep.subr.bf16.mxu0 %v524_v23 }
  0x6e   :  { %p662_p2 = pnand %p661_p1, %p655_p12 }
  0x6f   :  { %484 = vmatpush3.bf16.msra.mxu1 %v527_v25 }
  0x70   :  { %314 = vmatpush1.bf16.msra.mxu0 %v526_v24  ;;  %485 = vmatprep.subr.bf16.mxu1 %v693_v4 }
  0x71   :  { %315 = vmatprep.subr.bf16.mxu0 %v528_v26 }
  0x73   :  { %486 = vmatpush3.bf16.msra.mxu1 %v531_v28 }
  0x74   :  { %316 = vmatpush1.bf16.msra.mxu0 %v530_v27  ;;  %487 = vmatprep.subr.bf16.mxu1 %v693_v4 }
  0x75   :  { %317 = vmatprep.subr.bf16.mxu0 %v532_v29 }
  0x77   :  { %488 = vmatpush3.bf16.msra.mxu1 %v535_v32 }
  0x78   :  { %318 = vmatpush1.bf16.msra.mxu0 %v534_v31  ;;  %489 = vmatprep.subr.bf16.mxu1 %v693_v4 }
  0x79   :  { %319 = vmatprep.subr.bf16.mxu0 %v536_v33 }
  0x7b   :  { %490 = vmatpush3.bf16.msra.mxu1 %v539_v35 }
  0x7c   :  { %320 = vmatpush1.bf16.msra.mxu0 %v538_v34 }
  0xeb   :  { %v89_v7 = vpop.xlane.xlu0 %88 }
  0xec   :  { %v93_v8 = vmul.f32 0.0078125, %v89_v7 }
  0xee   :  { %v799_v9 = vsub.f32 %v84_v0, %v93_v8 }
  0xef   :  { %v91_v10 = vpop.xlane.xlu0 %90 }
  0xf0   :  { %v94_v11 = vmul.f32 0.0078125, %v91_v10  ;;  %v97_v12 = vmul.f32 %v799_v9, %v799_v9 }
  0xf2   :  { %v803_v13 = vsub.f32 %v85_v1, %v94_v11  ;;  %99 = vadd.xlane.f32.xlu1 %v97_v12 }
  0xf4   :  { %v98_v14 = vmul.f32 %v803_v13, %v803_v13 }
  0xf6   :  { %101 = vadd.xlane.f32.xlu1 %v98_v14 }
 0x17f   :  { %v100_v36 = vpop.xlane.xlu1 %99 }
 0x180   :  { %v103_v37 = vmul.f32 0.0078125, %v100_v36 }
 0x182   :  { %v105_v38 = vadd.f32 1e-05, %v103_v37 }
 0x183   :  { %v102_v39 = vpop.xlane.xlu1 %101 }
 0x184   :  { %540 = vrsqrt.f32 %v105_v38  ;;  %v104_v40 = vmul.f32 0.0078125, %v102_v39 }
 0x186   :  { %v106_v41 = vadd.f32 1e-05, %v104_v40 }
 0x188   :  { %542 = vrsqrt.f32 %v106_v41 }
 0x18e   :  { %v541_v42 = vpop.eup %540 }
 0x18f   :  { %v109_v43 = vmul.f32 %v541_v42, %v799_v9 }
 0x191   :  { %v117_v47 = vmul.f32 %v432_v44, %v109_v43 }
 0x192   :  { %v543_v45 = vpop.eup %542 }
 0x193   :  { %v110_v46 = vmul.f32 %v543_v45, %v803_v13  ;;  %v125_v50 = vadd.f32 %v433_v48, %v117_v47 }
 0x195   :  { %v118_v49 = vmul.f32 %v432_v44, %v110_v46 }
 0x197   :  { %v126_v51 = vadd.f32 %v433_v48, %v118_v49 }
 0x199   :  { %v127_v52 = vpack.c.bf16 %v126_v51, %v125_v50 }
 0x19b   :  { %338 = vmatmul.mubr.bf16.vlgmr.msra.gmra.mrb[0].mxu0 %v127_v52  ;;  %492 = vmatmul.mubr.bf16.vlgmr.msra.gmra.mrb[0].mxu1 %v127_v52 }
 0x26e   :  { %v339_v62 = vpop.f32.mrb[0].mxu0  ;;  %v382_v63 = vpop.f32.mrb[0].mxu1 }
 0x26f   :  { %v340_v0 = vadd.f32 %v339_v62, %v165_v59  ;;  %v383_v1 = vadd.f32 %v382_v63, %v173_v60  ;;  %v341_v2 = vpop.f32.mrb[1].mxu0  ;;  %v493_v3 = vpop.f32.mrb[1].mxu1 }
 0x270   :  { %v342_v4 = vadd.f32 %v341_v2, %v169_v61  ;;  %v343_v5 = vpop.f32.mrb[2].mxu0  ;;  %v385_v6 = vpop.f32.mrb[2].mxu1 }
 0x271   :  { %v463_v7 = vpack.c.bf16 %v383_v1, %v383_v1  ;;  %v344_v8 = vadd.f32 %v343_v5, %v165_v59  ;;  %v386_v9 = vadd.f32 %v385_v6, %v173_v60  ;;  %v345_v10 = vpop.f32.mrb[3].mxu0  ;;  %v494_v11 = vpop.f32.mrb[3].mxu1 }
 0x272   :  { %v462_v12 = vpack.c.bf16 %v342_v4, %v340_v0  ;;  %v346_v13 = vadd.f32 %v345_v10, %v169_v61 }
 0x273   :  { %410 = vst [vmem:[#allocation11 + $0x8] sm:$0xf] %v463_v7  ;;  %v465_v14 = vpack.c.bf16 %v386_v9, %v386_v9 }
 0x274   :  { %409 = vst [vmem:[#allocation11] sm:$0xff] %v462_v12  ;;  %v464_v15 = vpack.c.bf16 %v346_v13, %v344_v8 }
 0x275   :  { %412 = vst [vmem:[#allocation11 + $0x14] sm:$0xf] %v465_v14 }
 0x276   :  { %411 = vst [vmem:[#allocation11 + $0xc] sm:$0xff] %v464_v15 }
 0x277   :  { %665 = shalt.err (!%p662_p2)
}
 0x278   :  { %s666_s10 = scalar_lea.hbm %s836_s5, 384 }
 0x279   :  { %p667_p3 = scmp.ne.s32.totalorder %s836_s5, %s666_s10  ;;  %p670_p4 = scmp.lt.u32.totalorder %s666_s10, %s836_s5 }
 0x27b   :  { %p672_p5 = pnand %p670_p4, %p667_p3 }
 0x27d   :  { %675 = shalt.err (!%p672_p5)
}
 0x27e   :  { %424 = dma.vmem_to_hbm [thread:$0]  %s419_s6, 384, %s836_s5, [#allocation4], %s686_s1, %s686_s1, %s687_s16  }
 0x27f   :  { %682 = dma.done.wait [#allocation4], 384  }
 0x280   :  { %683 = vsyncadd [#allocation4], 4294966912 }
 0x281   :  { %428 = vsyncpa [#allocation3], 1 }
 0x282   :  { %429 = vsyncpa [#allocation6], 1 }
 0x283   :  { %430 = vsyncpa [#allocation9], 1 }
 0x284   :  { %431 = vsyncpa [#allocation4], 1 }

// kernel: transformer_module_forward.13
= control target key start
LH: loop header
LB: loop body
LE: loop exit
PB: predicated region body
PF: predicated region fallthrough
CT: control target
= control target key end

     0   :  { %12 = vsyncpa [#allocation3], 0  ;;  %s894_s0 = inlined_call_operand.hbm [shape: f32[16,128], index: 0, kind: input, shape index: {}]   ;;  %s895_s1 = inlined_call_operand.hbm [shape: f32[1,128], index: 1, kind: input, shape index: {}]   ;;  %s896_s2 = inlined_call_operand.hbm [shape: f32[1,128], index: 2, kind: input, shape index: {}]   ;;  %s897_s3 = inlined_call_operand.hbm [shape: bf16[128,128], index: 3, kind: input, shape index: {}]   ;;  %s898_s4 = inlined_call_operand.hbm [shape: f32[1,128], index: 4, kind: input, shape index: {}]   ;;  %s899_s5 = inlined_call_operand.hbm [shape: bf16[128,128], index: 5, kind: input, shape index: {}]   ;;  %s900_s6 = inlined_call_operand.hbm [shape: f32[1,128], index: 6, kind: input, shape index: {}]   ;;  %s901_s7 = inlined_call_operand.hbm [shape: f32[16,128], index: 7, kind: output, shape index: {}]  }
   0x1   :  { %13 = vsyncpa [#allocation6], 0 }
   0x2   :  { %14 = vsyncpa [#allocation9], 0 }
   0x3   :  { %15 = vsyncpa [#allocation12], 0 }
   0x4   :  { %16 = vsyncpa [#allocation4], 0  ;;  %s706_s24 = smov [#allocation5]   ;;  %s707_s26 = smov [#allocation8]  }
   0x5   :  { %s35_s25 = sshll.u32 %s706_s24, 4  ;;  %s54_s27 = sshll.u32 %s707_s26, 4  ;;  %s36_s25 = int_to_ptr.vmem [resolvable:$true] %s35_s25  ;;  %s760_s27 = int_to_ptr.vmem [resolvable:$true] %s54_s27 }
   0x6   :  { %s520_s30 = scalar_lea.hbm %s895_s1, 16 }
   0x7   :  { %p521_p0 = scmp.ne.s32.totalorder %s895_s1, %s520_s30  ;;  %p524_p1 = scmp.lt.u32.totalorder %s520_s30, %s895_s1 }
   0x9   :  { %p526_p2 = pnand %p524_p1, %p521_p0 }
   0xb   :  { %529 = shalt.err (!%p526_p2)
}
   0xc   :  { %s530_s12 = scalar_lea.vmem %s36_s25, 16  ;;  %s534_s13 = scalar_lea.vmem %s36_s25, 32 }
   0xd   :  { %p531_p3 = scmp.ne.s32.totalorder %s36_s25, %s530_s12  ;;  %p535_p4 = scmp.lt.s32.totalorder %s36_s25, %s36_s25 }
   0xe   :  { %p536_p5 = scmp.lt.s32.totalorder %s534_s13, %s530_s12 }
  0x10   :  { %p537_p6 = por %p536_p5, %p535_p4 }
  0x12   :  { %p538_p7 = pnand %p537_p6, %p531_p3 }
  0x14   :  { %541 = shalt.err (!%p538_p7)
}
  0x15   :  { %38 = dma.hbm_to_vmem [thread:$0]  %s895_s1, 16, %s36_s25, [#allocation6]  }
  0x16   :  { %s542_s18 = scalar_lea.hbm %s897_s3, 1024 }
  0x17   :  { %p543_p8 = scmp.ne.s32.totalorder %s897_s3, %s542_s18  ;;  %p546_p9 = scmp.lt.u32.totalorder %s542_s18, %s897_s3 }
  0x19   :  { %p548_p10 = pnand %p546_p9, %p543_p8 }
  0x1b   :  { %551 = shalt.err (!%p548_p10)
}
  0x1c   :  { %s552_s23 = scalar_lea.vmem %s760_s27, 1024  ;;  %p557_p12 = scmp.lt.s32.totalorder %s760_s27, %s760_s27 }
  0x1d   :  { %p553_p11 = scmp.ne.s32.totalorder %s760_s27, %s552_s23  ;;  %p558_p13 = scmp.lt.s32.totalorder %s552_s23, %s552_s23 }
  0x1f   :  { %p559_p0 = por %p558_p13, %p557_p12 }
  0x21   :  { %p560_p1 = pnand %p559_p0, %p553_p11 }
  0x23   :  { %563 = shalt.err (!%p560_p1)
}
  0x24   :  { %s708_s1 = smov 64   ;;  %s709_s24 = smov 4  }
  0x25   :  { %60 = dma.hbm_to_vmem [thread:$0]  %s897_s3, 1024, %s760_s27, [#allocation9], %s708_s1, %s708_s1, %s709_s24  }
  0x26   :  { %s710_s28 = smov [#allocation11]   ;;  %s711_s30 = smov [#allocation2]  }
  0x27   :  { %s76_s29 = sshll.u32 %s710_s28, 4  ;;  %s22_s8 = sshll.u32 %s711_s30, 4  ;;  %s77_s29 = int_to_ptr.vmem [resolvable:$true] %s76_s29  ;;  %s791_s8 = int_to_ptr.vmem [resolvable:$true] %s22_s8 }
  0x28   :  { %s564_s11 = scalar_lea.hbm %s899_s5, 1024 }
  0x29   :  { %p565_p2 = scmp.ne.s32.totalorder %s899_s5, %s564_s11  ;;  %p568_p3 = scmp.lt.u32.totalorder %s564_s11, %s899_s5 }
  0x2b   :  { %p570_p4 = pnand %p568_p3, %p565_p2 }
  0x2d   :  { %573 = shalt.err (!%p570_p4)
}
  0x2e   :  { %s574_s3 = scalar_lea.vmem %s77_s29, 1024  ;;  %p579_p6 = scmp.lt.s32.totalorder %s77_s29, %s77_s29 }
  0x2f   :  { %p575_p5 = scmp.ne.s32.totalorder %s77_s29, %s574_s3  ;;  %p580_p7 = scmp.lt.s32.totalorder %s574_s3, %s574_s3 }
  0x31   :  { %p581_p8 = por %p580_p7, %p579_p6 }
  0x33   :  { %p582_p9 = pnand %p581_p8, %p575_p5 }
  0x35   :  { %585 = shalt.err (!%p582_p9)
}
  0x36   :  { %82 = dma.hbm_to_vmem [thread:$0]  %s899_s5, 1024, %s77_s29, [#allocation12], %s708_s1, %s708_s1, %s709_s24  }
  0x37   :  { %s586_s19 = scalar_lea.hbm %s894_s0, 256 }
  0x38   :  { %p587_p10 = scmp.ne.s32.totalorder %s894_s0, %s586_s19  ;;  %p590_p11 = scmp.lt.u32.totalorder %s586_s19, %s894_s0 }
  0x3a   :  { %p592_p12 = pnand %p590_p11, %p587_p10 }
  0x3c   :  { %595 = shalt.err (!%p592_p12)
}
  0x3d   :  { %s596_s25 = scalar_lea.vmem %s791_s8, 256  ;;  %p601_p0 = scmp.lt.s32.totalorder %s791_s8, %s791_s8 }
  0x3e   :  { %p597_p13 = scmp.ne.s32.totalorder %s791_s8, %s596_s25  ;;  %p602_p1 = scmp.lt.s32.totalorder %s596_s25, %s596_s25 }
  0x40   :  { %p603_p2 = por %p602_p1, %p601_p0 }
  0x42   :  { %p604_p3 = pnand %p603_p2, %p597_p13 }
  0x44   :  { %607 = shalt.err (!%p604_p3)
}
  0x45   :  { %s712_s5 = smov 128   ;;  %s713_s1 = smov 8  }
  0x46   :  { %28 = dma.hbm_to_vmem [thread:$0]  %s894_s0, 256, %s791_s8, [#allocation3], %s712_s5, %s712_s5, %s713_s1  }
  0x47   :  { %s714_s28 = smov [#allocation7]   ;;  %s715_s30 = smov [#allocation10]  }
  0x48   :  { %s45_s29 = sshll.u32 %s714_s28, 4  ;;  %s67_s9 = sshll.u32 %s715_s30, 4  ;;  %s46_s29 = int_to_ptr.vmem [resolvable:$true] %s45_s29  ;;  %s68_s9 = int_to_ptr.vmem [resolvable:$true] %s67_s9 }
  0x49   :  { %s608_s12 = scalar_lea.hbm %s896_s2, 16 }
  0x4a   :  { %p609_p4 = scmp.ne.s32.totalorder %s896_s2, %s608_s12  ;;  %p612_p5 = scmp.lt.u32.totalorder %s608_s12, %s896_s2 }
  0x4c   :  { %p614_p6 = pnand %p612_p5, %p609_p4 }
  0x4e   :  { %617 = shalt.err (!%p614_p6)
}
  0x4f   :  { %s618_s0 = scalar_lea.vmem %s46_s29, 16  ;;  %s622_s8 = scalar_lea.vmem %s46_s29, 32 }
  0x50   :  { %p619_p7 = scmp.ne.s32.totalorder %s46_s29, %s618_s0  ;;  %p623_p8 = scmp.lt.s32.totalorder %s46_s29, %s46_s29 }
  0x51   :  { %p624_p9 = scmp.lt.s32.totalorder %s622_s8, %s618_s0 }
  0x53   :  { %p625_p10 = por %p624_p9, %p623_p8 }
  0x55   :  { %p626_p11 = pnand %p625_p10, %p619_p7 }
  0x57   :  { %629 = shalt.err (!%p626_p11)
}
  0x58   :  { %48 = dma.hbm_to_vmem [thread:$0]  %s896_s2, 16, %s46_s29, [#allocation6]  }
  0x59   :  { %s630_s19 = scalar_lea.hbm %s898_s4, 16 }
  0x5a   :  { %p631_p12 = scmp.ne.s32.totalorder %s898_s4, %s630_s19  ;;  %p634_p13 = scmp.lt.u32.totalorder %s630_s19, %s898_s4 }
  0x5c   :  { %p636_p0 = pnand %p634_p13, %p631_p12 }
  0x5e   :  { %639 = shalt.err (!%p636_p0)
}
  0x5f   :  { %s640_s25 = scalar_lea.vmem %s68_s9, 16  ;;  %s644_s24 = scalar_lea.vmem %s68_s9, 32 }
  0x60   :  { %p641_p1 = scmp.ne.s32.totalorder %s68_s9, %s640_s25  ;;  %p645_p2 = scmp.lt.s32.totalorder %s68_s9, %s68_s9 }
  0x61   :  { %p646_p3 = scmp.lt.s32.totalorder %s644_s24, %s640_s25 }
  0x63   :  { %p647_p4 = por %p646_p3, %p645_p2 }
  0x65   :  { %p648_p5 = pnand %p647_p4, %p641_p1 }
  0x67   :  { %651 = shalt.err (!%p648_p5)
}
  0x68   :  { %70 = dma.hbm_to_vmem [thread:$0]  %s898_s4, 16, %s68_s9, [#allocation9]  }
  0x69   :  { %s716_s28 = smov [#allocation13]   ;;  %s652_s11 = scalar_lea.hbm %s900_s6, 16 }
  0x6a   :  { %s89_s29 = sshll.u32 %s716_s28, 4  ;;  %p653_p6 = scmp.ne.s32.totalorder %s900_s6, %s652_s11  ;;  %s90_s29 = int_to_ptr.vmem [resolvable:$true] %s89_s29 }
  0x6b   :  { %p656_p7 = scmp.lt.u32.totalorder %s652_s11, %s900_s6 }
  0x6d   :  { %p658_p8 = pnand %p656_p7, %p653_p6 }
  0x6f   :  { %661 = shalt.err (!%p658_p8)
}
  0x70   :  { %s662_s3 = scalar_lea.vmem %s90_s29, 16  ;;  %s666_s4 = scalar_lea.vmem %s90_s29, 32 }
  0x71   :  { %p663_p9 = scmp.ne.s32.totalorder %s90_s29, %s662_s3  ;;  %p667_p10 = scmp.lt.s32.totalorder %s90_s29, %s90_s29 }
  0x72   :  { %p668_p11 = scmp.lt.s32.totalorder %s666_s4, %s662_s3 }
  0x74   :  { %p669_p12 = por %p668_p11, %p667_p10 }
  0x76   :  { %p670_p13 = pnand %p669_p12, %p663_p9 }
  0x78   :  { %673 = shalt.err (!%p670_p13)
}
  0x79   :  { %92 = dma.hbm_to_vmem [thread:$0]  %s900_s6, 16, %s90_s29, [#allocation12]  }
  0x7a   :  { %696 = dma.done.wait [#allocation3], 256  }
  0x7b   :  { %697 = vsyncadd [#allocation3], 4294967040 }
  0x7c   :  { %698 = dma.done.wait [#allocation6], 32  }
  0x7d   :  { %699 = vsyncadd [#allocation6], 4294967264 }
  0x7e   :  { %700 = dma.done.wait [#allocation9], 1040  }
  0x7f   :  { %701 = vsyncadd [#allocation9], 4294966256 }
  0x80   :  { %702 = dma.done.wait [#allocation12], 1040  }
  0x81   :  { %703 = vsyncadd [#allocation12], 4294966256  ;;  %v115_v0 = vld [vmem:[#allocation2] sm:$0xff]  ;;  %v116_v1 = vld [vmem:[#allocation2 + $0x8] sm:$0xff]  ;;  %v717_v3 = vmov 0.0   ;;  %vm718_vm0 = vmmov 0  }
  0x82   :  { %119 = vadd.xlane.f32.xlu0 %v115_v0  ;;  %v500_v2 = vld [vmem:[#allocation8] sm:$0xff]   ;;  %446 = vmatprep.subr.bf16.mxu0 %v717_v3  ;;  %v501_v12 = vld [vmem:[#allocation8 + $0x8] sm:$0xff]   ;;  %v502_v13 = vld [vmem:[#allocation8 + $0x10] sm:$0xff]   ;;  %s719_s6 = smov [#allocation14]  }
  0x83   :  { %466 = vmatprep.subr.bf16.mxu1 %v717_v3  ;;  %447 = vmatpush3.bf16.msra.mxu0 %v500_v2  ;;  %v503_v14 = vld [vmem:[#allocation8 + $0x18] sm:$0xff]   ;;  %v504_v15 = vld [vmem:[#allocation8 + $0x20] sm:$0xff]   ;;  %v505_v16 = vld [vmem:[#allocation8 + $0x28] sm:$0xff]   ;;  %s393_s8 = sshll.u32 %s719_s6, 4  ;;  %s394_s8 = int_to_ptr.vmem [resolvable:$true] %s393_s8 }
  0x84   :  { %448 = vmatprep.subr.bf16.mxu0 %v717_v3  ;;  %462 = vmatprep.mubr.msk.bf16.mxu0 %vm718_vm0, %v717_v3  ;;  %v506_v17 = vld [vmem:[#allocation8 + $0x30] sm:$0xff]   ;;  %v507_v18 = vld [vmem:[#allocation8 + $0x38] sm:$0xff]   ;;  %v508_v19 = vld [vmem:[#allocation11] sm:$0xff]   ;;  %s674_s27 = scalar_lea.vmem %s394_s8, 256  ;;  %p679_p1 = scmp.lt.s32.totalorder %s394_s8, %s394_s8 }
  0x85   :  { %482 = vmatprep.mubr.msk.bf16.mxu1 %vm718_vm0, %v717_v3  ;;  %467 = vmatpush3.bf16.msra.mxu1 %v508_v19  ;;  %v509_v20 = vld [vmem:[#allocation11 + $0x8] sm:$0xff]   ;;  %v510_v21 = vld [vmem:[#allocation11 + $0x10] sm:$0xff]   ;;  %v511_v22 = vld [vmem:[#allocation11 + $0x18] sm:$0xff]   ;;  %p675_p0 = scmp.ne.s32.totalorder %s394_s8, %s674_s27  ;;  %p680_p2 = scmp.lt.s32.totalorder %s674_s27, %s674_s27 }
  0x86   :  { %121 = vadd.xlane.f32.xlu0 %v116_v1  ;;  %468 = vmatprep.subr.bf16.mxu1 %v717_v3  ;;  %v512_v23 = vld [vmem:[#allocation11 + $0x20] sm:$0xff]   ;;  %v513_v24 = vld [vmem:[#allocation11 + $0x28] sm:$0xff]   ;;  %v408_v33 = vld [vmem:[#allocation5] ss:$0 sm:$0xff] }
  0x87   :  { %449 = vmatpush3.bf16.msra.mxu0 %v501_v12  ;;  %v409_v37 = vld [vmem:[#allocation7] ss:$0 sm:$0xff]  ;;  %v514_v42 = vld [vmem:[#allocation11 + $0x30] sm:$0xff]   ;;  %v410_v44 = vld [vmem:[#allocation10] ss:$0 sm:$0xff]  ;;  %p681_p3 = por %p680_p2, %p679_p1 }
  0x88   :  { %450 = vmatprep.subr.bf16.mxu0 %v717_v3  ;;  %v515_v43 = vld [vmem:[#allocation11 + $0x38] sm:$0xff]   ;;  %v419_v54 = vld [vmem:[#allocation13] ss:$0 sm:$0xff] }
  0x89   :  { %469 = vmatpush3.bf16.msra.mxu1 %v509_v20  ;;  %p682_p4 = pnand %p681_p3, %p675_p0 }
  0x8a   :  { %470 = vmatprep.subr.bf16.mxu1 %v717_v3 }
  0x8b   :  { %451 = vmatpush3.bf16.msra.mxu0 %v502_v13 }
  0x8c   :  { %452 = vmatprep.subr.bf16.mxu0 %v717_v3 }
  0x8d   :  { %471 = vmatpush3.bf16.msra.mxu1 %v510_v21 }
  0x8e   :  { %472 = vmatprep.subr.bf16.mxu1 %v717_v3 }
  0x8f   :  { %453 = vmatpush3.bf16.msra.mxu0 %v503_v14 }
  0x90   :  { %454 = vmatprep.subr.bf16.mxu0 %v717_v3 }
  0x91   :  { %473 = vmatpush3.bf16.msra.mxu1 %v511_v22 }
  0x92   :  { %474 = vmatprep.subr.bf16.mxu1 %v717_v3 }
  0x93   :  { %455 = vmatpush3.bf16.msra.mxu0 %v504_v15 }
  0x94   :  { %456 = vmatprep.subr.bf16.mxu0 %v717_v3 }
  0x95   :  { %475 = vmatpush3.bf16.msra.mxu1 %v512_v23 }
  0x96   :  { %476 = vmatprep.subr.bf16.mxu1 %v717_v3 }
  0x97   :  { %457 = vmatpush3.bf16.msra.mxu0 %v505_v16 }
  0x98   :  { %458 = vmatprep.subr.bf16.mxu0 %v717_v3 }
  0x99   :  { %477 = vmatpush3.bf16.msra.mxu1 %v513_v24 }
  0x9a   :  { %478 = vmatprep.subr.bf16.mxu1 %v717_v3 }
  0x9b   :  { %459 = vmatpush3.bf16.msra.mxu0 %v506_v17 }
  0x9c   :  { %460 = vmatprep.subr.bf16.mxu0 %v717_v3 }
  0x9d   :  { %479 = vmatpush3.bf16.msra.mxu1 %v514_v42 }
  0x9e   :  { %480 = vmatprep.subr.bf16.mxu1 %v717_v3 }
  0x9f   :  { %461 = vmatpush3.bf16.msra.mxu0 %v507_v18 }
  0xa1   :  { %481 = vmatpush3.bf16.msra.mxu1 %v515_v43 }
 0x10f   :  { %v120_v4 = vpop.xlane.xlu0 %119 }
 0x110   :  { %v124_v5 = vmul.f32 0.0078125, %v120_v4 }
 0x112   :  { %v126_v6 = vsub.f32 %v115_v0, %v124_v5 }
 0x113   :  { %v122_v7 = vpop.xlane.xlu0 %121 }
 0x114   :  { %v125_v8 = vmul.f32 0.0078125, %v122_v7  ;;  %v128_v9 = vmul.f32 %v126_v6, %v126_v6 }
 0x116   :  { %v127_v10 = vsub.f32 %v116_v1, %v125_v8  ;;  %130 = vadd.xlane.f32.xlu1 %v128_v9 }
 0x118   :  { %v129_v11 = vmul.f32 %v127_v10, %v127_v10 }
 0x11a   :  { %132 = vadd.xlane.f32.xlu1 %v129_v11 }
 0x1a3   :  { %v131_v25 = vpop.xlane.xlu1 %130 }
 0x1a4   :  { %v134_v26 = vmul.f32 0.0078125, %v131_v25 }
 0x1a6   :  { %v136_v27 = vadd.f32 1e-05, %v134_v26 }
 0x1a7   :  { %v133_v28 = vpop.xlane.xlu1 %132 }
 0x1a8   :  { %516 = vrsqrt.f32 %v136_v27  ;;  %v135_v29 = vmul.f32 0.0078125, %v133_v28 }
 0x1aa   :  { %v137_v30 = vadd.f32 1e-05, %v135_v29 }
 0x1ac   :  { %518 = vrsqrt.f32 %v137_v30 }
 0x1b2   :  { %v517_v31 = vpop.eup %516 }
 0x1b3   :  { %v140_v32 = vmul.f32 %v517_v31, %v126_v6 }
 0x1b5   :  { %v148_v36 = vmul.f32 %v408_v33, %v140_v32 }
 0x1b6   :  { %v519_v34 = vpop.eup %518 }
 0x1b7   :  { %v141_v35 = vmul.f32 %v519_v34, %v127_v10  ;;  %v156_v39 = vadd.f32 %v409_v37, %v148_v36 }
 0x1b9   :  { %v149_v38 = vmul.f32 %v408_v33, %v141_v35 }
 0x1bb   :  { %v157_v40 = vadd.f32 %v409_v37, %v149_v38 }
 0x1bd   :  { %v158_v41 = vpack.c.bf16 %v157_v40, %v156_v39 }
 0x1bf   :  { %463 = vmatmul.mubr.bf16.vlgmr.msra.gmra.mrb[0].mxu0 %v158_v41 }
 0x292   :  { %v264_v45 = vpop.f32.mrb[0].mxu0 }
 0x293   :  { %v265_v46 = vadd.f32 %v410_v44, %v264_v45  ;;  %v464_v47 = vpop.f32.mrb[1].mxu0 }
 0x294   :  { %v267_v48 = vpop.f32.mrb[2].mxu0 }
 0x295   :  { %v268_v49 = vadd.f32 %v410_v44, %v267_v48  ;;  %v465_v50 = vpop.f32.mrb[3].mxu0  ;;  %v271_v51 = vmax.f32 %v265_v46, 0.0 }
 0x297   :  { %v272_v52 = vmax.f32 %v268_v49, 0.0 }
 0x299   :  { %v273_v53 = vpack.c.bf16 %v272_v52, %v271_v51 }
 0x29b   :  { %483 = vmatmul.mubr.bf16.vlgmr.msra.gmra.mrb[0].mxu1 %v273_v53 }
 0x36e   :  { %v379_v55 = vpop.f32.mrb[0].mxu1 }
 0x36f   :  { %v380_v56 = vadd.f32 %v419_v54, %v379_v55  ;;  %v484_v57 = vpop.f32.mrb[1].mxu1 }
 0x370   :  { %v382_v58 = vpop.f32.mrb[2].mxu1 }
 0x371   :  { %386 = vst [vmem:[#allocation14] sm:$0xff] %v380_v56  ;;  %v383_v59 = vadd.f32 %v419_v54, %v382_v58  ;;  %v485_v60 = vpop.f32.mrb[3].mxu1 }
 0x373   :  { %387 = vst [vmem:[#allocation14 + $0x8] sm:$0xff] %v383_v59 }
 0x374   :  { %685 = shalt.err (!%p682_p4)
}
 0x375   :  { %s686_s18 = scalar_lea.hbm %s901_s7, 256 }
 0x376   :  { %p687_p5 = scmp.ne.s32.totalorder %s901_s7, %s686_s18  ;;  %p690_p6 = scmp.lt.u32.totalorder %s686_s18, %s901_s7 }
 0x378   :  { %p692_p7 = pnand %p690_p6, %p687_p5 }
 0x37a   :  { %695 = shalt.err (!%p692_p7)
}
 0x37b   :  { %399 = dma.vmem_to_hbm [thread:$0]  %s394_s8, 256, %s901_s7, [#allocation4], %s712_s5, %s712_s5, %s713_s1  }
 0x37c   :  { %704 = dma.done.wait [#allocation4], 256  }
 0x37d   :  { %705 = vsyncadd [#allocation4], 4294967040 }
 0x37e   :  { %403 = vsyncpa [#allocation3], 1 }
 0x37f   :  { %404 = vsyncpa [#allocation6], 1 }
 0x380   :  { %405 = vsyncpa [#allocation9], 1 }
 0x381   :  { %406 = vsyncpa [#allocation12], 1 }
 0x382   :  { %407 = vsyncpa [#allocation4], 1 }

// kernel: transformer_module_forward.9
= control target key start
LH: loop header
LB: loop body
LE: loop exit
PB: predicated region body
PF: predicated region fallthrough
CT: control target
= control target key end

     0   :  { %12 = vsyncpa [#allocation3], 0  ;;  %s1542_s0 = inlined_call_operand.hbm [shape: f32[16,128], index: 0, kind: input, shape index: {}]   ;;  %s1543_s1 = inlined_call_operand.hbm [shape: f32[1,128], index: 1, kind: input, shape index: {}]   ;;  %s1544_s2 = inlined_call_operand.hbm [shape: f32[1,128], index: 2, kind: input, shape index: {}]   ;;  %s1545_s3 = inlined_call_operand.hbm [shape: bf16[128,512], index: 3, kind: input, shape index: {}]   ;;  %s1546_s4 = inlined_call_operand.hbm [shape: f32[1,512], index: 4, kind: input, shape index: {}]   ;;  %s1547_s5 = inlined_call_operand.hbm [shape: bf16[512,128], index: 5, kind: input, shape index: {}]   ;;  %s1548_s6 = inlined_call_operand.hbm [shape: f32[1,128], index: 6, kind: input, shape index: {}]   ;;  %s1549_s7 = inlined_call_operand.hbm [shape: f32[16,128], index: 7, kind: output, shape index: {}]  }
   0x1   :  { %13 = vsyncpa [#allocation6], 0 }
   0x2   :  { %14 = vsyncpa [#allocation9], 0 }
   0x3   :  { %15 = vsyncpa [#allocation12], 0 }
   0x4   :  { %16 = vsyncpa [#allocation4], 0  ;;  %s1316_s24 = smov [#allocation5]   ;;  %s1317_s26 = smov [#allocation8]  }
   0x5   :  { %s35_s25 = sshll.u32 %s1316_s24, 4  ;;  %s54_s27 = sshll.u32 %s1317_s26, 4  ;;  %s36_s25 = int_to_ptr.vmem [resolvable:$true] %s35_s25  ;;  %s1371_s27 = int_to_ptr.vmem [resolvable:$true] %s54_s27 }
   0x6   :  { %s1130_s30 = scalar_lea.hbm %s1543_s1, 16 }
   0x7   :  { %p1131_p0 = scmp.ne.s32.totalorder %s1543_s1, %s1130_s30  ;;  %p1134_p1 = scmp.lt.u32.totalorder %s1130_s30, %s1543_s1 }
   0x9   :  { %p1136_p2 = pnand %p1134_p1, %p1131_p0 }
   0xb   :  { %1139 = shalt.err (!%p1136_p2)
}
   0xc   :  { %s1140_s12 = scalar_lea.vmem %s36_s25, 16  ;;  %s1144_s13 = scalar_lea.vmem %s36_s25, 32 }
   0xd   :  { %p1141_p3 = scmp.ne.s32.totalorder %s36_s25, %s1140_s12  ;;  %p1145_p4 = scmp.lt.s32.totalorder %s36_s25, %s36_s25 }
   0xe   :  { %p1146_p5 = scmp.lt.s32.totalorder %s1144_s13, %s1140_s12 }
  0x10   :  { %p1147_p6 = por %p1146_p5, %p1145_p4 }
  0x12   :  { %p1148_p7 = pnand %p1147_p6, %p1141_p3 }
  0x14   :  { %1151 = shalt.err (!%p1148_p7)
}
  0x15   :  { %38 = dma.hbm_to_vmem [thread:$0]  %s1543_s1, 16, %s36_s25, [#allocation6]  }
  0x16   :  { %s1152_s18 = scalar_lea.hbm %s1545_s3, 4096 }
  0x17   :  { %p1153_p8 = scmp.ne.s32.totalorder %s1545_s3, %s1152_s18  ;;  %p1156_p9 = scmp.lt.u32.totalorder %s1152_s18, %s1545_s3 }
  0x19   :  { %p1158_p10 = pnand %p1156_p9, %p1153_p8 }
  0x1b   :  { %1161 = shalt.err (!%p1158_p10)
}
  0x1c   :  { %s1162_s23 = scalar_lea.vmem %s1371_s27, 4096  ;;  %p1167_p12 = scmp.lt.s32.totalorder %s1371_s27, %s1371_s27 }
  0x1d   :  { %p1163_p11 = scmp.ne.s32.totalorder %s1371_s27, %s1162_s23  ;;  %p1168_p13 = scmp.lt.s32.totalorder %s1162_s23, %s1162_s23 }
  0x1f   :  { %p1169_p0 = por %p1168_p13, %p1167_p12 }
  0x21   :  { %p1170_p1 = pnand %p1169_p0, %p1163_p11 }
  0x23   :  { %1173 = shalt.err (!%p1170_p1)
}
  0x24   :  { %s1318_s1 = smov 256   ;;  %s1319_s24 = smov 16  }
  0x25   :  { %60 = dma.hbm_to_vmem [thread:$0]  %s1545_s3, 4096, %s1371_s27, [#allocation9], %s1318_s1, %s1318_s1, %s1319_s24  }
  0x26   :  { %s1320_s28 = smov [#allocation11]   ;;  %s1174_s9 = scalar_lea.hbm %s1547_s5, 4096 }
  0x27   :  { %s76_s29 = sshll.u32 %s1320_s28, 4  ;;  %p1175_p2 = scmp.ne.s32.totalorder %s1547_s5, %s1174_s9  ;;  %s77_s29 = int_to_ptr.vmem [resolvable:$true] %s76_s29 }
  0x28   :  { %p1178_p3 = scmp.lt.u32.totalorder %s1174_s9, %s1547_s5 }
  0x2a   :  { %p1180_p4 = pnand %p1178_p3, %p1175_p2 }
  0x2c   :  { %1183 = shalt.err (!%p1180_p4)
}
  0x2d   :  { %s1184_s14 = scalar_lea.vmem %s77_s29, 4096  ;;  %p1189_p6 = scmp.lt.s32.totalorder %s77_s29, %s77_s29 }
  0x2e   :  { %p1185_p5 = scmp.ne.s32.totalorder %s77_s29, %s1184_s14  ;;  %p1190_p7 = scmp.lt.s32.totalorder %s1184_s14, %s1184_s14 }
  0x30   :  { %p1191_p8 = por %p1190_p7, %p1189_p6 }
  0x32   :  { %p1192_p9 = pnand %p1191_p8, %p1185_p5 }
  0x34   :  { %1195 = shalt.err (!%p1192_p9)
}
  0x35   :  { %s1321_s3 = smov 64   ;;  %s1322_s27 = smov 4  }
  0x36   :  { %82 = dma.hbm_to_vmem [thread:$0]  %s1547_s5, 4096, %s77_s29, [#allocation12], %s1321_s3, %s1321_s3, %s1322_s27  }
  0x37   :  { %s1323_s17 = smov [#allocation2]   ;;  %s1196_s21 = scalar_lea.hbm %s1542_s0, 256 }
  0x38   :  { %s22_s18 = sshll.u32 %s1323_s17, 4  ;;  %p1197_p10 = scmp.ne.s32.totalorder %s1542_s0, %s1196_s21  ;;  %s23_s18 = int_to_ptr.vmem [resolvable:$true] %s22_s18 }
  0x39   :  { %p1200_p11 = scmp.lt.u32.totalorder %s1196_s21, %s1542_s0 }
  0x3b   :  { %p1202_p12 = pnand %p1200_p11, %p1197_p10 }
  0x3d   :  { %1205 = shalt.err (!%p1202_p12)
}
  0x3e   :  { %s1206_s25 = scalar_lea.vmem %s23_s18, 256  ;;  %p1211_p0 = scmp.lt.s32.totalorder %s23_s18, %s23_s18 }
  0x3f   :  { %p1207_p13 = scmp.ne.s32.totalorder %s23_s18, %s1206_s25  ;;  %p1212_p1 = scmp.lt.s32.totalorder %s1206_s25, %s1206_s25 }
  0x41   :  { %p1213_p2 = por %p1212_p1, %p1211_p0 }
  0x43   :  { %p1214_p3 = pnand %p1213_p2, %p1207_p13 }
  0x45   :  { %1217 = shalt.err (!%p1214_p3)
}
  0x46   :  { %s1324_s5 = smov 128   ;;  %s1325_s26 = smov 8  }
  0x47   :  { %28 = dma.hbm_to_vmem [thread:$0]  %s1542_s0, 256, %s23_s18, [#allocation3], %s1324_s5, %s1324_s5, %s1325_s26  }
  0x48   :  { %s1326_s30 = smov [#allocation7]   ;;  %s1327_s9 = smov [#allocation10]  }
  0x49   :  { %s45_s8 = sshll.u32 %s1326_s30, 4  ;;  %s67_s10 = sshll.u32 %s1327_s9, 4  ;;  %s46_s8 = int_to_ptr.vmem [resolvable:$true] %s45_s8  ;;  %s68_s10 = int_to_ptr.vmem [resolvable:$true] %s67_s10 }
  0x4a   :  { %s1218_s13 = scalar_lea.hbm %s1544_s2, 16 }
  0x4b   :  { %p1219_p4 = scmp.ne.s32.totalorder %s1544_s2, %s1218_s13  ;;  %p1222_p5 = scmp.lt.u32.totalorder %s1218_s13, %s1544_s2 }
  0x4d   :  { %p1224_p6 = pnand %p1222_p5, %p1219_p4 }
  0x4f   :  { %1227 = shalt.err (!%p1224_p6)
}
  0x50   :  { %s1228_s0 = scalar_lea.vmem %s46_s8, 16  ;;  %s1232_s16 = scalar_lea.vmem %s46_s8, 32 }
  0x51   :  { %p1229_p7 = scmp.ne.s32.totalorder %s46_s8, %s1228_s0  ;;  %p1233_p8 = scmp.lt.s32.totalorder %s46_s8, %s46_s8 }
  0x52   :  { %p1234_p9 = scmp.lt.s32.totalorder %s1232_s16, %s1228_s0 }
  0x54   :  { %p1235_p10 = por %p1234_p9, %p1233_p8 }
  0x56   :  { %p1236_p11 = pnand %p1235_p10, %p1229_p7 }
  0x58   :  { %1239 = shalt.err (!%p1236_p11)
}
  0x59   :  { %48 = dma.hbm_to_vmem [thread:$0]  %s1544_s2, 16, %s46_s8, [#allocation6]  }
  0x5a   :  { %s1240_s21 = scalar_lea.hbm %s1546_s4, 64 }
  0x5b   :  { %p1241_p12 = scmp.ne.s32.totalorder %s1546_s4, %s1240_s21  ;;  %p1244_p13 = scmp.lt.u32.totalorder %s1240_s21, %s1546_s4 }
  0x5d   :  { %p1246_p0 = pnand %p1244_p13, %p1241_p12 }
  0x5f   :  { %1249 = shalt.err (!%p1246_p0)
}
  0x60   :  { %s1250_s25 = scalar_lea.vmem %s68_s10, 64  ;;  %p1255_p2 = scmp.lt.s32.totalorder %s68_s10, %s68_s10 }
  0x61   :  { %p1251_p1 = scmp.ne.s32.totalorder %s68_s10, %s1250_s25  ;;  %p1256_p3 = scmp.lt.s32.totalorder %s1250_s25, %s1250_s25 }
  0x63   :  { %p1257_p4 = por %p1256_p3, %p1255_p2 }
  0x65   :  { %p1258_p5 = pnand %p1257_p4, %p1251_p1 }
  0x67   :  { %1261 = shalt.err (!%p1258_p5)
}
  0x68   :  { %70 = dma.hbm_to_vmem [thread:$0]  %s1546_s4, 64, %s68_s10, [#allocation9]  }
  0x69   :  { %s1328_s29 = smov [#allocation13]   ;;  %s1262_s11 = scalar_lea.hbm %s1548_s6, 16 }
  0x6a   :  { %s89_s30 = sshll.u32 %s1328_s29, 4  ;;  %p1263_p6 = scmp.ne.s32.totalorder %s1548_s6, %s1262_s11  ;;  %s90_s30 = int_to_ptr.vmem [resolvable:$true] %s89_s30 }
  0x6b   :  { %p1266_p7 = scmp.lt.u32.totalorder %s1262_s11, %s1548_s6 }
  0x6d   :  { %p1268_p8 = pnand %p1266_p7, %p1263_p6 }
  0x6f   :  { %1271 = shalt.err (!%p1268_p8)
}
  0x70   :  { %s1272_s27 = scalar_lea.vmem %s90_s30, 16  ;;  %s1276_s4 = scalar_lea.vmem %s90_s30, 32 }
  0x71   :  { %p1273_p9 = scmp.ne.s32.totalorder %s90_s30, %s1272_s27  ;;  %p1277_p10 = scmp.lt.s32.totalorder %s90_s30, %s90_s30 }
  0x72   :  { %p1278_p11 = scmp.lt.s32.totalorder %s1276_s4, %s1272_s27 }
  0x74   :  { %p1279_p12 = por %p1278_p11, %p1277_p10 }
  0x76   :  { %p1280_p13 = pnand %p1279_p12, %p1273_p9 }
  0x78   :  { %1283 = shalt.err (!%p1280_p13)
}
  0x79   :  { %92 = dma.hbm_to_vmem [thread:$0]  %s1548_s6, 16, %s90_s30, [#allocation12]  }
  0x7a   :  { %1306 = dma.done.wait [#allocation3], 256  }
  0x7b   :  { %1307 = vsyncadd [#allocation3], 4294967040 }
  0x7c   :  { %1308 = dma.done.wait [#allocation6], 32  }
  0x7d   :  { %1309 = vsyncadd [#allocation6], 4294967264 }
  0x7e   :  { %1310 = dma.done.wait [#allocation9], 4160  }
  0x7f   :  { %1311 = vsyncadd [#allocation9], 4294963136 }
  0x80   :  { %1312 = dma.done.wait [#allocation12], 4112  }
  0x81   :  { %1313 = vsyncadd [#allocation12], 4294963184  ;;  %v1465_v0 = vld [vmem:[#allocation2] sm:$0xff]  ;;  %v1467_v1 = vld [vmem:[#allocation2 + $0x8] sm:$0xff]  ;;  %v1329_v36 = vmov 0   ;;  %s1330_s6 = smov [#allocation14]  }
  0x82   :  { %119 = vadd.xlane.f32.xlu0 %v1465_v0  ;;  %v1030_v2 = vld [vmem:[#allocation8 + $0x4] ss:$16 sps:$4 sm:$0xff]   ;;  %v1032_v3 = vld [vmem:[#allocation8 + $0xc] ss:$16 sps:$4 sm:$0xff]   ;;  %v1034_v4 = vld [vmem:[#allocation8] ss:$16 sps:$4 sm:$0xff]   ;;  %405 = vmatprep.mubr.bf16.mxu0 %v1329_v36 }
  0x83   :  { %v1035_v5 = vld [vmem:[#allocation8 + $0x8] ss:$16 sps:$4 sm:$0xff]   ;;  %v1036_v6 = vld [vmem:[#allocation8 + $0x24] ss:$16 sps:$4 sm:$0xff]   ;;  %v1038_v7 = vld [vmem:[#allocation8 + $0x2c] ss:$16 sps:$4 sm:$0xff]   ;;  %373 = vmatprep.subr.bf16.mxu0 %v1030_v2  ;;  %416 = vmatprep.subr.bf16.mxu1 %v1032_v3 }
  0x84   :  { %374 = vmatpush1.bf16.msra.mxu0 %v1034_v4  ;;  %417 = vmatpush1.bf16.msra.mxu1 %v1035_v5  ;;  %v1040_v16 = vld [vmem:[#allocation8 + $0x20] ss:$16 sps:$4 sm:$0xff]   ;;  %v1041_v17 = vld [vmem:[#allocation8 + $0x28] ss:$16 sps:$4 sm:$0xff]   ;;  %v1042_v18 = vld [vmem:[#allocation8 + $0x44] ss:$16 sps:$4 sm:$0xff]  }
  0x85   :  { %375 = vmatprep.subr.bf16.mxu0 %v1036_v6  ;;  %418 = vmatprep.subr.bf16.mxu1 %v1038_v7  ;;  %v1044_v19 = vld [vmem:[#allocation8 + $0x4c] ss:$16 sps:$4 sm:$0xff]   ;;  %v1046_v20 = vld [vmem:[#allocation8 + $0x40] ss:$16 sps:$4 sm:$0xff]   ;;  %v1047_v21 = vld [vmem:[#allocation8 + $0x48] ss:$16 sps:$4 sm:$0xff]  }
  0x86   :  { %121 = vadd.xlane.f32.xlu0 %v1467_v1  ;;  %v1048_v22 = vld [vmem:[#allocation8 + $0x64] ss:$16 sps:$4 sm:$0xff]   ;;  %v1050_v23 = vld [vmem:[#allocation8 + $0x6c] ss:$16 sps:$4 sm:$0xff]   ;;  %v1052_v24 = vld [vmem:[#allocation8 + $0x60] ss:$16 sps:$4 sm:$0xff]   ;;  %448 = vmatprep.mubr.bf16.mxu1 %v1329_v36 }
  0x87   :  { %v1053_v25 = vld [vmem:[#allocation8 + $0x68] ss:$16 sps:$4 sm:$0xff]   ;;  %v1054_v26 = vld [vmem:[#allocation8 + $0x84] ss:$16 sps:$4 sm:$0xff]   ;;  %v1056_v27 = vld [vmem:[#allocation8 + $0x8c] ss:$16 sps:$4 sm:$0xff]  }
  0x88   :  { %376 = vmatpush1.bf16.msra.mxu0 %v1040_v16  ;;  %419 = vmatpush1.bf16.msra.mxu1 %v1041_v17  ;;  %v1058_v28 = vld [vmem:[#allocation8 + $0x80] ss:$16 sps:$4 sm:$0xff]   ;;  %v1059_v29 = vld [vmem:[#allocation8 + $0x88] ss:$16 sps:$4 sm:$0xff]   ;;  %v1060_v30 = vld [vmem:[#allocation8 + $0xa4] ss:$16 sps:$4 sm:$0xff]  }
  0x89   :  { %377 = vmatprep.subr.bf16.mxu0 %v1042_v18  ;;  %420 = vmatprep.subr.bf16.mxu1 %v1044_v19  ;;  %v1062_v31 = vld [vmem:[#allocation8 + $0xac] ss:$16 sps:$4 sm:$0xff]   ;;  %v1064_v32 = vld [vmem:[#allocation8 + $0xa0] ss:$16 sps:$4 sm:$0xff]   ;;  %v1065_v33 = vld [vmem:[#allocation8 + $0xa8] ss:$16 sps:$4 sm:$0xff]  }
  0x8a   :  { %v1066_v34 = vld [vmem:[#allocation8 + $0xc4] ss:$16 sps:$4 sm:$0xff]   ;;  %v1068_v35 = vld [vmem:[#allocation8 + $0xcc] ss:$16 sps:$4 sm:$0xff]   ;;  %v1070_v37 = vld [vmem:[#allocation8 + $0xc0] ss:$16 sps:$4 sm:$0xff]  }
  0x8b   :  { %v1071_v38 = vld [vmem:[#allocation8 + $0xc8] ss:$16 sps:$4 sm:$0xff]   ;;  %v1072_v39 = vld [vmem:[#allocation8 + $0xe4] ss:$16 sps:$4 sm:$0xff]   ;;  %v1074_v40 = vld [vmem:[#allocation8 + $0xec] ss:$16 sps:$4 sm:$0xff]  }
  0x8c   :  { %378 = vmatpush1.bf16.msra.mxu0 %v1046_v20  ;;  %421 = vmatpush1.bf16.msra.mxu1 %v1047_v21  ;;  %v1076_v41 = vld [vmem:[#allocation8 + $0xe0] ss:$16 sps:$4 sm:$0xff]   ;;  %v1077_v42 = vld [vmem:[#allocation8 + $0xe8] ss:$16 sps:$4 sm:$0xff]   ;;  %v904_v51 = vld [vmem:[#allocation5] ss:$0 sm:$0xff] }
  0x8d   :  { %379 = vmatprep.subr.bf16.mxu0 %v1048_v22  ;;  %422 = vmatprep.subr.bf16.mxu1 %v1050_v23  ;;  %v905_v55 = vld [vmem:[#allocation7] ss:$0 sm:$0xff]  ;;  %v1078_v60 = vld [vmem:[#allocation11 + $0x40] sm:$0xff]   ;;  %v1082_v2 = vld [vmem:[#allocation11 + $0x48] sm:$0xff]   ;;  %s889_s0 = sshll.u32 %s1330_s6, 4  ;;  %s890_s0 = int_to_ptr.vmem [resolvable:$true] %s889_s0 }
  0x8e   :  { %v1079_v61 = vld [vmem:[#allocation11 + $0xc0] sm:$0xff]   ;;  %v1083_v3 = vld [vmem:[#allocation11 + $0xc8] sm:$0xff]   ;;  %v1086_v6 = vld [vmem:[#allocation11 + $0x50] sm:$0xff]   ;;  %s1284_s16 = scalar_lea.vmem %s890_s0, 256  ;;  %p1289_p1 = scmp.lt.s32.totalorder %s890_s0, %s890_s0 }
  0x8f   :  { %v1080_v62 = vld [vmem:[#allocation11] sm:$0xff]   ;;  %v1084_v4 = vld [vmem:[#allocation11 + $0x8] sm:$0xff]   ;;  %v1087_v7 = vld [vmem:[#allocation11 + $0xd0] sm:$0xff]   ;;  %p1285_p0 = scmp.ne.s32.totalorder %s890_s0, %s1284_s16  ;;  %p1290_p2 = scmp.lt.s32.totalorder %s1284_s16, %s1284_s16 }
  0x90   :  { %380 = vmatpush1.bf16.msra.mxu0 %v1052_v24  ;;  %423 = vmatpush1.bf16.msra.mxu1 %v1053_v25  ;;  %v1081_v63 = vld [vmem:[#allocation11 + $0x80] sm:$0xff]   ;;  %v1085_v5 = vld [vmem:[#allocation11 + $0x88] sm:$0xff]   ;;  %v1102_v22 = vld [vmem:[#allocation11 + $0x70] sm:$0xff]  }
  0x91   :  { %381 = vmatprep.subr.bf16.mxu0 %v1054_v26  ;;  %424 = vmatprep.subr.bf16.mxu1 %v1056_v27  ;;  %v1096_v16 = vld [vmem:[#allocation11 + $0x20] sm:$0xff]   ;;  %v1098_v18 = vld [vmem:[#allocation11 + $0x68] sm:$0xff]   ;;  %v1103_v23 = vld [vmem:[#allocation11 + $0xf0] sm:$0xff]   ;;  %p1291_p3 = por %p1290_p2, %p1289_p1 }
  0x92   :  { %v1097_v17 = vld [vmem:[#allocation11 + $0xa0] sm:$0xff]   ;;  %v1099_v19 = vld [vmem:[#allocation11 + $0xe8] sm:$0xff]   ;;  %v1104_v24 = vld [vmem:[#allocation11 + $0x30] sm:$0xff]  }
  0x93   :  { %v1100_v20 = vld [vmem:[#allocation11 + $0x28] sm:$0xff]   ;;  %v1105_v25 = vld [vmem:[#allocation11 + $0xb0] sm:$0xff]   ;;  %v1106_v26 = vld [vmem:[#allocation11 + $0x78] sm:$0xff]   ;;  %p1292_p4 = pnand %p1291_p3, %p1285_p0 }
  0x94   :  { %382 = vmatpush1.bf16.msra.mxu0 %v1058_v28  ;;  %425 = vmatpush1.bf16.msra.mxu1 %v1059_v29  ;;  %v1101_v21 = vld [vmem:[#allocation11 + $0xa8] sm:$0xff]   ;;  %v1107_v27 = vld [vmem:[#allocation11 + $0xf8] sm:$0xff]  }
  0x95   :  { %383 = vmatprep.subr.bf16.mxu0 %v1060_v30  ;;  %426 = vmatprep.subr.bf16.mxu1 %v1062_v31  ;;  %v1108_v28 = vld [vmem:[#allocation11 + $0x38] sm:$0xff]   ;;  %v193_v30 = vlaneseq }
  0x96   :  { %v1109_v29 = vld [vmem:[#allocation11 + $0xb8] sm:$0xff]  }
  0x97   :  { %v194_v31 = vshrl.u32 %v193_v30, 7 }
  0x98   :  { %384 = vmatpush1.bf16.msra.mxu0 %v1064_v32  ;;  %427 = vmatpush1.bf16.msra.mxu1 %v1065_v33 }
  0x99   :  { %385 = vmatprep.subr.bf16.mxu0 %v1066_v34  ;;  %428 = vmatprep.subr.bf16.mxu1 %v1068_v35  ;;  %v195_v32 = vsub.s32 0, %v194_v31  ;;  %v203_v33 = vsub.s32 2, %v194_v31  ;;  %v191_v34 = vld [vmem:[#allocation10] sm:$0xf]  ;;  %v199_v35 = vsub.s32 1, %v194_v31  ;;  %v207_v36 = vsub.s32 3, %v194_v31 }
  0x9c   :  { %386 = vmatpush1.bf16.msra.mxu0 %v1070_v37  ;;  %429 = vmatpush1.bf16.msra.mxu1 %v1071_v38  ;;  %v196_v37 = vrot.slane %v191_v34, %v195_v32  ;;  %v204_v38 = vrot.slane %v191_v34, %v203_v33 }
  0x9d   :  { %387 = vmatprep.subr.bf16.mxu0 %v1072_v39  ;;  %430 = vmatprep.subr.bf16.mxu1 %v1074_v40  ;;  %v200_v39 = vrot.slane %v191_v34, %v199_v35  ;;  %v208_v40 = vrot.slane %v191_v34, %v207_v36 }
  0xa0   :  { %388 = vmatpush1.bf16.msra.mxu0 %v1076_v41  ;;  %431 = vmatpush1.bf16.msra.mxu1 %v1077_v42 }
  0xa1   :  { %971 = vmatprep.subr.bf16.mxu0 %v1078_v60  ;;  %993 = vmatprep.subr.bf16.mxu1 %v1079_v61 }
 0x10f   :  { %v120_v8 = vpop.xlane.xlu0 %119 }
 0x110   :  { %v124_v9 = vmul.f32 0.0078125, %v120_v8  ;;  %v1088_v8 = vld [vmem:[#allocation11 + $0x10] sm:$0xff]  }
 0x112   :  { %v1472_v10 = vsub.f32 %v1465_v0, %v124_v9  ;;  %v1089_v9 = vld [vmem:[#allocation11 + $0x90] sm:$0xff]  }
 0x113   :  { %v122_v11 = vpop.xlane.xlu0 %121 }
 0x114   :  { %v125_v12 = vmul.f32 0.0078125, %v122_v11  ;;  %v128_v13 = vmul.f32 %v1472_v10, %v1472_v10  ;;  %v1091_v11 = vld [vmem:[#allocation11 + $0xd8] sm:$0xff]  }
 0x116   :  { %v1477_v14 = vsub.f32 %v1467_v1, %v125_v12  ;;  %130 = vadd.xlane.f32.xlu1 %v128_v13  ;;  %v1092_v12 = vld [vmem:[#allocation11 + $0x18] sm:$0xff]  }
 0x117   :  { %v1093_v13 = vld [vmem:[#allocation11 + $0x98] sm:$0xff]  }
 0x118   :  { %v129_v15 = vmul.f32 %v1477_v14, %v1477_v14 }
 0x11a   :  { %132 = vadd.xlane.f32.xlu1 %v129_v15  ;;  %v1095_v15 = vld [vmem:[#allocation11 + $0xe0] sm:$0xff]  }
 0x1a3   :  { %v131_v43 = vpop.xlane.xlu1 %130 }
 0x1a4   :  { %v134_v44 = vmul.f32 0.0078125, %v131_v43 }
 0x1a6   :  { %v136_v45 = vadd.f32 1e-05, %v134_v44 }
 0x1a7   :  { %v133_v46 = vpop.xlane.xlu1 %132 }
 0x1a8   :  { %1110 = vrsqrt.f32 %v136_v45  ;;  %v135_v47 = vmul.f32 0.0078125, %v133_v46 }
 0x1aa   :  { %v137_v48 = vadd.f32 1e-05, %v135_v47 }
 0x1ac   :  { %1112 = vrsqrt.f32 %v137_v48 }
 0x1b2   :  { %v1111_v49 = vpop.eup %1110 }
 0x1b3   :  { %v140_v50 = vmul.f32 %v1111_v49, %v1472_v10  ;;  %v1090_v10 = vld [vmem:[#allocation11 + $0x58] sm:$0xff]  }
 0x1b5   :  { %v148_v54 = vmul.f32 %v904_v51, %v140_v50 }
 0x1b6   :  { %v1113_v52 = vpop.eup %1112 }
 0x1b7   :  { %v141_v53 = vmul.f32 %v1113_v52, %v1477_v14  ;;  %v156_v57 = vadd.f32 %v905_v55, %v148_v54  ;;  %v1094_v14 = vld [vmem:[#allocation11 + $0x60] sm:$0xff]  }
 0x1b9   :  { %v149_v56 = vmul.f32 %v904_v51, %v141_v53 }
 0x1bb   :  { %v157_v58 = vadd.f32 %v905_v55, %v149_v56 }
 0x1bd   :  { %v158_v59 = vpack.c.bf16 %v157_v58, %v156_v57 }
 0x1bf   :  { %406 = vmatmul.mubr.bf16.vlgmr.msra.gmra.mrb[0].mxu0 %v158_v59  ;;  %449 = vmatmul.mubr.bf16.vlgmr.msra.gmra.mrb[0].mxu1 %v158_v59 }
 0x1c0   :  { %972 = vmatpush3.bf16.msra.mxu0 %v1080_v62  ;;  %994 = vmatpush3.bf16.msra.mxu1 %v1081_v63 }
 0x1c1   :  { %973 = vmatprep.subr.bf16.mxu0 %v1082_v2  ;;  %995 = vmatprep.subr.bf16.mxu1 %v1083_v3 }
 0x1c4   :  { %974 = vmatpush3.bf16.msra.mxu0 %v1084_v4  ;;  %996 = vmatpush3.bf16.msra.mxu1 %v1085_v5 }
 0x1c5   :  { %975 = vmatprep.subr.bf16.mxu0 %v1086_v6  ;;  %997 = vmatprep.subr.bf16.mxu1 %v1087_v7 }
 0x1c8   :  { %976 = vmatpush3.bf16.msra.mxu0 %v1088_v8  ;;  %998 = vmatpush3.bf16.msra.mxu1 %v1089_v9 }
 0x1c9   :  { %977 = vmatprep.subr.bf16.mxu0 %v1090_v10  ;;  %999 = vmatprep.subr.bf16.mxu1 %v1091_v11 }
 0x1cc   :  { %978 = vmatpush3.bf16.msra.mxu0 %v1092_v12  ;;  %1000 = vmatpush3.bf16.msra.mxu1 %v1093_v13 }
 0x1cd   :  { %979 = vmatprep.subr.bf16.mxu0 %v1094_v14  ;;  %1001 = vmatprep.subr.bf16.mxu1 %v1095_v15 }
 0x1d0   :  { %980 = vmatpush3.bf16.msra.mxu0 %v1096_v16  ;;  %1002 = vmatpush3.bf16.msra.mxu1 %v1097_v17 }
 0x1d1   :  { %981 = vmatprep.subr.bf16.mxu0 %v1098_v18  ;;  %1003 = vmatprep.subr.bf16.mxu1 %v1099_v19 }
 0x1d4   :  { %982 = vmatpush3.bf16.msra.mxu0 %v1100_v20  ;;  %1004 = vmatpush3.bf16.msra.mxu1 %v1101_v21 }
 0x1d5   :  { %983 = vmatprep.subr.bf16.mxu0 %v1102_v22  ;;  %1005 = vmatprep.subr.bf16.mxu1 %v1103_v23 }
 0x1d8   :  { %984 = vmatpush3.bf16.msra.mxu0 %v1104_v24  ;;  %1006 = vmatpush3.bf16.msra.mxu1 %v1105_v25 }
 0x1d9   :  { %985 = vmatprep.subr.bf16.mxu0 %v1106_v26  ;;  %1007 = vmatprep.subr.bf16.mxu1 %v1107_v27 }
 0x1dc   :  { %986 = vmatpush3.bf16.msra.mxu0 %v1108_v28  ;;  %1008 = vmatpush3.bf16.msra.mxu1 %v1109_v29 }
 0x292   :  { %v407_v41 = vpop.f32.mrb[0].mxu0  ;;  %v450_v42 = vpop.f32.mrb[0].mxu1 }
 0x293   :  { %v1483_v43 = vadd.f32 %v407_v41, %v196_v37  ;;  %v1485_v44 = vadd.f32 %v450_v42, %v204_v38  ;;  %v409_v45 = vpop.f32.mrb[1].mxu0  ;;  %v452_v46 = vpop.f32.mrb[1].mxu1 }
 0x294   :  { %v1487_v47 = vadd.f32 %v409_v45, %v200_v39  ;;  %v1489_v48 = vadd.f32 %v452_v46, %v208_v40  ;;  %v411_v49 = vpop.f32.mrb[2].mxu0  ;;  %v454_v50 = vpop.f32.mrb[2].mxu1 }
 0x295   :  { %v467_v51 = vmul.f32 0.044715, %v1483_v43  ;;  %v469_v52 = vmul.f32 0.044715, %v1485_v44  ;;  %v412_v53 = vadd.f32 %v411_v49, %v196_v37  ;;  %v455_v54 = vadd.f32 %v454_v50, %v204_v38  ;;  %v413_v55 = vpop.f32.mrb[3].mxu0  ;;  %v456_v56 = vpop.f32.mrb[3].mxu1 }
 0x296   :  { %v468_v57 = vmul.f32 0.044715, %v1487_v47  ;;  %v470_v58 = vmul.f32 0.044715, %v1489_v48  ;;  %v1495_v59 = vadd.f32 %v413_v55, %v200_v39  ;;  %v1497_v60 = vadd.f32 %v456_v56, %v208_v40 }
 0x297   :  { %v475_v61 = vmul.f32 %v467_v51, %v1483_v43  ;;  %v477_v62 = vmul.f32 %v469_v52, %v1485_v44  ;;  %v471_v63 = vmul.f32 0.044715, %v412_v53  ;;  %v473_v2 = vmul.f32 0.044715, %v455_v54 }
 0x298   :  { %v476_v3 = vmul.f32 %v468_v57, %v1487_v47  ;;  %v478_v4 = vmul.f32 %v470_v58, %v1489_v48  ;;  %v472_v5 = vmul.f32 0.044715, %v1495_v59  ;;  %v474_v6 = vmul.f32 0.044715, %v1497_v60 }
 0x299   :  { %v483_v7 = vmul.f32 %v475_v61, %v1483_v43  ;;  %v485_v8 = vmul.f32 %v477_v62, %v1485_v44  ;;  %v479_v9 = vmul.f32 %v471_v63, %v412_v53  ;;  %v481_v10 = vmul.f32 %v473_v2, %v455_v54 }
 0x29a   :  { %v484_v11 = vmul.f32 %v476_v3, %v1487_v47  ;;  %v486_v12 = vmul.f32 %v478_v4, %v1489_v48  ;;  %v480_v13 = vmul.f32 %v472_v5, %v1495_v59  ;;  %v482_v14 = vmul.f32 %v474_v6, %v1497_v60 }
 0x29b   :  { %v491_v15 = vadd.f32 %v483_v7, %v1483_v43  ;;  %v493_v16 = vadd.f32 %v485_v8, %v1485_v44  ;;  %v487_v17 = vmul.f32 %v479_v9, %v412_v53  ;;  %v489_v18 = vmul.f32 %v481_v10, %v455_v54 }
 0x29c   :  { %v488_v19 = vmul.f32 %v480_v13, %v1495_v59  ;;  %v490_v20 = vmul.f32 %v482_v14, %v1497_v60  ;;  %v492_v25 = vadd.f32 %v484_v11, %v1487_v47  ;;  %v494_v29 = vadd.f32 %v486_v12, %v1489_v48  ;;  %v938_v12 = vld [vmem:[#allocation13] ss:$0 sm:$0xff] }
 0x29d   :  { %v499_v21 = vmul.f32 0.7978846, %v491_v15  ;;  %v501_v22 = vmul.f32 0.7978846, %v493_v16  ;;  %v495_v23 = vadd.f32 %v487_v17, %v412_v53  ;;  %v497_v24 = vadd.f32 %v489_v18, %v455_v54 }
 0x29e   :  { %v496_v26 = vadd.f32 %v488_v19, %v1495_v59  ;;  %v500_v30 = vmul.f32 0.7978846, %v492_v25  ;;  %v498_v32 = vadd.f32 %v490_v20, %v1497_v60  ;;  %v502_v33 = vmul.f32 0.7978846, %v494_v29 }
 0x29f   :  { %1114 = vtanh.f32 %v499_v21  ;;  %v503_v27 = vmul.f32 0.7978846, %v495_v23  ;;  %v505_v28 = vmul.f32 0.7978846, %v497_v24  ;;  %v459_v41 = vmul.f32 0.5, %v1483_v43 }
 0x2a0   :  { %1116 = vtanh.f32 %v501_v22  ;;  %v504_v31 = vmul.f32 0.7978846, %v496_v26  ;;  %v506_v34 = vmul.f32 0.7978846, %v498_v32  ;;  %v463_v42 = vmul.f32 0.5, %v412_v53 }
 0x2a1   :  { %1118 = vtanh.f32 %v503_v27  ;;  %v461_v49 = vmul.f32 0.5, %v1485_v44  ;;  %v465_v50 = vmul.f32 0.5, %v455_v54  ;;  %v460_v55 = vmul.f32 0.5, %v1487_v47 }
 0x2a2   :  { %1120 = vtanh.f32 %v505_v28  ;;  %v464_v62 = vmul.f32 0.5, %v1495_v59  ;;  %v462_v53 = vmul.f32 0.5, %v1489_v48  ;;  %v466_v4 = vmul.f32 0.5, %v1497_v60 }
 0x2a3   :  { %1122 = vtanh.f32 %v500_v30 }
 0x2a4   :  { %1124 = vtanh.f32 %v504_v31 }
 0x2a5   :  { %1126 = vtanh.f32 %v502_v33 }
 0x2a6   :  { %1128 = vtanh.f32 %v506_v34 }
 0x2a9   :  { %v1115_v35 = vpop.eup %1114 }
 0x2aa   :  { %v1117_v36 = vpop.eup %1116  ;;  %v515_v37 = vadd.f32 1.0, %v1115_v35 }
 0x2ab   :  { %v1119_v38 = vpop.eup %1118  ;;  %v517_v39 = vadd.f32 1.0, %v1117_v36 }
 0x2ac   :  { %v1121_v40 = vpop.eup %1120  ;;  %v519_v45 = vadd.f32 1.0, %v1119_v38  ;;  %v523_v57 = vmul.f32 %v515_v37, %v459_v41 }
 0x2ad   :  { %v1123_v46 = vpop.eup %1122  ;;  %v521_v51 = vadd.f32 1.0, %v1121_v40  ;;  %v525_v2 = vmul.f32 %v517_v39, %v461_v49 }
 0x2ae   :  { %v1125_v52 = vpop.eup %1124  ;;  %v516_v56 = vadd.f32 1.0, %v1123_v46  ;;  %v527_v58 = vmul.f32 %v519_v45, %v463_v42 }
 0x2af   :  { %v1127_v61 = vpop.eup %1126  ;;  %v520_v63 = vadd.f32 1.0, %v1125_v52  ;;  %v529_v3 = vmul.f32 %v521_v51, %v465_v50 }
 0x2b0   :  { %v1129_v43 = vpop.eup %1128  ;;  %v518_v44 = vadd.f32 1.0, %v1127_v61  ;;  %v531_v54 = vpack.c.bf16 %v527_v58, %v523_v57  ;;  %v524_v5 = vmul.f32 %v516_v56, %v460_v55 }
 0x2b1   :  { %v528_v6 = vmul.f32 %v520_v63, %v464_v62  ;;  %v522_v7 = vadd.f32 1.0, %v1129_v43  ;;  %v533_v47 = vpack.c.bf16 %v529_v3, %v525_v2 }
 0x2b2   :  { %v526_v9 = vmul.f32 %v518_v44, %v462_v53 }
 0x2b3   :  { %v532_v8 = vpack.c.bf16 %v528_v6, %v524_v5  ;;  %v530_v10 = vmul.f32 %v522_v7, %v466_v4 }
 0x2b5   :  { %830 = vmatprep.mubr.bf16.mxu0 %v532_v8  ;;  %v534_v11 = vpack.c.bf16 %v530_v10, %v526_v9 }
 0x2b6   :  { %831 = vmatmul.mubr.bf16.vlgmr.msra.gmra.mrb[4].mxu0 %v531_v54 }
 0x2b7   :  { %871 = vmatprep.mubr.bf16.mxu1 %v534_v11 }
 0x2b8   :  { %872 = vmatmul.mubr.bf16.vlgmr.msra.gmra.mrb[4].mxu1 %v533_v47 }
 0x389   :  { %v987_v59 = vpop.f32.mrb[4].mxu0 }
 0x38a   :  { %v988_v13 = vpop.f32.mrb[5].mxu0 }
 0x38b   :  { %v1009_v48 = vpop.f32.mrb[4].mxu1  ;;  %v989_v14 = vadd.f32 %v988_v13, %v987_v59  ;;  %v990_v60 = vpop.f32.mrb[6].mxu0 }
 0x38c   :  { %v1010_v15 = vpop.f32.mrb[5].mxu1  ;;  %v991_v16 = vpop.f32.mrb[7].mxu0 }
 0x38d   :  { %v833_v17 = vadd.f32 %v989_v14, %v938_v12  ;;  %v1011_v18 = vadd.f32 %v1010_v15, %v1009_v48  ;;  %v1012_v19 = vpop.f32.mrb[6].mxu1  ;;  %v992_v20 = vadd.f32 %v991_v16, %v990_v60 }
 0x38e   :  { %v1013_v21 = vpop.f32.mrb[7].mxu1 }
 0x38f   :  { %v874_v22 = vadd.f32 %v1011_v18, %v833_v17  ;;  %v836_v23 = vadd.f32 %v992_v20, %v938_v12  ;;  %v1014_v24 = vadd.f32 %v1013_v21, %v1012_v19 }
 0x391   :  { %v880_v25 = vadd.f32 %v874_v22, %v1465_v0  ;;  %v877_v26 = vadd.f32 %v1014_v24, %v836_v23 }
 0x393   :  { %882 = vst [vmem:[#allocation14] sm:$0xff] %v880_v25  ;;  %v881_v27 = vadd.f32 %v877_v26, %v1467_v1 }
 0x395   :  { %883 = vst [vmem:[#allocation14 + $0x8] sm:$0xff] %v881_v27 }
 0x396   :  { %1295 = shalt.err (!%p1292_p4)
}
 0x397   :  { %s1296_s19 = scalar_lea.hbm %s1549_s7, 256 }
 0x398   :  { %p1297_p5 = scmp.ne.s32.totalorder %s1549_s7, %s1296_s19  ;;  %p1300_p6 = scmp.lt.u32.totalorder %s1296_s19, %s1549_s7 }
 0x39a   :  { %p1302_p7 = pnand %p1300_p6, %p1297_p5 }
 0x39c   :  { %1305 = shalt.err (!%p1302_p7)
}
 0x39d   :  { %895 = dma.vmem_to_hbm [thread:$0]  %s890_s0, 256, %s1549_s7, [#allocation4], %s1324_s5, %s1324_s5, %s1325_s26  }
 0x39e   :  { %1314 = dma.done.wait [#allocation4], 256  }
 0x39f   :  { %1315 = vsyncadd [#allocation4], 4294967040 }
 0x3a0   :  { %899 = vsyncpa [#allocation3], 1 }
 0x3a1   :  { %900 = vsyncpa [#allocation6], 1 }
 0x3a2   :  { %901 = vsyncpa [#allocation9], 1 }
 0x3a3   :  { %902 = vsyncpa [#allocation12], 1 }
 0x3a4   :  { %903 = vsyncpa [#allocation4], 1 }

// kernel: transformer_module_forward.8
= control target key start
LH: loop header
LB: loop body
LE: loop exit
PB: predicated region body
PF: predicated region fallthrough
CT: control target
= control target key end

     0   :  { %s2913_s0 = inlined_call_operand.hbm [shape: bf16[16,384], index: 0, kind: input, shape index: {}]   ;;  %s2914_s1 = inlined_call_operand.hbm [shape: f32[16,128], index: 1, kind: input, shape index: {}]   ;;  %s2915_s2 = inlined_call_operand.hbm [shape: bf16[128,128], index: 2, kind: input, shape index: {}]   ;;  %s2916_s3 = inlined_call_operand.hbm [shape: f32[1,128], index: 3, kind: input, shape index: {}]   ;;  %s2917_s4 = inlined_call_operand.hbm [shape: f32[16,128], index: 4, kind: output, shape index: {}]  }
   0x1   :  { %2922 = sst [smem:[#allocation16_spill]] %s2913_s0 }
   0x2   :  { %2923 = sst [smem:[#allocation17_spill]] %s2915_s2 }
   0x3   :  { %9 = vsyncpa [#allocation3], 0 }
   0x4   :  { %11 = vsyncpa [#allocation3 + $0x1], 0 }
   0x5   :  { %12 = vsyncpa [#allocation6], 0 }
   0x6   :  { %14 = vsyncpa [#allocation6 + $0x1], 0 }
   0x7   :  { %15 = vsyncpa [#allocation9], 0 }
   0x8   :  { %16 = vsyncpa [#allocation4], 0 }
   0x9   :  { %18 = vsyncpa [#allocation4 + $0x1], 0  ;;  %s2425_s15 = smov 0   ;;  %s2427_s16 = smov 0  }
   0xa   :  { %s2429_s17 = smov 0   ;;  %s2431_s18 = smov 0  }
   0xb   :  { %s2433_s19 = smov 0   ;;  %s2435_s20 = smov 0  }
   0xc LB: > { %s2456_s21 = sadd.s32 4294967295, %s2382_s20   ;;  %s1783_s22 = sadd.s32 4294967294, %s2382_s20   ;;  %s2382_s20 = sphi %s2435_s20, %s24_s20   ;;  %s2378_s19 = sphi %s2433_s19, %s2948_s19   ;;  %s2374_s18 = sphi %s2431_s18, %s2947_s18   ;;  %s2370_s17 = sphi %s2429_s17, %s2946_s17   ;;  %s2366_s16 = sphi %s2427_s16, %s2945_s16   ;;  %s2362_s15 = sphi %s2425_s15, %s2944_s15  }
   0xd   : > { %p56_p0 = scmp.ne.s32.totalorder %s2366_s16, %s2362_s15  ;;  %p2918_p1 = scmp.eq.s32.totalorder %s2456_s21, 0 }
   0xe   : > { %p158_p3 = scmp.eq.s32.totalorder %s1783_s22, 1  ;;  %p1784_p5 = scmp.ge.s32.totalorder %s2382_s20, 1 }
   0xf   : > { %p2465_p4 = por %p2918_p1, %p56_p0  ;;  %p165_p7 = scmp.lt.s32.totalorder %s2382_s20, 3 }
  0x10   : > { %p2470_p6 = por %p158_p3, %p56_p0  ;;  %s2384_s26 = smov [#allocation7]  }
  0x11   : > { %s2924_s23 = scalar_select %p2465_p4, 1, 0 }
  0x12   : > { %s2925_s24 = scalar_select %p2470_p6, 1, 0 }
  0x13   : > { %p2475_p8 = pnand %p1784_p5, %p165_p7  ;;  %s177_s27 = sshll.u32 %s2384_s26, 4  ;;  %s2479_s27 = int_to_ptr.vmem [resolvable:$true] %s177_s27 }
  0x14   : > { %s2385_s29 = smov [#allocation8]   ;;  %s2928_s2 = sld [smem:[#allocation17_spill]] }
  0x15   : > { %s2926_s25 = scalar_select %p2475_p8, 1, 0 }
  0x16   : > { %p2045_p9 = pneg %p2475_p8  ;;  %s191_s30 = sshll.u32 %s2385_s29, 4  ;;  %s2490_s30 = int_to_ptr.vmem [resolvable:$true] %s191_s30 }
  0x18   : > { %p2486_p11 = pnand %p2045_p9, %p2918_p1 }
  0x1a   : > { %s2172_s7 = scalar_lea.hbm %s2928_s2, 1024  ;;  %p2174_p13 = pneg %p2486_p11 }
  0x1b   : > { %p2173_p12 = scmp.ne.s32.totalorder %s2928_s2, %s2172_s7  ;;  %p2179_p5 = scmp.lt.u32.totalorder %s2172_s7, %s2928_s2 }
  0x1d   : > { %p2175_p0 = pnand %p2174_p13, %p2173_p12 }
  0x1f   : > { %p2176_p3 = pneg %p2175_p0 }
  0x21   : > { %p2181_p7 = pnand %p2179_p5, %p2176_p3 }
  0x23   : > { %2184 = shalt.err (!%p2181_p7)
}
  0x24   : > { %s2185_s12 = scalar_lea.vmem %s2479_s27, 1024  ;;  %p2193_p2 = scmp.lt.s32.totalorder %s2479_s27, %s2479_s27 }
  0x25   : > { %p2186_p9 = scmp.ne.s32.totalorder %s2479_s27, %s2185_s12  ;;  %p2194_p12 = scmp.lt.s32.totalorder %s2185_s12, %s2185_s12 }
  0x27   : > { %p2188_p10 = pnand %p2186_p9, %p2174_p13  ;;  %p2195_p0 = por %p2194_p12, %p2193_p2 }
  0x29   : > { %p2189_p1 = pneg %p2188_p10 }
  0x2b   : > { %p2196_p6 = pnand %p2195_p0, %p2189_p1 }
  0x2d   : > { %2199 = shalt.err (!%p2196_p6)
}
  0x2e   : > { %s2386_s13 = smov 64   ;;  %s2387_s14 = smov 4  }
  0x2f   : > { %2048 = dma.hbm_to_vmem [thread:$0]  (!%p2486_p11), %s2928_s2, 1024, %s2479_s27, [#allocation6], %s2386_s13, %s2386_s13, %s2387_s14  }
  0x30   : > { %s2200_s6 = scalar_lea.hbm %s2916_s3, 16 }
  0x31   : > { %p2201_p2 = scmp.ne.s32.totalorder %s2916_s3, %s2200_s6  ;;  %p2207_p10 = scmp.lt.u32.totalorder %s2200_s6, %s2916_s3 }
  0x33   : > { %p2203_p1 = pnand %p2201_p2, %p2174_p13 }
  0x35   : > { %p2204_p6 = pneg %p2203_p1 }
  0x37   : > { %p2209_p3 = pnand %p2207_p10, %p2204_p6 }
  0x39   : > { %2212 = shalt.err (!%p2209_p3)
}
  0x3a   : > { %s2213_s27 = scalar_lea.vmem %s2490_s30, 16  ;;  %s2220_s11 = scalar_lea.vmem %s2490_s30, 32 }
  0x3b   : > { %p2214_p5 = scmp.ne.s32.totalorder %s2490_s30, %s2213_s27  ;;  %p2221_p12 = scmp.lt.s32.totalorder %s2490_s30, %s2490_s30 }
  0x3c   : > { %p2222_p0 = scmp.lt.s32.totalorder %s2220_s11, %s2213_s27 }
  0x3d   : > { %p2216_p7 = pnand %p2214_p5, %p2174_p13 }
  0x3e   : > { %p2223_p2 = por %p2222_p0, %p2221_p12 }
  0x3f   : > { %p2217_p9 = pneg %p2216_p7 }
  0x41   : > { %p2224_p1 = pnand %p2223_p2, %p2217_p9 }
  0x43   : > { %2227 = shalt.err (!%p2224_p1)
}
  0x44   : > { %2051 = dma.hbm_to_vmem [thread:$0]  (!%p2486_p11), %s2916_s3, 16, %s2490_s30, [#allocation9]  }
  0x45   : > { %s36_s14 = sadd.s32 1, %s2378_s19  ;;  %s43_s22 = sadd.s32 1, %s2370_s17 }
  0x46   : > { %p38_p13 = scmp.ge.s32.totalorder %s36_s14, 2  ;;  %p50_p6 = scmp.ne.s32.totalorder %s2370_s17, %s2366_s16 }
  0x47   : > { %p51_p10 = scmp.eq.s32.totalorder %s2382_s20, 0  ;;  %p2065_p3 = scmp.lt.s32.totalorder %s2382_s20, 2 }
  0x48   : > { %s2950_s14 = smov (%p38_p13, %s36_s14), 0  ;;  %p2929_p7 = scmp.eq.s32.totalorder %s2456_s21, 1 }
  0x49   : > { %p52_p5 = por %p51_p10, %p50_p6  ;;  %s40_s26 = ssub.s32 %s2378_s19, %s2950_s14 }
  0x4a   : > { %p2555_p9 = por %p2929_p7, %p50_p6  ;;  %s2562_s29 = sand.u32 1, %s2370_s17  }
  0x4b   : > { %p41_p11 = scmp.eq.s32.totalorder %s40_s26, 0  ;;  %s2028_s30 = smul.u32 12, %s2562_s29 }
  0x4c   : > { %s2930_s28 = scalar_select %p2555_p9, 1, 0 }
  0x4d   : > { %p2565_p12 = pnand %p2065_p3, %p52_p5  ;;  %s2029_s7 = smul.u32 192, %s2378_s19 }
  0x4e   : > { %s2570_s6 = scalar_select %p41_p11, %s2370_s17, %s43_s22  }
  0x4f   : > { %s206_s8 = scalar_lea.vmem [#allocation2], %s2028_s30  ;;  %s2932_s0 = sld [smem:[#allocation16_spill]] }
  0x50   : > { %s214_s9 = sshll.u32 %s206_s8, 4  ;;  %s203_s12 = scalar_lea.sflag [#allocation3], %s2562_s29  ;;  %s2578_s9 = int_to_ptr.vmem [resolvable:$true] %s214_s9 }
  0x51   : > { %p2230_p2 = pneg %p2565_p12 }
  0x55   : > { %s2576_s11 = scalar_lea.hbm %s2932_s0, %s2029_s7  ;;  %s2233_s30 = scalar_lea.hbm %s2932_s0, 384 }
  0x56   : > { %s2228_s13 = scalar_lea.hbm %s2576_s11, 192  ;;  %p2234_p6 = scmp.lt.u32.totalorder %s2576_s11, %s2932_s0 }
  0x57   : > { %p2229_p0 = scmp.ne.s32.totalorder %s2576_s11, %s2228_s13  ;;  %p2235_p10 = scmp.lt.u32.totalorder %s2233_s30, %s2228_s13 }
  0x58   : > { %p2237_p5 = scmp.lt.u32.totalorder %s2228_s13, %s2576_s11 }
  0x59   : > { %p2231_p1 = pnand %p2230_p2, %p2229_p0  ;;  %p2236_p3 = por %p2235_p10, %p2234_p6 }
  0x5b   : > { %p2232_p13 = pneg %p2231_p1  ;;  %p2238_p7 = por %p2237_p5, %p2236_p3 }
  0x5d   : > { %p2239_p11 = pnand %p2238_p7, %p2232_p13 }
  0x5f   : > { %2242 = shalt.err (!%p2239_p11)
}
  0x60   : > { %s2243_s10 = scalar_lea.vmem %s2578_s9, 192  ;;  %s2388_s27 = smov [#allocation2]  }
  0x61   : > { %p2244_p0 = scmp.ne.s32.totalorder %s2578_s9, %s2243_s10  ;;  %s2248_s22 = sshll.u32 %s2388_s27, 4  ;;  %s2249_s22 = int_to_ptr.vmem [resolvable:$false] %s2248_s22 }
  0x62   : > { %s2250_s26 = scalar_lea.vmem %s2249_s22, 384  ;;  %p2251_p4 = scmp.lt.s32.totalorder %s2578_s9, %s2249_s22 }
  0x63   : > { %p2246_p1 = pnand %p2244_p0, %p2230_p2  ;;  %p2252_p6 = scmp.lt.s32.totalorder %s2250_s26, %s2243_s10 }
  0x65   : > { %p2247_p9 = pneg %p2246_p1  ;;  %p2253_p10 = por %p2252_p6, %p2251_p4 }
  0x67   : > { %p2254_p3 = pnand %p2253_p10, %p2247_p9 }
  0x69   : > { %2257 = shalt.err (!%p2254_p3)
}
  0x6a   : > { %2055 = dma.hbm_to_vmem [thread:$0]  (!%p2565_p12), %s2576_s11, 192, %s2578_s9, %s203_s12  }
  0x6b   : > { %s221_s13 = sand.u32 1, %s2382_s20   ;;  %s1789_s30 = sshll.u32 %s2562_s29, 3 }
  0x6c   : > { %s1790_s7 = sshll.u32 %s2378_s19, 7  ;;  %s225_s8 = scalar_lea.vmem [#allocation5], %s1789_s30 }
  0x6d   : > { %s233_s27 = sshll.u32 %s225_s8, 4  ;;  %s2612_s10 = scalar_lea.hbm %s2914_s1, %s1790_s7  ;;  %s234_s27 = int_to_ptr.vmem [resolvable:$true] %s233_s27 }
  0x6e   : > { %s222_s26 = scalar_lea.sflag [#allocation6], %s221_s13  ;;  %s2258_s2 = scalar_lea.hbm %s2612_s10, 128 }
  0x6f   : > { %p2259_p4 = scmp.ne.s32.totalorder %s2612_s10, %s2258_s2  ;;  %s2263_s11 = scalar_lea.hbm %s2914_s1, 256 }
  0x70   : > { %p2264_p5 = scmp.lt.u32.totalorder %s2612_s10, %s2914_s1  ;;  %p2265_p7 = scmp.lt.u32.totalorder %s2263_s11, %s2258_s2 }
  0x71   : > { %p2261_p9 = pnand %p2259_p4, %p2230_p2  ;;  %p2267_p0 = scmp.lt.u32.totalorder %s2258_s2, %s2612_s10 }
  0x72   : > { %p2266_p11 = por %p2265_p7, %p2264_p5 }
  0x73   : > { %p2262_p13 = pneg %p2261_p9 }
  0x74   : > { %p2268_p1 = por %p2267_p0, %p2266_p11 }
  0x76   : > { %p2269_p6 = pnand %p2268_p1, %p2262_p13 }
  0x78   : > { %2272 = shalt.err (!%p2269_p6)
}
  0x79   : > { %s2273_s13 = scalar_lea.vmem %s234_s27, 128  ;;  %s2389_s30 = smov [#allocation5]  }
  0x7a   : > { %p2274_p10 = scmp.ne.s32.totalorder %s234_s27, %s2273_s13  ;;  %s2278_s7 = sshll.u32 %s2389_s30, 4  ;;  %s2279_s7 = int_to_ptr.vmem [resolvable:$false] %s2278_s7 }
  0x7b   : > { %s2280_s8 = scalar_lea.vmem %s2279_s7, 256  ;;  %p2281_p9 = scmp.lt.s32.totalorder %s234_s27, %s2279_s7 }
  0x7c   : > { %p2276_p3 = pnand %p2274_p10, %p2230_p2  ;;  %p2282_p8 = scmp.lt.s32.totalorder %s2280_s8, %s2273_s13 }
  0x7e   : > { %p2277_p4 = pneg %p2276_p3  ;;  %p2283_p5 = por %p2282_p8, %p2281_p9 }
  0x80   : > { %p2284_p7 = pnand %p2283_p5, %p2277_p4 }
  0x82   : > { %2287 = shalt.err (!%p2284_p7)
}
  0x83   : > { %2058 = dma.hbm_to_vmem [thread:$0]  (!%p2565_p12), %s2612_s10, 128, %s234_s27, %s222_s26  }
  0x84   : > { %p2933_p13 = scmp.ne.s32.totalorder %s2926_s25, 0 }
  0x85   : > { %s2636_s2 = sand.u32 (!%p2933_p13), 1, %s2366_s16   ;;  %p2934_p8 = scmp.ne.s32.totalorder (!%p2933_p13), %s2924_s23, 0 }
  0x86   : > { %242 = sbr.rel (%p2933_p13) target bundleno = 5111 (0x13f7), region = 36  ;;  %s245_s29 = scalar_lea.sflag (!%p2933_p13), [#allocation3], %s2636_s2 }
  0x87   : > { %s2030_s22 = smul.u32 (!%p2933_p13), 12, %s2636_s2 }
  0x89   : > { %s2640_s9 = scalar_lea.vmem (!%p2933_p13), [#allocation2], %s2030_s22 }
  0x8d   : > { %2341 = dma.done.wait (%p2934_p8), %s245_s29, 192  }
  0x8e   : > { %2343 = vsyncadd (%p2934_p8), %s245_s29, 4294967104  ;;  %s253_s25 = sand.u32 1, %s2456_s21   ;;  %s1792_s5 = sshll.u32 %s2636_s2, 3 }
  0x8f   : > { %s254_s27 = scalar_lea.sflag [#allocation6], %s253_s25  ;;  %s2650_s10 = scalar_lea.vmem [#allocation5], %s1792_s5 }
  0x90   : > { %2345 = dma.done.wait (%p2934_p8), %s254_s27, 128  }
  0x91   : > { %2347 = vsyncadd (%p2934_p8), %s254_s27, 4294967168  ;;  %p2935_p12 = scmp.eq.s32.totalorder %s2456_s21, 0 }
  0x93   : > { %2349 = dma.done.wait (%p2935_p12), [#allocation6], 1024   ;;  %p2936_p2 = pmov %p2935_p12 }
  0x95   : > { %2351 = vsyncadd (%p2936_p2), [#allocation6], 4294966272  ;;  %p2937_p11 = pmov %p2936_p2 }
  0x96   : > { %p2938_p0 = pmov %p2936_p2 }
  0x97   : > { %2353 = dma.done.wait (%p2937_p11), [#allocation9], 16  }
  0x98   : > { %2355 = vsyncadd (%p2938_p0), [#allocation9], 4294967280  ;;  %v2390_v0 = vmov 0.0   ;;  %vm2391_vm0 = vmmov 0   ;;  %v307_v1 = vld [vmem:[%s2640_s9] sm:$0xff]  ;;  %vm319_vm1 = vcmask 130048   ;;  %v309_v5 = vlaneseq }
  0x99   : > { %1884 = vmatprep.subr.bf16.mxu0 %v2390_v0  ;;  %1886 = vmatprep.mubr.msk.bf16.mxu0 %vm2391_vm0, %v2390_v0  ;;  %v2671_v2 = vcombine.high %v307_v1, %v307_v1  ;;  %v306_v4 = vmul.bf16 1048592000, %v307_v1  ;;  %vm367_vm3 = vcmask 64512   ;;  %s2392_s21 = smov 112   ;;  %v308_v21 = vld [vmem:[%s2640_s9 + $0x8] sm:$0xf] }
  0x9a   : > { %1890 = vmatprep.subr.bf16.mxu1 %v2390_v0  ;;  %1892 = vmatprep.mubr.msk.bf16.mxu1 %vm2391_vm0, %v2390_v0  ;;  %v310_v6 = vshrl.u32 %v309_v5, 7  ;;  %v314_v7 = vand.u32 127, %v309_v5  ;;  %vm383_vm4 = vcmask 1043456   ;;  %v2707_v40 = vcombine.low %v308_v21, %v308_v21  ;;  %v2133_v48 = vld [vmem:[#allocation7 + $0x8] sm:$0xff]   ;;  %s2393_s23 = smov 96   ;;  %v2132_v52 = vld [vmem:[#allocation7] sm:$0xff]  }
  0x9b   : > { %v324_v3 = vsel %vm319_vm1, %v2671_v2, 0  ;;  %v2686_v15 = vcombine.low %v306_v4, %v306_v4  ;;  %435 = vrot.lane.b32.xlu1 %v2671_v2, %s2392_s21  ;;  %v385_v22 = vsel %vm383_vm4, %v308_v21, 0  ;;  %s2394_s26 = smov 80   ;;  %s2395_s11 = smov 64  }
  0x9c   : > { %1885 = vmatpush3.bf16.xpose.msra.mxu0 %v324_v3  ;;  %vm2679_vm2 = vcmp.le.s32.totalorder %v314_v7, %v310_v6  ;;  %1891 = vmatpush3.bf16.msra.mxu1 %v385_v22  ;;  %s2396_s12 = smov 48   ;;  %s2397_s0 = smov 32  }
  0x9d   : > { %1902 = vmatprep.subr.bf16.mxu0 %v2390_v0  ;;  %1896 = vmatprep.subr.bf16.mxu1 %v2390_v0  ;;  %s2398_s13 = smov 16   ;;  %s1833_s30 = sshll.u32 %s2374_s18, 7 }
  0x9e   : > { %s294_s7 = scalar_lea.vmem [#allocation10], %s1792_s5  ;;  %s2864_s9 = scalar_lea.hbm %s2917_s4, %s1833_s30 }
  0x9f   : > { %433 = vrot.lane.b32.xlu1 %v2686_v15, %s2392_s21  ;;  %s1658_s8 = sshll.u32 %s294_s7, 4  ;;  %s1644_s25 = scalar_lea.sflag [#allocation4], %s2636_s2  ;;  %s2866_s8 = int_to_ptr.vmem [resolvable:$true] %s1658_s8 }
  0xa0   : > { %s2288_s27 = scalar_lea.vmem %s2866_s8, 128  ;;  %p2941_p6 = scmp.ne.s32.totalorder %s2930_s28, 0 }
  0xa1   : > { %p2289_p1 = scmp.ne.s32.totalorder %s2866_s8, %s2288_s27  ;;  %s2399_s18 = smov [#allocation10]  }
  0xa2   : > { %s2292_s5 = sshll.u32 %s2399_s18, 4  ;;  %s2293_s5 = int_to_ptr.vmem [resolvable:$false] %s2292_s5 }
  0xa3   : > { %1887 = vmatmul.mubr.msk.bf16.vlgmr.msra.gmra.mrb[0].mxu0 %vm319_vm1, %v306_v4  ;;  %p2290_p10 = pnand %p2289_p1, %p2941_p6  ;;  %p2295_p4 = scmp.lt.s32.totalorder %s2866_s8, %s2293_s5 }
  0xa4   : > { %1904 = vmatprep.mubr.msk.bf16.mxu0 %vm2391_vm0, %v2390_v0 }
  0xa5   : > { %p2291_p3 = pneg %p2290_p10 }
 0x10d   : > { %v436_v25 = vpop.permute.xlu1 %435 }
 0x10e   : > { %v441_v27 = vsel %vm319_vm1, %v436_v25, 0 }
 0x111   : > { %v434_v29 = vpop.permute.xlu1 %433 }
 0x176   : > { %v360_v9 = vpop.f32.mrb[0].mxu0 }
 0x177   : > { %v366_v10 = vsel %vm2679_vm2, %v360_v9, -1e+30  ;;  %v1888_v11 = vpop.f32.mrb[1].mxu0 }
 0x178   : > { %v363_v12 = vpop.f32.mrb[2].mxu0  ;;  %v368_v13 = vsel %vm367_vm3, %v366_v10, -inf }
 0x179   : > { %369 = vmax.xlane.f32.xlu0 %v368_v13  ;;  %v1889_v14 = vpop.f32.mrb[3].mxu0 }
 0x206   : > { %v370_v16 = vpop.xlane.xlu0 %369 }
 0x207   : > { %v371_v17 = vsub.f32 %v366_v10, %v370_v16 }
 0x209   : > { %v372_v18 = vmul.f32 1.442695, %v371_v17 }
 0x20b   : > { %2140 = vpow2.f32 %v372_v18 }
 0x215   : > { %v2141_v19 = vpop.eup %2140 }
 0x216   : > { %v374_v20 = vsel %vm367_vm3, %v2141_v19, 0.0 }
 0x217   : > { %375 = vadd.xlane.f32.xlu0 %v374_v20 }
 0x2a4   : > { %v376_v23 = vpop.xlane.xlu0 %375 }
 0x2a5   : > { %2142 = vrcp.f32 %v376_v23 }
 0x2af   : > { %v2143_v24 = vpop.eup %2142 }
 0x2b0   : > { %v378_v26 = vmul.f32 %v2143_v24, %v2141_v19 }
 0x2b2   : > { %v379_v28 = vpack.c.bf16 %v378_v26, %v378_v26 }
 0x2b4   : > { %1893 = vmatmul.mubr.msk.bf16.vlgmr.msra.gmra.mrb[0].mxu1 %vm367_vm3, %v379_v28 }
 0x2b5   : > { %1897 = vmatpush3.bf16.xpose.msra.mxu1 %v441_v27  ;;  %1898 = vmatprep.mubr.msk.bf16.mxu1 %vm2391_vm0, %v2390_v0 }
 0x2b6   : > { %1908 = vmatprep.subr.bf16.mxu1 %v2390_v0 }
 0x2bc   : > { %1899 = vmatmul.mubr.msk.bf16.vlgmr.msra.gmra.mrb[4].mxu1 %vm319_vm1, %v434_v29 }
 0x2bd   : > { %1910 = vmatprep.mubr.msk.bf16.mxu1 %vm2391_vm0, %v2390_v0  ;;  %1909 = vmatpush3.bf16.msra.mxu1 %v2133_v48 }
 0x2be   : > { %1920 = vmatprep.subr.bf16.mxu1 %v2390_v0 }
 0x387   : > { %v421_v30 = vpop.f32.mrb[0].mxu1 }
 0x388   : > { %v1894_v31 = vpop.f32.mrb[1].mxu1  ;;  %v427_v54 = vpack.c.bf16 %v421_v30, %v421_v30 }
 0x389   : > { %v424_v32 = vpop.f32.mrb[2].mxu1 }
 0x38a   : > { %v1895_v33 = vpop.f32.mrb[3].mxu1  ;;  %v2134_v32 = vld [vmem:[#allocation7 + $0x10] sm:$0xff]  }
 0x38f   : > { %v477_v34 = vpop.f32.mrb[4].mxu1 }
 0x390   : > { %v483_v35 = vsel %vm2679_vm2, %v477_v34, -1e+30  ;;  %v1900_v36 = vpop.f32.mrb[5].mxu1 }
 0x391   : > { %v480_v37 = vpop.f32.mrb[6].mxu1  ;;  %v484_v38 = vsel %vm367_vm3, %v483_v35, -inf }
 0x392   : > { %485 = vmax.xlane.f32.xlu0 %v484_v38  ;;  %v1901_v39 = vpop.f32.mrb[7].mxu1 }
 0x3a8   : > { %499 = vrot.lane.b32.xlu0 %v2707_v40, %s2392_s21 }
 0x3ac   : > { %650 = vrot.lane.b32.xlu0 %v2671_v2, %s2393_s23 }
 0x3b0   : > { %648 = vrot.lane.b32.xlu0 %v2686_v15, %s2393_s23 }
 0x41f   : > { %v486_v41 = vpop.xlane.xlu0 %485 }
 0x420   : > { %v487_v42 = vsub.f32 %v483_v35, %v486_v41 }
 0x422   : > { %v488_v43 = vmul.f32 1.442695, %v487_v42 }
 0x423   : > { %v500_v46 = vpop.permute.xlu0 %499 }
 0x424   : > { %2144 = vpow2.f32 %v488_v43  ;;  %v505_v47 = vsel %vm383_vm4, %v500_v46, 0 }
 0x425   : > { %1903 = vmatpush3.bf16.msra.mxu0 %v505_v47 }
 0x426   : > { %1914 = vmatprep.subr.bf16.mxu0 %v2390_v0 }
 0x427   : > { %v651_v55 = vpop.permute.xlu0 %650 }
 0x428   : > { %v656_v58 = vsel %vm319_vm1, %v651_v55, 0 }
 0x42b   : > { %v649_v63 = vpop.permute.xlu0 %648 }
 0x42e   : > { %v2145_v44 = vpop.eup %2144 }
 0x42f   : > { %v490_v45 = vsel %vm367_vm3, %v2145_v44, 0.0 }
 0x430   : > { %491 = vadd.xlane.f32.xlu1 %v490_v45 }
 0x441   : > { %711 = vrot.lane.b32.xlu1 %v2707_v40, %s2393_s23 }
 0x4bd   : > { %v492_v49 = vpop.xlane.xlu1 %491 }
 0x4be   : > { %2146 = vrcp.f32 %v492_v49 }
 0x4c1   : > { %v712_v18 = vpop.permute.xlu1 %711 }
 0x4c2   : > { %v717_v19 = vsel %vm383_vm4, %v712_v18, 0 }
 0x4c8   : > { %v2147_v50 = vpop.eup %2146 }
 0x4c9   : > { %v494_v51 = vmul.f32 %v2147_v50, %v2145_v44 }
 0x4cb   : > { %v495_v53 = vpack.c.bf16 %v494_v51, %v494_v51 }
 0x4cd   : > { %1905 = vmatmul.mubr.msk.bf16.vlgmr.msra.gmra.mrb[4].mxu0 %vm367_vm3, %v495_v53 }
 0x4ce   : > { %1915 = vmatpush3.bf16.msra.mxu0 %v2132_v52  ;;  %1916 = vmatprep.mubr.msk.bf16.mxu0 %vm2391_vm0, %v2390_v0 }
 0x4cf   : > { %1926 = vmatprep.subr.bf16.mxu0 %v2390_v0 }
 0x4d5   : > { %1917 = vmatmul.mubr.msk.bf16.vlgmr.msra.gmra.mrb[8].mxu0 %vm319_vm1, %v427_v54 }
 0x4d6   : > { %1928 = vmatprep.mubr.msk.bf16.mxu0 %vm2391_vm0, %v2390_v0  ;;  %1927 = vmatpush3.bf16.msra.mxu0 %v717_v19 }
 0x4d7   : > { %1938 = vmatprep.subr.bf16.mxu0 %v2390_v0 }
 0x5a0   : > { %v541_v56 = vpop.f32.mrb[4].mxu0 }
 0x5a1   : > { %v547_v57 = vpack.c.bf16 %v541_v56, %v541_v56  ;;  %v1906_v59 = vpop.f32.mrb[5].mxu0 }
 0x5a2   : > { %v544_v60 = vpop.f32.mrb[6].mxu0 }
 0x5a3   : > { %v1907_v61 = vpop.f32.mrb[7].mxu0  ;;  %1911 = vmatmul.mubr.msk.bf16.vlgmr.msra.gmra.mrb[8].mxu1 %vm319_vm1, %v547_v57 }
 0x5a4   : > { %1921 = vmatpush3.bf16.xpose.msra.mxu1 %v656_v58  ;;  %1922 = vmatprep.mubr.msk.bf16.mxu1 %vm2391_vm0, %v2390_v0 }
 0x5a5   : > { %1932 = vmatprep.subr.bf16.mxu1 %v2390_v0 }
 0x5a8   : > { %v642_v62 = vpop.f32.mrb[8].mxu0 }
 0x5a9   : > { %v1918_v1 = vpop.f32.mrb[9].mxu0 }
 0x5aa   : > { %v645_v3 = vpop.f32.mrb[10].mxu0  ;;  %v2135_v1 = vld [vmem:[#allocation7 + $0x18] sm:$0xff]  }
 0x5ab   : > { %v1919_v4 = vpop.f32.mrb[11].mxu0  ;;  %1923 = vmatmul.mubr.msk.bf16.vlgmr.msra.gmra.mrb[12].mxu1 %vm319_vm1, %v649_v63 }
 0x5ac   : > { %1934 = vmatprep.mubr.msk.bf16.mxu1 %vm2391_vm0, %v2390_v0  ;;  %1933 = vmatpush3.bf16.msra.mxu1 %v2134_v32 }
 0x5ad   : > { %1944 = vmatprep.subr.bf16.mxu1 %v2390_v0 }
 0x676   : > { %v593_v5 = vpop.f32.mrb[8].mxu1 }
 0x677   : > { %v2733_v6 = vadd.f32 %v642_v62, %v593_v5  ;;  %v1912_v7 = vpop.f32.mrb[9].mxu1 }
 0x678   : > { %v596_v9 = vpop.f32.mrb[10].mxu1 }
 0x679   : > { %v1913_v10 = vpop.f32.mrb[11].mxu1 }
 0x67e   : > { %v692_v11 = vpop.f32.mrb[12].mxu1 }
 0x67f   : > { %v698_v12 = vsel %vm2679_vm2, %v692_v11, -1e+30  ;;  %v1924_v13 = vpop.f32.mrb[13].mxu1 }
 0x680   : > { %v695_v14 = vpop.f32.mrb[14].mxu1  ;;  %v699_v16 = vsel %vm367_vm3, %v698_v12, -inf }
 0x681   : > { %700 = vmax.xlane.f32.xlu0 %v699_v16  ;;  %v1925_v17 = vpop.f32.mrb[15].mxu1 }
 0x70e   : > { %v701_v20 = vpop.xlane.xlu0 %700 }
 0x70f   : > { %v702_v21 = vsub.f32 %v698_v12, %v701_v20 }
 0x711   : > { %v703_v22 = vmul.f32 1.442695, %v702_v21 }
 0x713   : > { %2148 = vpow2.f32 %v703_v22 }
 0x71d   : > { %v2149_v23 = vpop.eup %2148 }
 0x71e   : > { %v705_v24 = vsel %vm367_vm3, %v2149_v23, 0.0 }
 0x71f   : > { %706 = vadd.xlane.f32.xlu1 %v705_v24 }
 0x730   : > { %814 = vrot.lane.b32.xlu1 %v2671_v2, %s2394_s26 }
 0x734   : > { %812 = vrot.lane.b32.xlu1 %v2686_v15, %s2394_s26 }
 0x7ac   : > { %v707_v25 = vpop.xlane.xlu1 %706 }
 0x7ad   : > { %2150 = vrcp.f32 %v707_v25 }
 0x7b0   : > { %v815_v27 = vpop.permute.xlu1 %814 }
 0x7b1   : > { %v820_v29 = vsel %vm319_vm1, %v815_v27, 0 }
 0x7b4   : > { %v813_v31 = vpop.permute.xlu1 %812 }
 0x7b7   : > { %v2151_v26 = vpop.eup %2150 }
 0x7b8   : > { %v709_v28 = vmul.f32 %v2151_v26, %v2149_v23 }
 0x7ba   : > { %v710_v30 = vpack.c.bf16 %v709_v28, %v709_v28 }
 0x7bc   : > { %1929 = vmatmul.mubr.msk.bf16.vlgmr.msra.gmra.mrb[12].mxu0 %vm367_vm3, %v710_v30 }
 0x7bd   : > { %1939 = vmatpush3.bf16.xpose.msra.mxu0 %v820_v29  ;;  %1940 = vmatprep.mubr.msk.bf16.mxu0 %vm2391_vm0, %v2390_v0 }
 0x7be   : > { %1950 = vmatprep.subr.bf16.mxu0 %v2390_v0 }
 0x7c4   : > { %1941 = vmatmul.mubr.msk.bf16.vlgmr.msra.gmra.mrb[16].mxu0 %vm319_vm1, %v813_v31 }
 0x7c5   : > { %1952 = vmatprep.mubr.msk.bf16.mxu0 %vm2391_vm0, %v2390_v0  ;;  %1951 = vmatpush3.bf16.msra.mxu0 %v2135_v1 }
 0x7c6   : > { %1962 = vmatprep.subr.bf16.mxu0 %v2390_v0 }
 0x88f   : > { %v753_v33 = vpop.f32.mrb[12].mxu0 }
 0x890   : > { %v759_v34 = vpack.c.bf16 %v753_v33, %v753_v33  ;;  %v1930_v35 = vpop.f32.mrb[13].mxu0 }
 0x891   : > { %v756_v36 = vpop.f32.mrb[14].mxu0  ;;  %v2136_v35 = vld [vmem:[#allocation7 + $0x20] sm:$0xff]  }
 0x892   : > { %v1931_v37 = vpop.f32.mrb[15].mxu0  ;;  %1935 = vmatmul.mubr.msk.bf16.vlgmr.msra.gmra.mrb[16].mxu1 %vm319_vm1, %v759_v34 }
 0x893   : > { %1946 = vmatprep.mubr.msk.bf16.mxu1 %vm2391_vm0, %v2390_v0 }
 0x897   : > { %v856_v38 = vpop.f32.mrb[16].mxu0 }
 0x898   : > { %v862_v39 = vsel %vm2679_vm2, %v856_v38, -1e+30  ;;  %v1942_v41 = vpop.f32.mrb[17].mxu0 }
 0x899   : > { %v859_v42 = vpop.f32.mrb[18].mxu0  ;;  %v863_v43 = vsel %vm367_vm3, %v862_v39, -inf }
 0x89a   : > { %864 = vmax.xlane.f32.xlu0 %v863_v43  ;;  %v1943_v44 = vpop.f32.mrb[19].mxu0 }
 0x8b0   : > { %875 = vrot.lane.b32.xlu0 %v2707_v40, %s2394_s26 }
 0x8b4   : > { %978 = vrot.lane.b32.xlu0 %v2671_v2, %s2395_s11 }
 0x8b8   : > { %976 = vrot.lane.b32.xlu0 %v2686_v15, %s2395_s11 }
 0x927   : > { %v865_v45 = vpop.xlane.xlu0 %864 }
 0x928   : > { %v866_v46 = vsub.f32 %v862_v39, %v865_v45 }
 0x92a   : > { %v867_v47 = vmul.f32 1.442695, %v866_v46 }
 0x92b   : > { %v876_v50 = vpop.permute.xlu0 %875 }
 0x92c   : > { %2152 = vpow2.f32 %v867_v47  ;;  %v881_v51 = vsel %vm383_vm4, %v876_v50, 0 }
 0x92d   : > { %1945 = vmatpush3.bf16.msra.mxu1 %v881_v51 }
 0x92e   : > { %1956 = vmatprep.subr.bf16.mxu1 %v2390_v0 }
 0x92f   : > { %v979_v59 = vpop.permute.xlu0 %978 }
 0x930   : > { %v984_v61 = vsel %vm319_vm1, %v979_v59, 0 }
 0x933   : > { %v977_v63 = vpop.permute.xlu0 %976 }
 0x936   : > { %v2153_v48 = vpop.eup %2152 }
 0x937   : > { %v869_v49 = vsel %vm367_vm3, %v2153_v48, 0.0 }
 0x938   : > { %870 = vadd.xlane.f32.xlu1 %v869_v49 }
 0x949   : > { %1039 = vrot.lane.b32.xlu1 %v2707_v40, %s2395_s11 }
 0x965   : > { %v805_v52 = vpop.f32.mrb[16].mxu1 }
 0x966   : > { %v811_v53 = vadd.f32 %v805_v52, %v2733_v6  ;;  %v1936_v54 = vpop.f32.mrb[17].mxu1 }
 0x967   : > { %v808_v55 = vpop.f32.mrb[18].mxu1 }
 0x968   : > { %v1937_v56 = vpop.f32.mrb[19].mxu1 }
 0x9c5   : > { %v871_v57 = vpop.xlane.xlu1 %870 }
 0x9c6   : > { %2154 = vrcp.f32 %v871_v57 }
 0x9c9   : > { %v1040_v16 = vpop.permute.xlu1 %1039 }
 0x9ca   : > { %v1045_v17 = vsel %vm383_vm4, %v1040_v16, 0 }
 0x9d0   : > { %v2155_v58 = vpop.eup %2154 }
 0x9d1   : > { %v873_v60 = vmul.f32 %v2155_v58, %v2153_v48 }
 0x9d3   : > { %v874_v62 = vpack.c.bf16 %v873_v60, %v873_v60 }
 0x9d5   : > { %1947 = vmatmul.mubr.msk.bf16.vlgmr.msra.gmra.mrb[20].mxu1 %vm367_vm3, %v874_v62 }
 0x9d6   : > { %1957 = vmatpush3.bf16.xpose.msra.mxu1 %v984_v61  ;;  %1958 = vmatprep.mubr.msk.bf16.mxu1 %vm2391_vm0, %v2390_v0 }
 0x9d7   : > { %1968 = vmatprep.subr.bf16.mxu1 %v2390_v0 }
 0x9dd   : > { %1959 = vmatmul.mubr.msk.bf16.vlgmr.msra.gmra.mrb[24].mxu1 %vm319_vm1, %v977_v63 }
 0x9de   : > { %1970 = vmatprep.mubr.msk.bf16.mxu1 %vm2391_vm0, %v2390_v0  ;;  %1969 = vmatpush3.bf16.msra.mxu1 %v2136_v35 }
 0x9df   : > { %1980 = vmatprep.subr.bf16.mxu1 %v2390_v0 }
 0xaa8   : > { %v917_v3 = vpop.f32.mrb[20].mxu1 }
 0xaa9   : > { %v923_v4 = vpack.c.bf16 %v917_v3, %v917_v3  ;;  %v1948_v5 = vpop.f32.mrb[21].mxu1 }
 0xaaa   : > { %v920_v6 = vpop.f32.mrb[22].mxu1  ;;  %v2137_v5 = vld [vmem:[#allocation7 + $0x28] sm:$0xff]  }
 0xaab   : > { %v1949_v7 = vpop.f32.mrb[23].mxu1  ;;  %1953 = vmatmul.mubr.msk.bf16.vlgmr.msra.gmra.mrb[20].mxu0 %vm319_vm1, %v923_v4 }
 0xaac   : > { %1964 = vmatprep.mubr.msk.bf16.mxu0 %vm2391_vm0, %v2390_v0  ;;  %1963 = vmatpush3.bf16.msra.mxu0 %v1045_v17 }
 0xaad   : > { %1974 = vmatprep.subr.bf16.mxu0 %v2390_v0 }
 0xab0   : > { %v1020_v9 = vpop.f32.mrb[24].mxu1 }
 0xab1   : > { %v1026_v10 = vsel %vm2679_vm2, %v1020_v9, -1e+30  ;;  %v1960_v11 = vpop.f32.mrb[25].mxu1 }
 0xab2   : > { %v1023_v12 = vpop.f32.mrb[26].mxu1  ;;  %v1027_v13 = vsel %vm367_vm3, %v1026_v10, -inf }
 0xab3   : > { %1028 = vmax.xlane.f32.xlu0 %v1027_v13  ;;  %v1961_v14 = vpop.f32.mrb[27].mxu1 }
 0xb40   : > { %v1029_v18 = vpop.xlane.xlu0 %1028 }
 0xb41   : > { %v1030_v19 = vsub.f32 %v1026_v10, %v1029_v18 }
 0xb43   : > { %v1031_v20 = vmul.f32 1.442695, %v1030_v19 }
 0xb45   : > { %2156 = vpow2.f32 %v1031_v20 }
 0xb4f   : > { %v2157_v21 = vpop.eup %2156 }
 0xb50   : > { %v1033_v22 = vsel %vm367_vm3, %v2157_v21, 0.0 }
 0xb51   : > { %1034 = vadd.xlane.f32.xlu1 %v1033_v22 }
 0xb62   : > { %1142 = vrot.lane.b32.xlu1 %v2671_v2, %s2396_s12 }
 0xb66   : > { %1140 = vrot.lane.b32.xlu1 %v2686_v15, %s2396_s12 }
 0xb7e   : > { %v969_v23 = vpop.f32.mrb[20].mxu0 }
 0xb7f   : > { %v975_v24 = vadd.f32 %v969_v23, %v811_v53  ;;  %v1954_v25 = vpop.f32.mrb[21].mxu0 }
 0xb80   : > { %v972_v26 = vpop.f32.mrb[22].mxu0 }
 0xb81   : > { %v1955_v27 = vpop.f32.mrb[23].mxu0 }
 0xbde   : > { %v1035_v28 = vpop.xlane.xlu1 %1034 }
 0xbdf   : > { %2158 = vrcp.f32 %v1035_v28 }
 0xbe2   : > { %v1143_v30 = vpop.permute.xlu1 %1142 }
 0xbe3   : > { %v1148_v32 = vsel %vm319_vm1, %v1143_v30, 0 }
 0xbe6   : > { %v1141_v34 = vpop.permute.xlu1 %1140 }
 0xbe9   : > { %v2159_v29 = vpop.eup %2158 }
 0xbea   : > { %v1037_v31 = vmul.f32 %v2159_v29, %v2157_v21 }
 0xbec   : > { %v1038_v33 = vpack.c.bf16 %v1037_v31, %v1037_v31 }
 0xbee   : > { %1965 = vmatmul.mubr.msk.bf16.vlgmr.msra.gmra.mrb[24].mxu0 %vm367_vm3, %v1038_v33 }
 0xbef   : > { %1975 = vmatpush3.bf16.xpose.msra.mxu0 %v1148_v32  ;;  %1976 = vmatprep.mubr.msk.bf16.mxu0 %vm2391_vm0, %v2390_v0 }
 0xbf0   : > { %1986 = vmatprep.subr.bf16.mxu0 %v2390_v0 }
 0xbf6   : > { %1977 = vmatmul.mubr.msk.bf16.vlgmr.msra.gmra.mrb[28].mxu0 %vm319_vm1, %v1141_v34 }
 0xbf7   : > { %1988 = vmatprep.mubr.msk.bf16.mxu0 %vm2391_vm0, %v2390_v0  ;;  %1987 = vmatpush3.bf16.msra.mxu0 %v2137_v5 }
 0xbf8   : > { %1998 = vmatprep.subr.bf16.mxu0 %v2390_v0 }
 0xcc1   : > { %v1081_v36 = vpop.f32.mrb[24].mxu0 }
 0xcc2   : > { %v1087_v37 = vpack.c.bf16 %v1081_v36, %v1081_v36  ;;  %v1966_v38 = vpop.f32.mrb[25].mxu0 }
 0xcc3   : > { %v1084_v39 = vpop.f32.mrb[26].mxu0 }
 0xcc4   : > { %v1967_v41 = vpop.f32.mrb[27].mxu0  ;;  %1971 = vmatmul.mubr.msk.bf16.vlgmr.msra.gmra.mrb[28].mxu1 %vm319_vm1, %v1087_v37 }
 0xcc5   : > { %1982 = vmatprep.mubr.msk.bf16.mxu1 %vm2391_vm0, %v2390_v0 }
 0xcc9   : > { %v1184_v42 = vpop.f32.mrb[28].mxu0 }
 0xcca   : > { %v1190_v43 = vsel %vm2679_vm2, %v1184_v42, -1e+30  ;;  %v1978_v44 = vpop.f32.mrb[29].mxu0 }
 0xccb   : > { %v1187_v45 = vpop.f32.mrb[30].mxu0  ;;  %v1191_v46 = vsel %vm367_vm3, %v1190_v43, -inf }
 0xccc   : > { %1192 = vmax.xlane.f32.xlu0 %v1191_v46  ;;  %v1979_v47 = vpop.f32.mrb[31].mxu0 }
 0xce2   : > { %1203 = vrot.lane.b32.xlu0 %v2707_v40, %s2396_s12 }
 0xce6   : > { %1306 = vrot.lane.b32.xlu0 %v2671_v2, %s2397_s0 }
 0xcea   : > { %1304 = vrot.lane.b32.xlu0 %v2686_v15, %s2397_s0 }
 0xd59   : > { %v1193_v48 = vpop.xlane.xlu0 %1192 }
 0xd5a   : > { %v1194_v49 = vsub.f32 %v1190_v43, %v1193_v48 }
 0xd5c   : > { %v1195_v50 = vmul.f32 1.442695, %v1194_v49 }
 0xd5d   : > { %v1204_v53 = vpop.permute.xlu0 %1203 }
 0xd5e   : > { %2160 = vpow2.f32 %v1195_v50  ;;  %v1209_v54 = vsel %vm383_vm4, %v1204_v53, 0 }
 0xd5f   : > { %1981 = vmatpush3.bf16.msra.mxu1 %v1209_v54  ;;  %v2139_v54 = vld [vmem:[#allocation7 + $0x38] sm:$0xff]  }
 0xd60   : > { %1992 = vmatprep.subr.bf16.mxu1 %v2390_v0 }
 0xd61   : > { %v1307_v62 = vpop.permute.xlu0 %1306 }
 0xd62   : > { %v1312_v1 = vsel %vm319_vm1, %v1307_v62, 0 }
 0xd65   : > { %v1305_v4 = vpop.permute.xlu0 %1304 }
 0xd68   : > { %v2161_v51 = vpop.eup %2160 }
 0xd69   : > { %v1197_v52 = vsel %vm367_vm3, %v2161_v51, 0.0 }
 0xd6a   : > { %1198 = vadd.xlane.f32.xlu1 %v1197_v52 }
 0xd7b   : > { %1367 = vrot.lane.b32.xlu1 %v2707_v40, %s2397_s0 }
 0xd97   : > { %v1133_v55 = vpop.f32.mrb[28].mxu1 }
 0xd98   : > { %v1139_v56 = vadd.f32 %v1133_v55, %v975_v24  ;;  %v1972_v57 = vpop.f32.mrb[29].mxu1 }
 0xd99   : > { %v1136_v58 = vpop.f32.mrb[30].mxu1 }
 0xd9a   : > { %v1973_v59 = vpop.f32.mrb[31].mxu1 }
 0xdf7   : > { %v1199_v60 = vpop.xlane.xlu1 %1198 }
 0xdf8   : > { %2162 = vrcp.f32 %v1199_v60 }
 0xdfb   : > { %v1368_v19 = vpop.permute.xlu1 %1367 }
 0xdfc   : > { %v1373_v20 = vsel %vm383_vm4, %v1368_v19, 0 }
 0xe02   : > { %v2163_v61 = vpop.eup %2162 }
 0xe03   : > { %v1201_v63 = vmul.f32 %v2163_v61, %v2161_v51 }
 0xe05   : > { %v1202_v3 = vpack.c.bf16 %v1201_v63, %v1201_v63 }
 0xe07   : > { %1983 = vmatmul.mubr.msk.bf16.vlgmr.msra.gmra.mrb[32].mxu1 %vm367_vm3, %v1202_v3 }
 0xe08   : > { %1993 = vmatpush3.bf16.xpose.msra.mxu1 %v1312_v1  ;;  %1994 = vmatprep.mubr.msk.bf16.mxu1 %vm2391_vm0, %v2390_v0 }
 0xe09   : > { %2004 = vmatprep.subr.bf16.mxu1 %v2390_v0 }
 0xe0f   : > { %1995 = vmatmul.mubr.msk.bf16.vlgmr.msra.gmra.mrb[36].mxu1 %vm319_vm1, %v1305_v4 }
 0xe10   : > { %2006 = vmatprep.mubr.msk.bf16.mxu1 %vm2391_vm0, %v2390_v0 }
 0xeda   : > { %v1245_v6 = vpop.f32.mrb[32].mxu1 }
 0xedb   : > { %v1251_v7 = vpack.c.bf16 %v1245_v6, %v1245_v6  ;;  %v1984_v9 = vpop.f32.mrb[33].mxu1 }
 0xedc   : > { %v1248_v10 = vpop.f32.mrb[34].mxu1 }
 0xedd   : > { %v1985_v11 = vpop.f32.mrb[35].mxu1  ;;  %1989 = vmatmul.mubr.msk.bf16.vlgmr.msra.gmra.mrb[32].mxu0 %vm319_vm1, %v1251_v7  ;;  %v1632_v7 = vld [vmem:[%s2650_s10] sm:$0xff]  ;;  %s2294_s10 = scalar_lea.vmem %s2293_s5, 256 }
 0xede   : > { %2000 = vmatprep.mubr.msk.bf16.mxu0 %vm2391_vm0, %v2390_v0  ;;  %1999 = vmatpush3.bf16.msra.mxu0 %v1373_v20  ;;  %v1831_v11 = vld [vmem:[#allocation8] ss:$0 sm:$0xff]  ;;  %p2296_p9 = scmp.lt.s32.totalorder %s2294_s10, %s2288_s27 }
 0xedf   : > { %2010 = vmatprep.subr.bf16.mxu0 %v2390_v0 }
 0xee0   : > { %p2297_p5 = por %p2296_p9, %p2295_p4 }
 0xee2   : > { %v1348_v12 = vpop.f32.mrb[36].mxu1  ;;  %p2298_p7 = pnand %p2297_p5, %p2291_p3 }
 0xee3   : > { %v1354_v13 = vsel %vm2679_vm2, %v1348_v12, -1e+30  ;;  %v1996_v14 = vpop.f32.mrb[37].mxu1 }
 0xee4   : > { %v1351_v16 = vpop.f32.mrb[38].mxu1  ;;  %v1355_v17 = vsel %vm367_vm3, %v1354_v13, -inf }
 0xee5   : > { %1356 = vmax.xlane.f32.xlu0 %v1355_v17  ;;  %v1997_v18 = vpop.f32.mrb[39].mxu1 }
 0xf72   : > { %v1357_v21 = vpop.xlane.xlu0 %1356 }
 0xf73   : > { %v1358_v22 = vsub.f32 %v1354_v13, %v1357_v21 }
 0xf75   : > { %v1359_v23 = vmul.f32 1.442695, %v1358_v22 }
 0xf77   : > { %2164 = vpow2.f32 %v1359_v23 }
 0xf81   : > { %v2165_v24 = vpop.eup %2164 }
 0xf82   : > { %v1361_v25 = vsel %vm367_vm3, %v2165_v24, 0.0 }
 0xf83   : > { %1362 = vadd.xlane.f32.xlu1 %v1361_v25 }
 0xf94   : > { %1470 = vrot.lane.b32.xlu1 %v2671_v2, %s2398_s13 }
 0xf98   : > { %1468 = vrot.lane.b32.xlu1 %v2686_v15, %s2398_s13  ;;  %v2138_v15 = vld [vmem:[#allocation7 + $0x30] sm:$0xff]  }
 0xf99   : > { %2005 = vmatpush3.bf16.msra.mxu1 %v2138_v15 }
 0xf9a   : > { %2016 = vmatprep.subr.bf16.mxu1 %v2390_v0 }
 0xfb0   : > { %v1297_v26 = vpop.f32.mrb[32].mxu0 }
 0xfb1   : > { %v1303_v27 = vadd.f32 %v1297_v26, %v1139_v56  ;;  %v1990_v28 = vpop.f32.mrb[33].mxu0 }
 0xfb2   : > { %v1300_v29 = vpop.f32.mrb[34].mxu0 }
 0xfb3   : > { %v1991_v30 = vpop.f32.mrb[35].mxu0 }
0x1010   : > { %v1363_v31 = vpop.xlane.xlu1 %1362 }
0x1011   : > { %2166 = vrcp.f32 %v1363_v31 }
0x1014   : > { %v1471_v33 = vpop.permute.xlu1 %1470 }
0x1015   : > { %v1476_v35 = vsel %vm319_vm1, %v1471_v33, 0 }
0x1018   : > { %v1469_v2 = vpop.permute.xlu1 %1468 }
0x101b   : > { %v2167_v32 = vpop.eup %2166 }
0x101c   : > { %v1365_v34 = vmul.f32 %v2167_v32, %v2165_v24 }
0x101e   : > { %v1366_v36 = vpack.c.bf16 %v1365_v34, %v1365_v34 }
0x1020   : > { %2001 = vmatmul.mubr.msk.bf16.vlgmr.msra.gmra.mrb[36].mxu0 %vm367_vm3, %v1366_v36 }
0x1021   : > { %2011 = vmatpush3.bf16.xpose.msra.mxu0 %v1476_v35  ;;  %2012 = vmatprep.mubr.msk.bf16.mxu0 %vm2391_vm0, %v2390_v0 }
0x1022   : > { %2022 = vmatprep.subr.bf16.mxu0 %v2390_v0 }
0x1028   : > { %2013 = vmatmul.mubr.msk.bf16.vlgmr.msra.gmra.mrb[40].mxu0 %vm319_vm1, %v1469_v2 }
0x1029   : > { %2024 = vmatprep.mubr.msk.bf16.mxu0 %vm2391_vm0, %v2390_v0  ;;  %2023 = vmatpush3.bf16.msra.mxu0 %v2139_v54 }
0x10f3   : > { %v1409_v37 = vpop.f32.mrb[36].mxu0 }
0x10f4   : > { %v1415_v38 = vpack.c.bf16 %v1409_v37, %v1409_v37  ;;  %v2002_v39 = vpop.f32.mrb[37].mxu0 }
0x10f5   : > { %v1412_v41 = vpop.f32.mrb[38].mxu0 }
0x10f6   : > { %v2003_v42 = vpop.f32.mrb[39].mxu0  ;;  %2007 = vmatmul.mubr.msk.bf16.vlgmr.msra.gmra.mrb[40].mxu1 %vm319_vm1, %v1415_v38 }
0x10f7   : > { %2018 = vmatprep.mubr.msk.bf16.mxu1 %vm2391_vm0, %v2390_v0 }
0x10fb   : > { %v1512_v43 = vpop.f32.mrb[40].mxu0 }
0x10fc   : > { %v1518_v44 = vsel %vm2679_vm2, %v1512_v43, -1e+30  ;;  %v2014_v45 = vpop.f32.mrb[41].mxu0 }
0x10fd   : > { %v1515_v46 = vpop.f32.mrb[42].mxu0  ;;  %v1519_v47 = vsel %vm367_vm3, %v1518_v44, -inf }
0x10fe   : > { %1520 = vmax.xlane.f32.xlu0 %v1519_v47  ;;  %v2015_v48 = vpop.f32.mrb[43].mxu0 }
0x1114   : > { %1531 = vrot.lane.b32.xlu0 %v2707_v40, %s2398_s13 }
0x118b   : > { %v1521_v49 = vpop.xlane.xlu0 %1520 }
0x118c   : > { %v1522_v50 = vsub.f32 %v1518_v44, %v1521_v49 }
0x118e   : > { %v1523_v51 = vmul.f32 1.442695, %v1522_v50 }
0x118f   : > { %v1532_v53 = vpop.permute.xlu0 %1531 }
0x1190   : > { %2168 = vpow2.f32 %v1523_v51  ;;  %v1537_v8 = vsel %vm383_vm4, %v1532_v53, 0 }
0x1191   : > { %2017 = vmatpush3.bf16.msra.mxu1 %v1537_v8 }
0x119a   : > { %v2169_v52 = vpop.eup %2168 }
0x119b   : > { %v1525_v0 = vsel %vm367_vm3, %v2169_v52, 0.0 }
0x119c   : > { %1526 = vadd.xlane.f32.xlu1 %v1525_v0 }
0x11c9   : > { %v1461_v55 = vpop.f32.mrb[40].mxu1 }
0x11ca   : > { %v1467_v56 = vadd.f32 %v1461_v55, %v1303_v27  ;;  %v2008_v57 = vpop.f32.mrb[41].mxu1 }
0x11cb   : > { %v1464_v58 = vpop.f32.mrb[42].mxu1 }
0x11cc   : > { %v2009_v40 = vpop.f32.mrb[43].mxu1 }
0x1229   : > { %v1527_v59 = vpop.xlane.xlu1 %1526 }
0x122a   : > { %2170 = vrcp.f32 %v1527_v59 }
0x1234   : > { %v2171_v60 = vpop.eup %2170 }
0x1235   : > { %v1529_v61 = vmul.f32 %v2171_v60, %v2169_v52 }
0x1237   : > { %v1530_v62 = vpack.c.bf16 %v1529_v61, %v1529_v61 }
0x1239   : > { %2019 = vmatmul.mubr.msk.bf16.vlgmr.msra.gmra.mrb[44].mxu1 %vm367_vm3, %v1530_v62 }
0x130c   : > { %v1573_v63 = vpop.f32.mrb[44].mxu1 }
0x130d   : > { %v1579_v1 = vpack.c.bf16 %v1573_v63, %v1573_v63  ;;  %v2020_v3 = vpop.f32.mrb[45].mxu1 }
0x130e   : > { %v1576_v4 = vpop.f32.mrb[46].mxu1 }
0x130f   : > { %v2021_v5 = vpop.f32.mrb[47].mxu1  ;;  %2025 = vmatmul.mubr.msk.bf16.vlgmr.msra.gmra.mrb[44].mxu0 %vm319_vm1, %v1579_v1 }
0x13e2   : > { %v1625_v6 = vpop.f32.mrb[44].mxu0 }
0x13e3   : > { %v1631_v9 = vadd.f32 %v1625_v6, %v1467_v56  ;;  %v2026_v10 = vpop.f32.mrb[45].mxu0 }
0x13e4   : > { %v1628_v12 = vpop.f32.mrb[46].mxu0 }
0x13e5   : > { %v1633_v13 = vadd.f32 %v1632_v7, %v1631_v9  ;;  %v2027_v14 = vpop.f32.mrb[47].mxu0 }
0x13e7   : > { %v1641_v16 = vadd.f32 %v1831_v11, %v1633_v13 }
0x13e9   : > { %1642 = vst [vmem:[%s294_s7] sm:$0xff] %v1641_v16 }
0x13ea   : > { %2301 = shalt.err (!%p2298_p7)
}
0x13eb   : > { %s2302_s2 = scalar_lea.hbm %s2864_s9, 128  ;;  %s2306_s26 = scalar_lea.hbm %s2917_s4, 256 }
0x13ec   : > { %p2303_p13 = scmp.ne.s32.totalorder %s2864_s9, %s2302_s2  ;;  %p2307_p2 = scmp.lt.u32.totalorder %s2864_s9, %s2917_s4 }
0x13ed   : > { %p2308_p11 = scmp.lt.u32.totalorder %s2306_s26, %s2302_s2  ;;  %p2310_p1 = scmp.lt.u32.totalorder %s2302_s2, %s2864_s9 }
0x13ee   : > { %p2304_p8 = pnand %p2303_p13, %p2941_p6 }
0x13ef   : > { %p2309_p0 = por %p2308_p11, %p2307_p2 }
0x13f0   : > { %p2305_p12 = pneg %p2304_p8 }
0x13f1   : > { %p2311_p10 = por %p2310_p1, %p2309_p0 }
0x13f3   : > { %p2312_p3 = pnand %p2311_p10, %p2305_p12 }
0x13f5   : > { %2315 = shalt.err (!%p2312_p3)
}
0x13f6   : > { %2043 = dma.vmem_to_hbm [thread:$0]  (%p2941_p6), %s2866_s8, 128, %s2864_s9, %s1644_s25  }
0x13f7 PF: > { %s1670_s0 = sand.u32 1, %s2362_s15   ;;  %p2942_p4 = scmp.ne.s32.totalorder %s2925_s24, 0 }
0x13f8   : > { %p2943_p9 = scmp.ge.s32.totalorder %s2382_s20, 2  ;;  %s1671_s13 = scalar_lea.sflag [#allocation4], %s1670_s0 }
0x13fa   : > { %p2060_p5 = pnand %p2943_p9, %p2942_p4 }
0x13fc   : > { %2357 = dma.done.wait (!%p2060_p5), %s1671_s13, 128  }
0x13fd   : > { %2359 = vsyncadd (!%p2060_p5), %s1671_s13, 4294967168  ;;  %s24_s20 = sadd.s32 1, %s2382_s20   ;;  %s2944_s15 = smov %s2366_s16 }
0x13fe   : > { %p21_p7 = scmp.ge.s32.totalorder %s24_s20, 4   ;;  %s2945_s16 = smov %s2370_s17 }
0x13ff   : > { %s2946_s17 = smov %s2570_s6  ;;  %s2947_s18 = smov %s2378_s19 }
0x1400   : > { %s2948_s19 = smov %s2950_s14  ;;  %23 = sbr.rel (!%p21_p7) target bundleno = 12 (0xc), region = 103 }
0x1407   :  { %1676 = vsyncpa [#allocation3], 1 }
0x1408   :  { %1678 = vsyncpa [#allocation3 + $0x1], 1 }
0x1409   :  { %1679 = vsyncpa [#allocation6], 1 }
0x140a   :  { %1681 = vsyncpa [#allocation6 + $0x1], 1 }
0x140b   :  { %1682 = vsyncpa [#allocation9], 1 }
0x140c   :  { %1683 = vsyncpa [#allocation4], 1 }
0x140d   :  { %1685 = vsyncpa [#allocation4 + $0x1], 1 }

</bundles_post_ra>
